<compile_context>
chip_gen: v6e
topology: v6e:2x2x1
jax: 0.10.0
libtpu: 0.0.40
codegen_flags: <defaults>
</compile_context>

<pallas_src>
import functools
import math

import jax
import jax.numpy as jnp
from jax.experimental import pallas as pl
from jax.experimental.pallas import tpu as pltpu


def _round_up(v, m):
    return ((v + m - 1) // m) * m


# ----------------------------------------------------------------------------
# Pallas kernel: 3x3 conv (pad=1, stride 1 or 2) + bias (+ optional SiLU)
# ----------------------------------------------------------------------------
def _conv3x3_kernel(xm_ref, xh_ref, w_ref, b_ref, o_ref, xs_ref, acc_ref, *,
                    stride, Wq, TM, TH, apply_silu):
    """One (batch, row-tile) grid step.

    xm_ref : (P, 1, TM, Cin)  bf16  main rows  [t*TM, (t+1)*TM)
    xh_ref : (P, 1, TH, Cin)  bf16  halo rows  [(t+1)*TM, (t+1)*TM + TH)
    w_ref  : (9, Cin, Cout)   bf16  tap-major weights
    b_ref  : (1, Cout)        f32
    o_ref  : (1, TM, Cout)    output rows [t*TM, (t+1)*TM) (junk cols sliced in glue)
    xs_ref : (P, TM+TH, Cin)  bf16  VMEM staging (main ++ halo, contiguous rows)
    acc_ref: (TM, Cout)       f32   VMEM accumulator
    """
    s = stride
    P = xm_ref.shape[0]

    # Stage main + halo rows contiguously so each tap is one row-offset slice.
    for p in range(P):
        xs_ref[p, :TM, :] = xm_ref[p, 0]
        xs_ref[p, TM:TM + TH, :] = xh_ref[p, 0]

    first = True
    for kh in range(3):
        for kw in range(3):
            p = (kh % s) * s + (kw % s)          # parity plane (static)
            off = (kh // s) * Wq + (kw // s)     # flat row offset inside plane
            lhs = xs_ref[p, pl.ds(off, TM), :]   # (TM, Cin) bf16
            contrib = jnp.dot(lhs, w_ref[kh * 3 + kw],
                              preferred_element_type=jnp.float32)
            if first:
                acc_ref[...] = contrib
                first = False
            else:
                acc_ref[...] += contrib

    acc = acc_ref[...] + b_ref[...]              # f32, (1, Cout) broadcasts
    if apply_silu:
        acc = acc * jax.nn.sigmoid(acc)
    o_ref[0] = acc.astype(o_ref.dtype)


def conv3x3(x, w, b, *, stride, apply_silu, out_dtype=jnp.bfloat16, tm_target=512):
    """3x3 conv, padding=1. x: (N, H, W, Cin). w: (Cout, Cin, 3, 3) PyTorch layout."""
    N, H, W, Cin = x.shape
    Cout = w.shape[0]
    s = stride
    assert s in (1, 2)

    x = x.astype(jnp.bfloat16)
    xp = jnp.pad(x, ((0, 0), (1, 1), (1, 1), (0, 0)))  # zero pad=1
    Hp, Wp = H + 2, W + 2

    if s == 1:
        planes = xp[None]                      # (1, N, Hq, Wq, Cin)
        Hq, Wq = Hp, Wp
        Ho, Wo = H, W
        halo = 2 * Wq + 2                      # max tap row offset
    else:
        assert H % 2 == 0 and W % 2 == 0
        planes = jnp.stack(
            [xp[:, a::2, b::2, :] for a in range(2) for b in range(2)], axis=0)
        Hq, Wq = Hp // 2, Wp // 2              # (4, N, Hq, Wq, Cin)
        Ho, Wo = H // 2, W // 2
        halo = Wq + 1                          # max tap row offset within a plane

    P = planes.shape[0]
    M = Ho * Wq                                # output rows incl. junk cols (w >= Wo)
    TH = _round_up(halo, 16)                   # halo block rows (divides TM)
    TM = TH * max(1, -(-min(M, tm_target) // TH))
    nt = -(-M // TM)                           # row tiles per image
    L_pad = (nt + 1) * TM                      # both TM and TH divide L_pad

    planes_flat = planes.reshape(P, N, Hq * Wq, Cin)
    planes_flat = jnp.pad(
        planes_flat, ((0, 0), (0, 0), (0, L_pad - Hq * Wq), (0, 0)))

    # PyTorch weight (Cout, Cin, kh, kw) -> (kh*3+kw, Cin, Cout), bf16 for the MXU.
    wk = jnp.transpose(w, (2, 3, 1, 0)).reshape(9, Cin, Cout).astype(jnp.bfloat16)
    bk = b.reshape(1, Cout).astype(jnp.float32)

    k = TM // TH
    kernel = functools.partial(
        _conv3x3_kernel, stride=s, Wq=Wq, TM=TM, TH=TH, apply_silu=apply_silu)

    out_flat = pl.pallas_call(
        kernel,
        out_shape=jax.ShapeDtypeStruct((N, nt * TM, Cout), out_dtype),
        grid=(N, nt),
        in_specs=[
            pl.BlockSpec((P, 1, TM, Cin), lambda n, t: (0, n, t, 0)),
            pl.BlockSpec((P, 1, TH, Cin), lambda n, t: (0, n, (t + 1) * k, 0)),
            pl.BlockSpec((9, Cin, Cout), lambda n, t: (0, 0, 0)),
            pl.BlockSpec((1, Cout), lambda n, t: (0, 0)),
        ],
        out_specs=pl.BlockSpec((1, TM, Cout), lambda n, t: (n, t, 0)),
        scratch_shapes=[
            pltpu.VMEM((P, TM + TH, Cin), jnp.bfloat16),
            pltpu.VMEM((TM, Cout), jnp.float32),
        ],
        compiler_params=pltpu.CompilerParams(
            dimension_semantics=("parallel", "parallel"),
            vmem_limit_bytes=32 * 1024 * 1024,
        ),
    )(planes_flat, planes_flat, wk, bk)

    # TODO(synk): junk-column slice + next-layer pad are XLA copies; fold in-kernel.
    out = out_flat[:, :M, :].reshape(N, Ho, Wq, Cout)[:, :, :Wo, :]
    return out


# ----------------------------------------------------------------------------
# ControlEncoder: parameters + forward
# ----------------------------------------------------------------------------
def _layer_configs(in_channels, out_channels):
    # (Cin, Cout, stride, apply_silu) matching nn.Sequential in the module.
    return [
        (in_channels, 16, 1, True),
        (16, 16, 1, True),
        (16, 32, 2, True),
        (32, 32, 1, True),
        (32, 96, 2, True),
        (96, 96, 1, True),
        (96, 128, 2, True),
        (128, 128, 1, True),
        (128, 256, 2, True),
        (256, out_channels, 1, False),
    ]


def init_control_encoder_params(key, in_channels, out_channels):
    """Xavier-uniform conv weights (PyTorch layout (Cout, Cin, 3, 3)), zero bias."""
    params = []
    for (cin, cout, stride, silu) in _layer_configs(in_channels, out_channels):
        key, wkey = jax.random.split(key)
        fan_in = cin * 9
        fan_out = cout * 9
        bound = math.sqrt(6.0 / (fan_in + fan_out))
        w = jax.random.uniform(
            wkey, (cout, cin, 3, 3), jnp.float32, minval=-bound, maxval=bound)
        b = jnp.zeros((cout,), jnp.float32)
        params.append((w, b, stride, silu))
    return params


def control_encoder_forward(x_nchw, params):
    """Forward pass. Input/output are NCHW, like the PyTorch module."""
    x = jnp.transpose(x_nchw, (0, 2, 3, 1)).astype(jnp.bfloat16)  # NCHW -> NHWC
    n_layers = len(params)
    for i, (w, b, stride, silu) in enumerate(params):
        last = i == n_layers - 1
        x = conv3x3(x, w, b, stride=stride, apply_silu=silu,
                    out_dtype=jnp.float32 if last else jnp.bfloat16)
    return jnp.transpose(x, (0, 3, 1, 2))  # NHWC -> NCHW


# ----------------------------------------------------------------------------
# Reference (pure JAX/XLA, same bf16-compute / f32-accumulate recipe)
# ----------------------------------------------------------------------------
def _reference_forward(x_nchw, params):
    x = jnp.transpose(x_nchw, (0, 2, 3, 1)).astype(jnp.bfloat16)
    n_layers = len(params)
    for i, (w, b, stride, silu) in enumerate(params):
        w_hwio = jnp.transpose(w, (2, 3, 1, 0)).astype(jnp.bfloat16)
        y = jax.lax.conv_general_dilated(
            x, w_hwio,
            window_strides=(stride, stride),
            padding=((1, 1), (1, 1)),
            dimension_numbers=("NHWC", "HWIO", "NHWC"),
            preferred_element_type=jnp.float32,
        ) + b[None, None, None, :]
        if silu:
            y = y * jax.nn.sigmoid(y)
        last = i == n_layers - 1
        x = y.astype(jnp.float32 if last else jnp.bfloat16)
    return jnp.transpose(x, (0, 3, 1, 2))


if __name__ == "__main__":
    in_channels, out_channels = 4, 8
    N, Hs, Ws = 2, 16, 16

    key = jax.random.PRNGKey(0)
    key, xkey = jax.random.split(key)
    x = jax.random.normal(xkey, (N, in_channels, Hs, Ws), jnp.float32)

    params = init_control_encoder_params(key, in_channels, out_channels)

    out = control_encoder_forward(x, params)
    out = jax.block_until_ready(out)

    assert out.shape == (N, out_channels, Hs // 16, Ws // 16), out.shape
    assert out.dtype == jnp.float32

    ref = jax.block_until_ready(_reference_forward(x, params))
    max_err = float(jnp.max(jnp.abs(out - ref)))
    assert jnp.allclose(out, ref, atol=2e-2, rtol=2e-2), max_err

    print("KERNEL_OK")
</pallas_src>

<mosaic_0001>
module attributes {stable_mosaic.version = 11 : i64} {
  func.func @_conv3x3_kernel(%arg0: i32, %arg1: i32, %arg2: memref<1x1x288x4xbf16, #tpu.memory_space<vmem>>, %arg3: memref<1x1x48x4xbf16, #tpu.memory_space<vmem>>, %arg4: memref<9x4x16xbf16, #tpu.memory_space<vmem>>, %arg5: memref<1x16xf32, #tpu.memory_space<vmem>>, %arg6: memref<1x288x16xbf16, #tpu.memory_space<vmem>>, %arg7: memref<1x336x4xbf16, #tpu.memory_space<vmem>>, %arg8: memref<288x16xf32, #tpu.memory_space<vmem>>) attributes {dimension_semantics = [#tpu.dimension_semantics<parallel>, #tpu.dimension_semantics<parallel>], iteration_bounds = array<i64: 2, 1>, scalar_prefetch = 0 : i64, scratch_operands = 2 : i64, tpu.core_type = #tpu.core_type<tc>, window_params = [{transform_indices = @transform_0, window_bounds = array<i64: 1, 1, 288, 4>}, {transform_indices = @transform_1, window_bounds = array<i64: 1, 1, 48, 4>}, {pipeline_mode = #tpu.pipeline_mode<synchronous>, transform_indices = @transform_2, window_bounds = array<i64: 9, 4, 16>}, {pipeline_mode = #tpu.pipeline_mode<synchronous>, transform_indices = @transform_3, window_bounds = array<i64: 1, 16>}, {transform_indices = @transform_4, window_bounds = array<i64: 1, 288, 16>}]} {
    %c0 = arith.constant 0 : index
    %c0_0 = arith.constant 0 : index
    %c0_1 = arith.constant 0 : index
    %c0_2 = arith.constant 0 : index
    %0 = vector.load %arg2[%c0, %c0_0, %c0_1, %c0_2] : memref<1x1x288x4xbf16, #tpu.memory_space<vmem>>, vector<1x1x288x4xbf16>
    %1 = vector.shape_cast %0 : vector<1x1x288x4xbf16> to vector<288x4xbf16>
    %c0_3 = arith.constant 0 : index
    %c0_4 = arith.constant 0 : index
    %c0_5 = arith.constant 0 : index
    %2 = vector.load %arg7[%c0_3, %c0_4, %c0_5] : memref<1x336x4xbf16, #tpu.memory_space<vmem>>, vector<1x288x4xbf16>
    %3 = vector.shape_cast %2 : vector<1x288x4xbf16> to vector<288x4xbf16>
    %4 = vector.shape_cast %1 : vector<288x4xbf16> to vector<1x288x4xbf16>
    tpu.vector_store %arg7[%c0_3, %c0_4, %c0_5], %4 {strides = array<i32>} : memref<1x336x4xbf16, #tpu.memory_space<vmem>>, vector<1x288x4xbf16>,
    %c0_6 = arith.constant 0 : index
    %c0_7 = arith.constant 0 : index
    %c0_8 = arith.constant 0 : index
    %c0_9 = arith.constant 0 : index
    %5 = vector.load %arg3[%c0_6, %c0_7, %c0_8, %c0_9] : memref<1x1x48x4xbf16, #tpu.memory_space<vmem>>, vector<1x1x48x4xbf16>
    %6 = vector.shape_cast %5 : vector<1x1x48x4xbf16> to vector<48x4xbf16>
    %c0_10 = arith.constant 0 : index
    %c288 = arith.constant 288 : index
    %c0_11 = arith.constant 0 : index
    %7 = vector.load %arg7[%c0_10, %c288, %c0_11] : memref<1x336x4xbf16, #tpu.memory_space<vmem>>, vector<1x48x4xbf16>
    %8 = vector.shape_cast %7 : vector<1x48x4xbf16> to vector<48x4xbf16>
    %9 = vector.shape_cast %6 : vector<48x4xbf16> to vector<1x48x4xbf16>
    tpu.vector_store %arg7[%c0_10, %c288, %c0_11], %9 {strides = array<i32>} : memref<1x336x4xbf16, #tpu.memory_space<vmem>>, vector<1x48x4xbf16>,
    %c0_12 = arith.constant 0 : index
    %c0_13 = arith.constant 0 : index
    %c0_14 = arith.constant 0 : index
    %10 = vector.load %arg7[%c0_12, %c0_13, %c0_14] : memref<1x336x4xbf16, #tpu.memory_space<vmem>>, vector<1x288x4xbf16>
    %11 = vector.shape_cast %10 : vector<1x288x4xbf16> to vector<288x4xbf16>
    %c0_15 = arith.constant 0 : index
    %c0_16 = arith.constant 0 : index
    %c0_17 = arith.constant 0 : index
    %12 = vector.load %arg4[%c0_15, %c0_16, %c0_17] : memref<9x4x16xbf16, #tpu.memory_space<vmem>>, vector<1x4x16xbf16>
    %13 = vector.shape_cast %12 : vector<1x4x16xbf16> to vector<4x16xbf16>
    %cst = arith.constant dense<0.000000e+00> : vector<288x16xf32>
    %14 = tpu.matmul %11, %13, %cst {dimension_numbers = #tpu.dot_dimension_numbers<[1], [0], [0], [1], [0, 0, 1, 1], [], []>} : vector<288x4xbf16>, vector<4x16xbf16>, vector<288x16xf32> -> vector<288x16xf32>
    %c0_18 = arith.constant 0 : index
    %c0_19 = arith.constant 0 : index
    %15 = vector.load %arg8[%c0_18, %c0_19] : memref<288x16xf32, #tpu.memory_space<vmem>>, vector<288x16xf32>
    tpu.vector_store %arg8[%c0_18, %c0_19], %14 {strides = array<i32>} : memref<288x16xf32, #tpu.memory_space<vmem>>, vector<288x16xf32>,
    %c0_20 = arith.constant 0 : index
    %c1 = arith.constant 1 : index
    %c0_21 = arith.constant 0 : index
    %16 = vector.load %arg7[%c0_20, %c1, %c0_21] : memref<1x336x4xbf16, #tpu.memory_space<vmem>>, vector<1x288x4xbf16>
    %17 = vector.shape_cast %16 : vector<1x288x4xbf16> to vector<288x4xbf16>
    %c1_22 = arith.constant 1 : index
    %c0_23 = arith.constant 0 : index
    %c0_24 = arith.constant 0 : index
    %18 = vector.load %arg4[%c1_22, %c0_23, %c0_24] : memref<9x4x16xbf16, #tpu.memory_space<vmem>>, vector<1x4x16xbf16>
    %19 = vector.shape_cast %18 : vector<1x4x16xbf16> to vector<4x16xbf16>
    %cst_25 = arith.constant dense<0.000000e+00> : vector<288x16xf32>
    %20 = tpu.matmul %17, %19, %cst_25 {dimension_numbers = #tpu.dot_dimension_numbers<[1], [0], [0], [1], [0, 0, 1, 1], [], []>} : vector<288x4xbf16>, vector<4x16xbf16>, vector<288x16xf32> -> vector<288x16xf32>
    %c0_26 = arith.constant 0 : index
    %c0_27 = arith.constant 0 : index
    %21 = vector.load %arg8[%c0_26, %c0_27] : memref<288x16xf32, #tpu.memory_space<vmem>>, vector<288x16xf32>
    %22 = arith.addf %21, %20 : vector<288x16xf32>
    %c0_28 = arith.constant 0 : index
    %c0_29 = arith.constant 0 : index
    %23 = vector.load %arg8[%c0_28, %c0_29] : memref<288x16xf32, #tpu.memory_space<vmem>>, vector<288x16xf32>
    tpu.vector_store %arg8[%c0_28, %c0_29], %22 {strides = array<i32>} : memref<288x16xf32, #tpu.memory_space<vmem>>, vector<288x16xf32>,
    %c0_30 = arith.constant 0 : index
    %c2 = arith.constant 2 : index
    %c0_31 = arith.constant 0 : index
    %24 = vector.load %arg7[%c0_30, %c2, %c0_31] : memref<1x336x4xbf16, #tpu.memory_space<vmem>>, vector<1x288x4xbf16>
    %25 = vector.shape_cast %24 : vector<1x288x4xbf16> to vector<288x4xbf16>
    %c2_32 = arith.constant 2 : index
    %c0_33 = arith.constant 0 : index
    %c0_34 = arith.constant 0 : index
    %26 = vector.load %arg4[%c2_32, %c0_33, %c0_34] : memref<9x4x16xbf16, #tpu.memory_space<vmem>>, vector<1x4x16xbf16>
    %27 = vector.shape_cast %26 : vector<1x4x16xbf16> to vector<4x16xbf16>
    %cst_35 = arith.constant dense<0.000000e+00> : vector<288x16xf32>
    %28 = tpu.matmul %25, %27, %cst_35 {dimension_numbers = #tpu.dot_dimension_numbers<[1], [0], [0], [1], [0, 0, 1, 1], [], []>} : vector<288x4xbf16>, vector<4x16xbf16>, vector<288x16xf32> -> vector<288x16xf32>
    %c0_36 = arith.constant 0 : index
    %c0_37 = arith.constant 0 : index
    %29 = vector.load %arg8[%c0_36, %c0_37] : memref<288x16xf32, #tpu.memory_space<vmem>>, vector<288x16xf32>
    %30 = arith.addf %29, %28 : vector<288x16xf32>
    %c0_38 = arith.constant 0 : index
    %c0_39 = arith.constant 0 : index
    %31 = vector.load %arg8[%c0_38, %c0_39] : memref<288x16xf32, #tpu.memory_space<vmem>>, vector<288x16xf32>
    tpu.vector_store %arg8[%c0_38, %c0_39], %30 {strides = array<i32>} : memref<288x16xf32, #tpu.memory_space<vmem>>, vector<288x16xf32>,
    %c0_40 = arith.constant 0 : index
    %c18 = arith.constant 18 : index
    %c0_41 = arith.constant 0 : index
    %32 = vector.load %arg7[%c0_40, %c18, %c0_41] : memref<1x336x4xbf16, #tpu.memory_space<vmem>>, vector<1x288x4xbf16>
    %33 = vector.shape_cast %32 : vector<1x288x4xbf16> to vector<288x4xbf16>
    %c3 = arith.constant 3 : index
    %c0_42 = arith.constant 0 : index
    %c0_43 = arith.constant 0 : index
    %34 = vector.load %arg4[%c3, %c0_42, %c0_43] : memref<9x4x16xbf16, #tpu.memory_space<vmem>>, vector<1x4x16xbf16>
    %35 = vector.shape_cast %34 : vector<1x4x16xbf16> to vector<4x16xbf16>
    %cst_44 = arith.constant dense<0.000000e+00> : vector<288x16xf32>
    %36 = tpu.matmul %33, %35, %cst_44 {dimension_numbers = #tpu.dot_dimension_numbers<[1], [0], [0], [1], [0, 0, 1, 1], [], []>} : vector<288x4xbf16>, vector<4x16xbf16>, vector<288x16xf32> -> vector<288x16xf32>
    %c0_45 = arith.constant 0 : index
    %c0_46 = arith.constant 0 : index
    %37 = vector.load %arg8[%c0_45, %c0_46] : memref<288x16xf32, #tpu.memory_space<vmem>>, vector<288x16xf32>
    %38 = arith.addf %37, %36 : vector<288x16xf32>
    %c0_47 = arith.constant 0 : index
    %c0_48 = arith.constant 0 : index
    %39 = vector.load %arg8[%c0_47, %c0_48] : memref<288x16xf32, #tpu.memory_space<vmem>>, vector<288x16xf32>
    tpu.vector_store %arg8[%c0_47, %c0_48], %38 {strides = array<i32>} : memref<288x16xf32, #tpu.memory_space<vmem>>, vector<288x16xf32>,
    %c0_49 = arith.constant 0 : index
    %c19 = arith.constant 19 : index
    %c0_50 = arith.constant 0 : index
    %40 = vector.load %arg7[%c0_49, %c19, %c0_50] : memref<1x336x4xbf16, #tpu.memory_space<vmem>>, vector<1x288x4xbf16>
    %41 = vector.shape_cast %40 : vector<1x288x4xbf16> to vector<288x4xbf16>
    %c4 = arith.constant 4 : index
    %c0_51 = arith.constant 0 : index
    %c0_52 = arith.constant 0 : index
    %42 = vector.load %arg4[%c4, %c0_51, %c0_52] : memref<9x4x16xbf16, #tpu.memory_space<vmem>>, vector<1x4x16xbf16>
    %43 = vector.shape_cast %42 : vector<1x4x16xbf16> to vector<4x16xbf16>
    %cst_53 = arith.constant dense<0.000000e+00> : vector<288x16xf32>
    %44 = tpu.matmul %41, %43, %cst_53 {dimension_numbers = #tpu.dot_dimension_numbers<[1], [0], [0], [1], [0, 0, 1, 1], [], []>} : vector<288x4xbf16>, vector<4x16xbf16>, vector<288x16xf32> -> vector<288x16xf32>
    %c0_54 = arith.constant 0 : index
    %c0_55 = arith.constant 0 : index
    %45 = vector.load %arg8[%c0_54, %c0_55] : memref<288x16xf32, #tpu.memory_space<vmem>>, vector<288x16xf32>
    %46 = arith.addf %45, %44 : vector<288x16xf32>
    %c0_56 = arith.constant 0 : index
    %c0_57 = arith.constant 0 : index
    %47 = vector.load %arg8[%c0_56, %c0_57] : memref<288x16xf32, #tpu.memory_space<vmem>>, vector<288x16xf32>
    tpu.vector_store %arg8[%c0_56, %c0_57], %46 {strides = array<i32>} : memref<288x16xf32, #tpu.memory_space<vmem>>, vector<288x16xf32>,
    %c0_58 = arith.constant 0 : index
    %c20 = arith.constant 20 : index
    %c0_59 = arith.constant 0 : index
    %48 = vector.load %arg7[%c0_58, %c20, %c0_59] : memref<1x336x4xbf16, #tpu.memory_space<vmem>>, vector<1x288x4xbf16>
    %49 = vector.shape_cast %48 : vector<1x288x4xbf16> to vector<288x4xbf16>
    %c5 = arith.constant 5 : index
    %c0_60 = arith.constant 0 : index
    %c0_61 = arith.constant 0 : index
    %50 = vector.load %arg4[%c5, %c0_60, %c0_61] : memref<9x4x16xbf16, #tpu.memory_space<vmem>>, vector<1x4x16xbf16>
    %51 = vector.shape_cast %50 : vector<1x4x16xbf16> to vector<4x16xbf16>
    %cst_62 = arith.constant dense<0.000000e+00> : vector<288x16xf32>
    %52 = tpu.matmul %49, %51, %cst_62 {dimension_numbers = #tpu.dot_dimension_numbers<[1], [0], [0], [1], [0, 0, 1, 1], [], []>} : vector<288x4xbf16>, vector<4x16xbf16>, vector<288x16xf32> -> vector<288x16xf32>
    %c0_63 = arith.constant 0 : index
    %c0_64 = arith.constant 0 : index
    %53 = vector.load %arg8[%c0_63, %c0_64] : memref<288x16xf32, #tpu.memory_space<vmem>>, vector<288x16xf32>
    %54 = arith.addf %53, %52 : vector<288x16xf32>
    %c0_65 = arith.constant 0 : index
    %c0_66 = arith.constant 0 : index
    %55 = vector.load %arg8[%c0_65, %c0_66] : memref<288x16xf32, #tpu.memory_space<vmem>>, vector<288x16xf32>
    tpu.vector_store %arg8[%c0_65, %c0_66], %54 {strides = array<i32>} : memref<288x16xf32, #tpu.memory_space<vmem>>, vector<288x16xf32>,
    %c0_67 = arith.constant 0 : index
    %c36 = arith.constant 36 : index
    %c0_68 = arith.constant 0 : index
    %56 = vector.load %arg7[%c0_67, %c36, %c0_68] : memref<1x336x4xbf16, #tpu.memory_space<vmem>>, vector<1x288x4xbf16>
    %57 = vector.shape_cast %56 : vector<1x288x4xbf16> to vector<288x4xbf16>
    %c6 = arith.constant 6 : index
    %c0_69 = arith.constant 0 : index
    %c0_70 = arith.constant 0 : index
    %58 = vector.load %arg4[%c6, %c0_69, %c0_70] : memref<9x4x16xbf16, #tpu.memory_space<vmem>>, vector<1x4x16xbf16>
    %59 = vector.shape_cast %58 : vector<1x4x16xbf16> to vector<4x16xbf16>
    %cst_71 = arith.constant dense<0.000000e+00> : vector<288x16xf32>
    %60 = tpu.matmul %57, %59, %cst_71 {dimension_numbers = #tpu.dot_dimension_numbers<[1], [0], [0], [1], [0, 0, 1, 1], [], []>} : vector<288x4xbf16>, vector<4x16xbf16>, vector<288x16xf32> -> vector<288x16xf32>
    %c0_72 = arith.constant 0 : index
    %c0_73 = arith.constant 0 : index
    %61 = vector.load %arg8[%c0_72, %c0_73] : memref<288x16xf32, #tpu.memory_space<vmem>>, vector<288x16xf32>
    %62 = arith.addf %61, %60 : vector<288x16xf32>
    %c0_74 = arith.constant 0 : index
    %c0_75 = arith.constant 0 : index
    %63 = vector.load %arg8[%c0_74, %c0_75] : memref<288x16xf32, #tpu.memory_space<vmem>>, vector<288x16xf32>
    tpu.vector_store %arg8[%c0_74, %c0_75], %62 {strides = array<i32>} : memref<288x16xf32, #tpu.memory_space<vmem>>, vector<288x16xf32>,
    %c0_76 = arith.constant 0 : index
    %c37 = arith.constant 37 : index
    %c0_77 = arith.constant 0 : index
    %64 = vector.load %arg7[%c0_76, %c37, %c0_77] : memref<1x336x4xbf16, #tpu.memory_space<vmem>>, vector<1x288x4xbf16>
    %65 = vector.shape_cast %64 : vector<1x288x4xbf16> to vector<288x4xbf16>
    %c7 = arith.constant 7 : index
    %c0_78 = arith.constant 0 : index
    %c0_79 = arith.constant 0 : index
    %66 = vector.load %arg4[%c7, %c0_78, %c0_79] : memref<9x4x16xbf16, #tpu.memory_space<vmem>>, vector<1x4x16xbf16>
    %67 = vector.shape_cast %66 : vector<1x4x16xbf16> to vector<4x16xbf16>
    %cst_80 = arith.constant dense<0.000000e+00> : vector<288x16xf32>
    %68 = tpu.matmul %65, %67, %cst_80 {dimension_numbers = #tpu.dot_dimension_numbers<[1], [0], [0], [1], [0, 0, 1, 1], [], []>} : vector<288x4xbf16>, vector<4x16xbf16>, vector<288x16xf32> -> vector<288x16xf32>
    %c0_81 = arith.constant 0 : index
    %c0_82 = arith.constant 0 : index
    %69 = vector.load %arg8[%c0_81, %c0_82] : memref<288x16xf32, #tpu.memory_space<vmem>>, vector<288x16xf32>
    %70 = arith.addf %69, %68 : vector<288x16xf32>
    %c0_83 = arith.constant 0 : index
    %c0_84 = arith.constant 0 : index
    %71 = vector.load %arg8[%c0_83, %c0_84] : memref<288x16xf32, #tpu.memory_space<vmem>>, vector<288x16xf32>
    tpu.vector_store %arg8[%c0_83, %c0_84], %70 {strides = array<i32>} : memref<288x16xf32, #tpu.memory_space<vmem>>, vector<288x16xf32>,
    %c0_85 = arith.constant 0 : index
    %c38 = arith.constant 38 : index
    %c0_86 = arith.constant 0 : index
    %72 = vector.load %arg7[%c0_85, %c38, %c0_86] : memref<1x336x4xbf16, #tpu.memory_space<vmem>>, vector<1x288x4xbf16>
    %73 = vector.shape_cast %72 : vector<1x288x4xbf16> to vector<288x4xbf16>
    %c8 = arith.constant 8 : index
    %c0_87 = arith.constant 0 : index
    %c0_88 = arith.constant 0 : index
    %74 = vector.load %arg4[%c8, %c0_87, %c0_88] : memref<9x4x16xbf16, #tpu.memory_space<vmem>>, vector<1x4x16xbf16>
    %75 = vector.shape_cast %74 : vector<1x4x16xbf16> to vector<4x16xbf16>
    %cst_89 = arith.constant dense<0.000000e+00> : vector<288x16xf32>
    %76 = tpu.matmul %73, %75, %cst_89 {dimension_numbers = #tpu.dot_dimension_numbers<[1], [0], [0], [1], [0, 0, 1, 1], [], []>} : vector<288x4xbf16>, vector<4x16xbf16>, vector<288x16xf32> -> vector<288x16xf32>
    %c0_90 = arith.constant 0 : index
    %c0_91 = arith.constant 0 : index
    %77 = vector.load %arg8[%c0_90, %c0_91] : memref<288x16xf32, #tpu.memory_space<vmem>>, vector<288x16xf32>
    %78 = arith.addf %77, %76 : vector<288x16xf32>
    %c0_92 = arith.constant 0 : index
    %c0_93 = arith.constant 0 : index
    %79 = vector.load %arg8[%c0_92, %c0_93] : memref<288x16xf32, #tpu.memory_space<vmem>>, vector<288x16xf32>
    tpu.vector_store %arg8[%c0_92, %c0_93], %78 {strides = array<i32>} : memref<288x16xf32, #tpu.memory_space<vmem>>, vector<288x16xf32>,
    %c0_94 = arith.constant 0 : index
    %c0_95 = arith.constant 0 : index
    %80 = vector.load %arg8[%c0_94, %c0_95] : memref<288x16xf32, #tpu.memory_space<vmem>>, vector<288x16xf32>
    %c0_96 = arith.constant 0 : index
    %c0_97 = arith.constant 0 : index
    %81 = vector.load %arg5[%c0_96, %c0_97] : memref<1x16xf32, #tpu.memory_space<vmem>>, vector<1x16xf32>
    %82 = vector.broadcast %81 : vector<1x16xf32> to vector<288x16xf32>
    %83 = arith.addf %80, %82 : vector<288x16xf32>
    %84 = arith.negf %83 : vector<288x16xf32>
    %85 = math.exp %84 : vector<288x16xf32>
    %cst_98 = arith.constant 1.000000e+00 : f32
    %86 = vector.broadcast %cst_98 : f32 to vector<288x16xf32>
    %87 = arith.addf %86, %85 : vector<288x16xf32>
    %88 = arith.divf %86, %87 : vector<288x16xf32>
    %89 = arith.mulf %83, %88 : vector<288x16xf32>
    %90 = arith.truncf %89 : vector<288x16xf32> to vector<288x16xbf16>
    %c0_99 = arith.constant 0 : index
    %c0_100 = arith.constant 0 : index
    %c0_101 = arith.constant 0 : index
    %91 = vector.load %arg6[%c0_99, %c0_100, %c0_101] : memref<1x288x16xbf16, #tpu.memory_space<vmem>>, vector<1x288x16xbf16>
    %92 = vector.shape_cast %91 : vector<1x288x16xbf16> to vector<288x16xbf16>
    %93 = vector.shape_cast %90 : vector<288x16xbf16> to vector<1x288x16xbf16>
    tpu.vector_store %arg6[%c0_99, %c0_100, %c0_101], %93 {strides = array<i32>} : memref<1x288x16xbf16, #tpu.memory_space<vmem>>, vector<1x288x16xbf16>,
    return
  }
  func.func @transform_0(%arg0: i32, %arg1: i32) -> (i32, i32, i32, i32) {
    %c0_i32 = arith.constant 0 : i32
    %c0_i32_0 = arith.constant 0 : i32
    %c0_i32_1 = arith.constant 0 : i32
    return %c0_i32, %arg0, %arg1, %c0_i32_0 : i32, i32, i32, i32
  }
  func.func @transform_1(%arg0: i32, %arg1: i32) -> (i32, i32, i32, i32) {
    %c1_i32 = arith.constant 1 : i32
    %0 = arith.addi %arg1, %c1_i32 : i32
    %c6_i32 = arith.constant 6 : i32
    %1 = arith.muli %0, %c6_i32 : i32
    %c0_i32 = arith.constant 0 : i32
    %c0_i32_0 = arith.constant 0 : i32
    %c0_i32_1 = arith.constant 0 : i32
    return %c0_i32, %arg0, %1, %c0_i32_0 : i32, i32, i32, i32
  }
  func.func @transform_2(%arg0: i32, %arg1: i32) -> (i32, i32, i32) {
    %c0_i32 = arith.constant 0 : i32
    %c0_i32_0 = arith.constant 0 : i32
    %c0_i32_1 = arith.constant 0 : i32
    %c0_i32_2 = arith.constant 0 : i32
    return %c0_i32, %c0_i32_0, %c0_i32_1 : i32, i32, i32
  }
  func.func @transform_3(%arg0: i32, %arg1: i32) -> (i32, i32) {
    %c0_i32 = arith.constant 0 : i32
    %c0_i32_0 = arith.constant 0 : i32
    %c0_i32_1 = arith.constant 0 : i32
    return %c0_i32, %c0_i32_0 : i32, i32
  }
  func.func @transform_4(%arg0: i32, %arg1: i32) -> (i32, i32, i32) {
    %c0_i32 = arith.constant 0 : i32
    %c0_i32_0 = arith.constant 0 : i32
    return %arg0, %arg1, %c0_i32 : i32, i32, i32
  }
}

</mosaic_0001>

<bundles_post_ra>
// kernel: tpu_custom_call.1
= control target key start
LH: loop header
LB: loop body
LE: loop exit
PB: predicated region body
PF: predicated region fallthrough
CT: control target
= control target key end

     0   :  { %s7239_s15 = smov 0   ;;  %s7241_s16 = smov 0   ;;  %s8501_s0 = inlined_call_operand.vmem [shape: bf16[1,2,576,4], index: 0, kind: input, shape index: {}]   ;;  %s8502_s1 = inlined_call_operand.vmem [shape: bf16[1,2,576,4], index: 1, kind: input, shape index: {}]   ;;  %s8503_s2 = inlined_call_operand.vmem [shape: bf16[9,4,16], index: 2, kind: input, shape index: {}]   ;;  %s8504_s3 = inlined_call_operand.vmem [shape: f32[1,16], index: 3, kind: input, shape index: {}]   ;;  %s8505_s4 = inlined_call_operand.vmem [shape: bf16[2,288,16], index: 4, kind: output, shape index: {}]  }
   0x1   :  { %s7243_s17 = smov 0  }
   0x2 LB: > { %s26_s18 = sadd.s32 1, %s7208_s16  ;;  %p5865_p0 = scmp.ge.s32.totalorder %s7212_s17, 1  ;;  %s7212_s17 = sphi %s7243_s17, %s14_s17   ;;  %s7208_s16 = sphi %s7241_s16, %s8507_s16   ;;  %s7204_s15 = sphi %s7239_s15, %s8506_s15  }
   0x3   : > { %p28_p1 = scmp.ge.s32.totalorder %s26_s18, 2  ;;  %p208_p2 = scmp.lt.s32.totalorder %s7212_s17, 3 }
   0x5   : > { %s8509_s18 = smov (%p28_p1, %s26_s18), 0  ;;  %p209_p3 = pnand %p5865_p0, %p208_p2 }
   0x6   : > { %p254_p4 = scmp.lt.s32.totalorder (!%p209_p3), %s7204_s15, 1 }
   0x7   : > { %212 = sbr.rel (%p209_p3) target bundleno = 612 (0x264), region = 36 }
   0xc   : > { %v409_v0 = vld [vmem:[%s8503_s2] sm:$0x3]  ;;  %vm555_vm0 = vcmask 1041408   ;;  %v7266_v2 = vld [vmem:[%s8503_s2 + $0x2] sm:$0x3]  ;;  %s8511_s15 = smov (!%p254_p4, %s7204_s15), 1 }
   0xd   : > { %6838 = vmatprep.subr.msk.bf16.mxu1 %vm555_vm0, %v409_v0  ;;  %6837 = vmatprep.subr.msk.bf16.mxu0 %vm555_vm0, %v409_v0  ;;  %v557_v1 = vsel %vm555_vm0, %v409_v0, 0  ;;  %v5943_v3 = vld [vmem:[%s8503_s2 + $0x4] sm:$0x3]  ;;  %s6847_s25 = smul.u32 288, %s8511_s15  ;;  %vm324_vm1 = vcmask 27648   ;;  %vm500_vm2 = vcmask 31744  }
   0xe   : > { %6836 = vmatpush3.bf16.msra.mxu1 %v557_v1  ;;  %6494 = vmatpush3.bf16.msra.mxu0 %v557_v1  ;;  %v1621_v31 = vsel %vm555_vm0, %v5943_v3, 0  ;;  %v7337_v32 = vld [vmem:[%s8503_s2 + $0x6] sm:$0x3]  ;;  %v1109_v34 = vsel %vm555_vm0, %v7266_v2, 0  ;;  %v7345_v35 = vld [vmem:[%s8503_s2 + $0x8] sm:$0x3] }
   0xf   : > { %6839 = vmatprep.subr.msk.bf16.mxu1 %vm555_vm0, %v7266_v2  ;;  %6840 = vmatprep.subr.msk.bf16.mxu0 %vm555_vm0, %v5943_v3  ;;  %s7282_s28 = scalar_lea.vmem %s8501_s0, %s6847_s25  ;;  %vm905_vm3 = vsmask.f32 7424  ;;  %vm1528_vm4 = vcmask 1046528   ;;  %s6285_s11 = sadd.s32 144, %s6847_s25  ;;  %vm2551_vm5 = vsmask.f32 6400 }
  0x10   : > { %v288_v4 = vld [vmem:[%s7282_s28] sm:$0xf]  ;;  %v289_v5 = vld [vmem:[%s7282_s28 + $0x4] sm:$0xf]  ;;  %v308_v6 = vld [vmem:[%s7282_s28 + $0x50] sm:$0xf]  ;;  %s7441_s14 = scalar_lea.vmem %s8502_s1, %s6285_s11 }
  0x11   : > { %325 = vst.msk [vmem:[#allocation2] sm:$0xf] %vm324_vm1, %v288_v4  ;;  %326 = vst.msk [vmem:[#allocation2 + $0x4] sm:$0xf] %vm324_vm1, %v289_v5  ;;  %v309_v7 = vld [vmem:[%s7282_s28 + $0x54] sm:$0xf] }
  0x12   : > { %345 = vst.msk [vmem:[#allocation2 + $0x50] sm:$0xf] %vm324_vm1, %v308_v6  ;;  %v290_v8 = vld [vmem:[%s7282_s28 + $0x8] sm:$0xf]  ;;  %v291_v9 = vld [vmem:[%s7282_s28 + $0xc] sm:$0xf] }
  0x13   : > { %346 = vst.msk [vmem:[#allocation2 + $0x54] sm:$0xf] %vm324_vm1, %v309_v7  ;;  %327 = vst.msk [vmem:[#allocation2 + $0x8] sm:$0xf] %vm324_vm1, %v290_v8  ;;  %v310_v10 = vld [vmem:[%s7282_s28 + $0x58] sm:$0xf] }
  0x14   : > { %328 = vst.msk [vmem:[#allocation2 + $0xc] sm:$0xf] %vm324_vm1, %v291_v9  ;;  %v311_v11 = vld [vmem:[%s7282_s28 + $0x5c] sm:$0xf]  ;;  %v292_v12 = vld [vmem:[%s7282_s28 + $0x10] sm:$0xf] }
  0x15   : > { %347 = vst.msk [vmem:[#allocation2 + $0x58] sm:$0xf] %vm324_vm1, %v310_v10  ;;  %348 = vst.msk [vmem:[#allocation2 + $0x5c] sm:$0xf] %vm324_vm1, %v311_v11  ;;  %v293_v13 = vld [vmem:[%s7282_s28 + $0x14] sm:$0xf] }
  0x16   : > { %329 = vst.msk [vmem:[#allocation2 + $0x10] sm:$0xf] %vm324_vm1, %v292_v12  ;;  %v312_v14 = vld [vmem:[%s7282_s28 + $0x60] sm:$0xf]  ;;  %v313_v15 = vld [vmem:[%s7282_s28 + $0x64] sm:$0xf] }
  0x17   : > { %330 = vst.msk [vmem:[#allocation2 + $0x14] sm:$0xf] %vm324_vm1, %v293_v13  ;;  %349 = vst.msk [vmem:[#allocation2 + $0x60] sm:$0xf] %vm324_vm1, %v312_v14  ;;  %v294_v16 = vld [vmem:[%s7282_s28 + $0x18] sm:$0xf] }
  0x18   : > { %350 = vst.msk [vmem:[#allocation2 + $0x64] sm:$0xf] %vm324_vm1, %v313_v15  ;;  %v295_v17 = vld [vmem:[%s7282_s28 + $0x1c] sm:$0xf]  ;;  %v314_v18 = vld [vmem:[%s7282_s28 + $0x68] sm:$0xf] }
  0x19   : > { %331 = vst.msk [vmem:[#allocation2 + $0x18] sm:$0xf] %vm324_vm1, %v294_v16  ;;  %332 = vst.msk [vmem:[#allocation2 + $0x1c] sm:$0xf] %vm324_vm1, %v295_v17  ;;  %v315_v19 = vld [vmem:[%s7282_s28 + $0x6c] sm:$0xf] }
  0x1a   : > { %351 = vst.msk [vmem:[#allocation2 + $0x68] sm:$0xf] %vm324_vm1, %v314_v18  ;;  %v296_v20 = vld [vmem:[%s7282_s28 + $0x20] sm:$0xf]  ;;  %v297_v21 = vld [vmem:[%s7282_s28 + $0x24] sm:$0xf] }
  0x1b   : > { %352 = vst.msk [vmem:[#allocation2 + $0x6c] sm:$0xf] %vm324_vm1, %v315_v19  ;;  %333 = vst.msk [vmem:[#allocation2 + $0x20] sm:$0xf] %vm324_vm1, %v296_v20  ;;  %v316_v22 = vld [vmem:[%s7282_s28 + $0x70] sm:$0xf] }
  0x1c   : > { %334 = vst.msk [vmem:[#allocation2 + $0x24] sm:$0xf] %vm324_vm1, %v297_v21  ;;  %v317_v23 = vld [vmem:[%s7282_s28 + $0x74] sm:$0xf]  ;;  %v298_v24 = vld [vmem:[%s7282_s28 + $0x28] sm:$0xf] }
  0x1d   : > { %353 = vst.msk [vmem:[#allocation2 + $0x70] sm:$0xf] %vm324_vm1, %v316_v22  ;;  %354 = vst.msk [vmem:[#allocation2 + $0x74] sm:$0xf] %vm324_vm1, %v317_v23  ;;  %v299_v25 = vld [vmem:[%s7282_s28 + $0x2c] sm:$0xf] }
  0x1e   : > { %335 = vst.msk [vmem:[#allocation2 + $0x28] sm:$0xf] %vm324_vm1, %v298_v24  ;;  %v318_v26 = vld [vmem:[%s7282_s28 + $0x78] sm:$0xf]  ;;  %v319_v27 = vld [vmem:[%s7282_s28 + $0x7c] sm:$0xf] }
  0x1f   : > { %v6875_v28 = vld [vmem:[#allocation2] sm:$0xff]   ;;  %336 = vst.msk [vmem:[#allocation2 + $0x2c] sm:$0xf] %vm324_vm1, %v299_v25  ;;  %355 = vst.msk [vmem:[#allocation2 + $0x78] sm:$0xf] %vm324_vm1, %v318_v26  ;;  %v6876_v29 = vld [vmem:[#allocation2 + $0x50] sm:$0xff]  }
  0x20   : > { %356 = vst.msk [vmem:[#allocation2 + $0x7c] sm:$0xf] %vm324_vm1, %v319_v27  ;;  %6495 = vmatprep.mubr.msk.bf16.mxu0 %vm500_vm2, %v6875_v28  ;;  %v6877_v30 = vld [vmem:[#allocation2 + $0x8] sm:$0xff]   ;;  %6515 = vmatprep.mubr.msk.bf16.mxu1 %vm500_vm2, %v6876_v29  ;;  %v6878_v33 = vld [vmem:[#allocation2 + $0x58] sm:$0xff]   ;;  %v6879_v36 = vld [vmem:[#allocation2 + $0x10] sm:$0xff]   ;;  %v2132_v23 = vsel %vm555_vm0, %v7337_v32, 0 }
  0x21   : > { %6496 = vmatmul.mubr.msk.bf16.vlgmr.msra.gmra.mxu0 %vm500_vm2, %v6877_v30  ;;  %6516 = vmatmul.mubr.msk.bf16.vlgmr.msra.gmra.mxu1 %vm500_vm2, %v6878_v33  ;;  %v6880_v37 = vld [vmem:[#allocation2 + $0x60] sm:$0xff]   ;;  %v6881_v38 = vld [vmem:[#allocation2 + $0x18] sm:$0xff]   ;;  %v300_v42 = vld [vmem:[%s7282_s28 + $0x30] sm:$0xf]  ;;  %vm3196_vm6 = vcmask 1045504   ;;  %vm736_vm7 = vcmask 130048  }
  0x22   : > { %6570 = vmatpush3.bf16.msra.mxu0 %v1621_v31  ;;  %6532 = vmatpush3.bf16.msra.mxu1 %v1109_v34  ;;  %v6882_v39 = vld [vmem:[#allocation2 + $0x68] sm:$0xff]   ;;  %v301_v43 = vld [vmem:[%s7282_s28 + $0x34] sm:$0xf]  ;;  %v320_v44 = vld [vmem:[%s7282_s28 + $0x80] sm:$0xf]  ;;  %vm4864_vm9 = vcmask 1044480  }
  0x23   : > { %6499 = vmatprep.mubr.msk.bf16.mxu0 %vm500_vm2, %v6879_v36  ;;  %6519 = vmatprep.mubr.msk.bf16.mxu1 %vm500_vm2, %v6880_v37  ;;  %v6883_v40 = vld [vmem:[#allocation2 + $0x20] sm:$0xff]   ;;  %337 = vst.msk [vmem:[#allocation2 + $0x30] sm:$0xf] %vm324_vm1, %v300_v42  ;;  %338 = vst.msk [vmem:[#allocation2 + $0x34] sm:$0xf] %vm324_vm1, %v301_v43  ;;  %v6893_v55 = vld [vmem:[#allocation2 + $0x8] sm:$0xff]  }
  0x24   : > { %6841 = vmatprep.subr.msk.bf16.mxu1 %vm555_vm0, %v7337_v32  ;;  %6842 = vmatprep.subr.msk.bf16.mxu0 %vm555_vm0, %v7345_v35  ;;  %v6884_v41 = vld [vmem:[#allocation2 + $0x70] sm:$0xff]   ;;  %v321_v45 = vld [vmem:[%s7282_s28 + $0x84] sm:$0xf]  ;;  %357 = vst.msk [vmem:[#allocation2 + $0x80] sm:$0xf] %vm324_vm1, %v320_v44  ;;  %v914_v60 = vshll.u32 %v6893_v55, 16 }
  0x25   : > { %v302_v46 = vld [vmem:[%s7282_s28 + $0x38] sm:$0xf]  ;;  %v303_v47 = vld [vmem:[%s7282_s28 + $0x3c] sm:$0xf]  ;;  %358 = vst.msk [vmem:[#allocation2 + $0x84] sm:$0xf] %vm324_vm1, %v321_v45 }
  0x26   : > { %v6885_v48 = vld [vmem:[#allocation2 + $0x28] sm:$0xff]   ;;  %339 = vst.msk [vmem:[#allocation2 + $0x38] sm:$0xf] %vm324_vm1, %v302_v46  ;;  %340 = vst.msk [vmem:[#allocation2 + $0x3c] sm:$0xf] %vm324_vm1, %v303_v47  ;;  %v6892_v54 = vld [vmem:[#allocation2] sm:$0xff]  }
  0x27   : > { %v322_v49 = vld [vmem:[%s7282_s28 + $0x88] sm:$0xf]  ;;  %v323_v50 = vld [vmem:[%s7282_s28 + $0x8c] sm:$0xf]  ;;  %v304_v51 = vld [vmem:[%s7282_s28 + $0x40] sm:$0xf] }
  0x28   : > { %v6886_v52 = vld [vmem:[#allocation2 + $0x78] sm:$0xff]   ;;  %359 = vst.msk [vmem:[#allocation2 + $0x88] sm:$0xf] %vm324_vm1, %v322_v49  ;;  %360 = vst.msk [vmem:[#allocation2 + $0x8c] sm:$0xf] %vm324_vm1, %v323_v50  ;;  %v909_v58 = vshll.u32 %v6892_v54, 16 }
  0x29   : > { %6500 = vmatmul.mubr.msk.bf16.gmra.mxu0 %vm500_vm2, %v6881_v38  ;;  %6520 = vmatmul.mubr.msk.bf16.gmra.mxu1 %vm500_vm2, %v6882_v39  ;;  %v305_v53 = vld [vmem:[%s7282_s28 + $0x44] sm:$0xf]  ;;  %341 = vst.msk [vmem:[#allocation2 + $0x40] sm:$0xf] %vm324_vm1, %v304_v51  ;;  %v306_v56 = vld [vmem:[%s7282_s28 + $0x48] sm:$0xf] }
  0x2a   : > { %6503 = vmatprep.mubr.msk.bf16.mxu0 %vm500_vm2, %v6883_v40  ;;  %6523 = vmatprep.mubr.msk.bf16.mxu1 %vm500_vm2, %v6884_v41  ;;  %342 = vst.msk [vmem:[#allocation2 + $0x44] sm:$0xf] %vm324_vm1, %v305_v53  ;;  %v307_v57 = vld [vmem:[%s7282_s28 + $0x4c] sm:$0xf]  ;;  %343 = vst.msk [vmem:[#allocation2 + $0x48] sm:$0xf] %vm324_vm1, %v306_v56 }
  0x2b   : > { %344 = vst.msk [vmem:[#allocation2 + $0x4c] sm:$0xf] %vm324_vm1, %v307_v57  ;;  %v907_v59 = vshrl.u32 %v6892_v54, 16  ;;  %v6895_v61 = vld [vmem:[#allocation2 + $0x10] sm:$0xff]   ;;  %v911_v63 = vrot.slane %v909_v58, 1  ;;  %v918_v1 = vshrl.u32 %v6893_v55, 16 }
  0x2c   : > { %v6887_v62 = vld [vmem:[#allocation2 + $0x30] sm:$0xff]   ;;  %v6888_v0 = vld [vmem:[#allocation2 + $0x80] sm:$0xff]   ;;  %v6896_v2 = vld [vmem:[#allocation2 + $0x18] sm:$0xff]   ;;  %v916_v5 = vrot.slane %v914_v60, 1  ;;  %v922_v7 = vshll.u32 %v6895_v61, 16  ;;  %v926_v9 = vshrl.u32 %v6895_v61, 16 }
  0x2d   : > { %v6889_v3 = vld [vmem:[#allocation2 + $0x38] sm:$0xff]   ;;  %v912_v4 = vor.u32 %v911_v63, %v907_v59  ;;  %v930_v11 = vshll.u32 %v6896_v2, 16  ;;  %v6898_v12 = vld [vmem:[#allocation2 + $0x8] sm:$0xff]   ;;  %v6897_v13 = vld [vmem:[#allocation2] sm:$0xfe]   ;;  %v934_v28 = vshrl.u32 %v6896_v2, 16 }
  0x2e   : > { %v920_v14 = vor.u32 %v918_v1, %v916_v5  ;;  %v924_v15 = vrot.slane %v922_v7, 1  ;;  %v1530_v16 = vrot.slane %v6898_v12, 1  ;;  %v6899_v17 = vld [vmem:[#allocation2 + $0x20] sm:$0xff]   ;;  %v1529_v18 = vrot.slane %v6897_v13, 1  ;;  %v6901_v19 = vld [vmem:[#allocation2 + $0x28] sm:$0xff]   ;;  %v6900_v26 = vld [vmem:[#allocation2 + $0x10] sm:$0xff]  }
  0x2f   : > { %v6890_v6 = vld [vmem:[#allocation2 + $0x88] sm:$0xff]   ;;  %v917_v10 = vsel %vm905_vm3, %v912_v4, %v916_v5  ;;  %v932_v21 = vrot.slane %v930_v11, 1  ;;  %v938_v25 = vshll.u32 %v6899_v17, 16  ;;  %v942_v29 = vshrl.u32 %v6899_v17, 16  ;;  %v6902_v31 = vld [vmem:[#allocation2 + $0x18] sm:$0xff]   ;;  %v6903_v34 = vld [vmem:[#allocation2 + $0x30] sm:$0xff]  }
  0x30   : > { %v928_v20 = vor.u32 %v926_v9, %v924_v15  ;;  %v925_v24 = vsel %vm905_vm3, %v920_v14, %v924_v15  ;;  %v1531_v27 = vsel %vm1528_vm4, %v1529_v18, %v1530_v16  ;;  %v946_v30 = vshll.u32 %v6901_v19, 16  ;;  %v7401_v36 = vld [vmem:[%s8503_s2 + $0xa] sm:$0x3]  ;;  %v6905_v42 = vld [vmem:[#allocation2 + $0x38] sm:$0xff]   ;;  %v6904_v46 = vld [vmem:[#allocation2 + $0x20] sm:$0xff]   ;;  %s6849_s25 = smul.u32 144, %s8511_s15 }
  0x31   : > { %6504 = vmatmul.mubr.msk.bf16.gmra.mxu0 %vm500_vm2, %v6885_v48  ;;  %6524 = vmatmul.mubr.msk.bf16.gmra.mxu1 %vm500_vm2, %v6886_v52  ;;  %v6891_v8 = vld [vmem:[#allocation2 + $0x40] sm:$0xff]   ;;  %v940_v32 = vrot.slane %v938_v25, 1  ;;  %v1532_v37 = vrot.slane %v6900_v26, 1  ;;  %v936_v38 = vor.u32 %v934_v28, %v932_v21  ;;  %v1534_v41 = vrot.slane %v6902_v31, 1  ;;  %v6906_v49 = vld [vmem:[#allocation2 + $0x28] sm:$0xff]   ;;  %v6910_v4 = vld [vmem:[#allocation2 + $0x38] sm:$0xff]  }
  0x32   : > { %6507 = vmatprep.mubr.msk.bf16.mxu0 %vm500_vm2, %v6887_v62  ;;  %6527 = vmatprep.mubr.msk.bf16.mxu1 %vm500_vm2, %v6888_v0  ;;  %v6894_v22 = vld [vmem:[#allocation2 + $0x48] sm:$0xff]   ;;  %v933_v33 = vsel %vm905_vm3, %v928_v20, %v932_v21  ;;  %v948_v40 = vrot.slane %v946_v30, 1  ;;  %v954_v43 = vshll.u32 %v6903_v34, 16  ;;  %v2777_v45 = vsel %vm555_vm0, %v7345_v35, 0  ;;  %v6907_v56 = vld [vmem:[#allocation2 + $0x40] sm:$0xff]   ;;  %v6908_v62 = vld [vmem:[#allocation2 + $0x30] sm:$0xff]   ;;  %s8268_s28 = scalar_lea.vmem %s8505_s4, %s6849_s25 }
  0x33   : > { %v944_v39 = vor.u32 %v942_v29, %v940_v32  ;;  %v1533_v44 = vsel %vm1528_vm4, %v1530_v16, %v1532_v37  ;;  %v941_v47 = vsel %vm905_vm3, %v936_v38, %v940_v32  ;;  %v950_v48 = vshrl.u32 %v6901_v19, 16  ;;  %v7417_v54 = vld [vmem:[%s8503_s2 + $0xc] sm:$0x3]  ;;  %v6913_v15 = vld [vmem:[#allocation2 + $0x58] sm:$0xff]   ;;  %v6912_v16 = vld [vmem:[#allocation2 + $0x40] sm:$0xff]  }
  0x34   : > { %v1535_v51 = vsel %vm1528_vm4, %v1532_v37, %v1534_v41  ;;  %v958_v52 = vshrl.u32 %v6903_v34, 16  ;;  %v962_v53 = vshll.u32 %v6905_v42, 16  ;;  %v956_v55 = vrot.slane %v954_v43, 1  ;;  %v6909_v61 = vld [vmem:[#allocation2 + $0x48] sm:$0xff]   ;;  %v6915_v28 = vld [vmem:[#allocation2 + $0x60] sm:$0xff]   ;;  %v6918_v43 = vld [vmem:[#allocation2 + $0x58] sm:$0xff]  }
  0x35   : > { %v949_v50 = vsel %vm905_vm3, %v944_v39, %v948_v40  ;;  %v1536_v35 = vrot.slane %v6904_v46, 1  ;;  %v952_v57 = vor.u32 %v950_v48, %v948_v40  ;;  %v1538_v58 = vrot.slane %v6906_v49, 1  ;;  %v361_v29 = vld [vmem:[%s7441_s14] sm:$0xf]  ;;  %v6917_v32 = vld [vmem:[#allocation2 + $0x68] sm:$0xff]   ;;  %v6916_v39 = vld [vmem:[#allocation2 + $0x50] sm:$0xff]  }
  0x36   : > { %v960_v59 = vor.u32 %v958_v52, %v956_v55  ;;  %v964_v60 = vrot.slane %v962_v53, 1  ;;  %v970_v0 = vshll.u32 %v6907_v56, 16  ;;  %v978_v7 = vshll.u32 %v6909_v61, 16  ;;  %367 = vst.msk [vmem:[#allocation2 + $0x90] sm:$0xf] %vm324_vm1, %v361_v29  ;;  %v6919_v49 = vld [vmem:[#allocation2 + $0x70] sm:$0xff]  }
  0x37   : > { %v1537_v63 = vsel %vm1528_vm4, %v1534_v41, %v1536_v35  ;;  %v957_v1 = vsel %vm905_vm3, %v952_v57, %v956_v55  ;;  %v1539_v2 = vsel %vm1528_vm4, %v1536_v35, %v1538_v58  ;;  %v1542_v12 = vrot.slane %v6910_v4, 1  ;;  %v6921_v55 = vld [vmem:[#allocation2 + $0x78] sm:$0xff]   ;;  %v6920_v57 = vld [vmem:[#allocation2 + $0x60] sm:$0xff]   ;;  %v6929_v29 = vld [vmem:[#allocation2 + $0x88] sm:$0xff]  }
  0x38   : > { %v965_v5 = vsel %vm905_vm3, %v960_v59, %v964_v60  ;;  %v972_v9 = vrot.slane %v970_v0, 1  ;;  %v980_v14 = vrot.slane %v978_v7, 1  ;;  %v982_v21 = vshrl.u32 %v6909_v61, 16  ;;  %v6922_v61 = vld [vmem:[#allocation2 + $0x68] sm:$0xff]  }
  0x39   : > { %6508 = vmatmul.mubr.msk.bf16.gmra.mxu0 %vm500_vm2, %v6889_v3  ;;  %6528 = vmatmul.mubr.msk.bf16.gmra.mxu1 %vm500_vm2, %v6890_v6  ;;  %v966_v3 = vshrl.u32 %v6905_v42, 16  ;;  %v974_v6 = vshrl.u32 %v6907_v56, 16  ;;  %v994_v25 = vshll.u32 %v6913_v15, 16  ;;  %v1544_v26 = vrot.slane %v6912_v16, 1 }
  0x3a   : > { %6511 = vmatprep.mubr.msk.bf16.mxu0 %vm500_vm2, %v6891_v8  ;;  %6533 = vmatprep.mubr.msk.bf16.mxu1 %vm500_vm2, %v917_v10  ;;  %v1540_v8 = vrot.slane %v6908_v62, 1  ;;  %v6911_v10 = vld [vmem:[#allocation2 + $0x50] sm:$0xff]   ;;  %v984_v30 = vor.u32 %v982_v21, %v980_v14  ;;  %v1002_v38 = vshll.u32 %v6915_v28, 16  ;;  %v998_v42 = vshrl.u32 %v6913_v15, 16  ;;  %v6926_v15 = vld [vmem:[#allocation2 + $0x78] sm:$0xff]  }
  0x3b   : > { %v968_v11 = vor.u32 %v966_v3, %v964_v60  ;;  %v976_v13 = vor.u32 %v974_v6, %v972_v9  ;;  %v986_v18 = vshll.u32 %v6911_v10, 16  ;;  %v996_v34 = vrot.slane %v994_v25, 1 }
  0x3c   : > { %v1541_v17 = vsel %vm1528_vm4, %v1538_v58, %v1540_v8  ;;  %v1543_v20 = vsel %vm1528_vm4, %v1540_v8, %v1542_v12  ;;  %v1545_v37 = vsel %vm1528_vm4, %v1542_v12, %v1544_v26  ;;  %v1010_v46 = vshll.u32 %v6917_v32, 16  ;;  %v6925_v8 = vld [vmem:[#allocation2 + $0x88] sm:$0xff]  }
  0x3d   : > { %v973_v19 = vsel %vm905_vm3, %v968_v11, %v972_v9  ;;  %v1548_v48 = vrot.slane %v6916_v39, 1  ;;  %v1018_v56 = vshll.u32 %v6919_v49, 16  ;;  %v1014_v60 = vshrl.u32 %v6917_v32, 16  ;;  %v6924_v11 = vld [vmem:[#allocation2 + $0x70] sm:$0xff]   ;;  %v6930_v39 = vld [vmem:[#allocation2 + $0x8] sm:$0xfe]  }
  0x3e   : > { %v1012_v53 = vrot.slane %v1010_v46, 1  ;;  %v1026_v0 = vshll.u32 %v6921_v55, 16  ;;  %v1552_v3 = vrot.slane %v6920_v57, 1  ;;  %v6927_v21 = vld [vmem:[#allocation2 + $0x90] ss:$0 sps:$4 sm:$0x11]  }
  0x3f   : > { %v1050_v32 = vshll.u32 %v6927_v21, 16  ;;  %v6938_v57 = vld [vmem:[#allocation2 + $0x18] sm:$0xff]   ;;  %vm4219_vm8 = vsmask.f32 5376  ;;  %vm5719_vm10 = vcmask 125952  }
  0x40   : > { %v1016_v4 = vor.u32 %v1014_v60, %v1012_v53  ;;  %v1028_v7 = vrot.slane %v1026_v0, 1 }
  0x41   : > { %6512 = vmatmul.mubr.msk.bf16.gmra.mxu0 %vm500_vm2, %v6894_v22  ;;  %6534 = vmatmul.mubr.msk.bf16.vlgmr.msra.gmra.mxu1 %vm500_vm2, %v925_v24  ;;  %v6914_v22 = vld [vmem:[#allocation2 + $0x48] sm:$0xff]   ;;  %v990_v24 = vshrl.u32 %v6911_v10, 16  ;;  %v1052_v46 = vrot.slane %v1050_v32, 1  ;;  %v6946_v32 = vld [vmem:[#allocation2 + $0x38] sm:$0xff]  }
  0x42   : > { %6571 = vmatprep.mubr.msk.bf16.mxu0 %vm500_vm2, %v1531_v27  ;;  %6608 = vmatpush3.bf16.msra.mxu1 %v2132_v23  ;;  %v981_v23 = vsel %vm905_vm3, %v976_v13, %v980_v14  ;;  %v988_v27 = vrot.slane %v986_v18, 1  ;;  %v1546_v31 = vrot.slane %v6914_v22, 1  ;;  %v1030_v14 = vshrl.u32 %v6921_v55, 16 }
  0x43   : > { %6537 = vmatprep.mubr.msk.bf16.mxu1 %vm500_vm2, %v933_v33  ;;  %6843 = vmatprep.subr.msk.bf16.mxu1 %vm555_vm0, %v7401_v36  ;;  %v1042_v18 = vshll.u32 %v6925_v8, 16 }
  0x44   : > { %v992_v33 = vor.u32 %v990_v24, %v988_v27  ;;  %v989_v40 = vsel %vm905_vm3, %v984_v30, %v988_v27  ;;  %v1547_v41 = vsel %vm1528_vm4, %v1544_v26, %v1546_v31  ;;  %v1549_v35 = vsel %vm1528_vm4, %v1546_v31, %v1548_v48  ;;  %v6928_v26 = vld [vmem:[#allocation2 + $0x80] sm:$0xff]   ;;  %v6936_v27 = vld [vmem:[#allocation2 + $0x10] sm:$0xff]   ;;  %v6935_v30 = vld [vmem:[#allocation2 + $0x8] sm:$0xfe]  }
  0x45   : > { %v1032_v22 = vor.u32 %v1030_v14, %v1028_v7  ;;  %v1044_v25 = vrot.slane %v1042_v18, 1 }
  0x49   : > { %6572 = vmatmul.mubr.msk.bf16.vlgmr.msra.gmra.mxu0 %vm500_vm2, %v1533_v44  ;;  %6538 = vmatmul.mubr.msk.bf16.gmra.mxu1 %vm500_vm2, %v941_v47  ;;  %v997_v44 = vsel %vm905_vm3, %v992_v33, %v996_v34  ;;  %v1004_v47 = vrot.slane %v1002_v38, 1 }
  0x4a   : > { %6646 = vmatpush3.bf16.msra.mxu0 %v2777_v45  ;;  %6541 = vmatprep.mubr.msk.bf16.mxu1 %vm500_vm2, %v949_v50  ;;  %v1006_v45 = vshrl.u32 %v6915_v28, 16  ;;  %v1000_v50 = vor.u32 %v998_v42, %v996_v34  ;;  %v1046_v34 = vshrl.u32 %v6925_v8, 16  ;;  %v1560_v42 = vrot.slane %v6928_v26, 1  ;;  %v6942_v8 = vld [vmem:[#allocation2 + $0x28] sm:$0xff]  }
  0x4b   : > { %6575 = vmatprep.mubr.msk.bf16.mxu0 %vm500_vm2, %v1535_v51  ;;  %6844 = vmatprep.subr.msk.bf16.mxu0 %vm555_vm0, %v7417_v54  ;;  %v1550_v51 = vrot.slane %v6918_v43, 1  ;;  %v1562_v43 = vrot.slane %v6929_v29, 1 }
  0x4c   : > { %v1008_v52 = vor.u32 %v1006_v45, %v1004_v47  ;;  %v1005_v58 = vsel %vm905_vm3, %v1000_v50, %v1004_v47  ;;  %v1048_v45 = vor.u32 %v1046_v34, %v1044_v25  ;;  %v2556_v47 = vshll.u32 %v6935_v30, 16  ;;  %v6932_v50 = vld [vmem:[#allocation2 + $0x90] ss:$0 sps:$4 sm:$0x11]  }
  0x4d   : > { %v1551_v59 = vsel %vm1528_vm4, %v1548_v48, %v1550_v51  ;;  %v1553_v10 = vsel %vm1528_vm4, %v1550_v51, %v1552_v3  ;;  %v2040_v48 = vrot.slane %v6930_v39, 1  ;;  %v6933_v51 = vld [vmem:[#allocation2 + $0x18] sm:$0xff]  }
  0x4e   : > { %v1013_v62 = vsel %vm905_vm3, %v1008_v52, %v1012_v53  ;;  %v6934_v52 = vld [vmem:[#allocation2 + $0x20] sm:$0xff]   ;;  %v2558_v60 = vrot.slane %v2556_v47, 2  ;;  %v2043_v0 = vrot.slane %v6933_v51, 1  ;;  %v2606_v47 = vshrl.u32 %v6946_v32, 16 }
  0x51   : > { %6576 = vmatmul.mubr.msk.bf16.gmra.mxu0 %vm500_vm2, %v1537_v63  ;;  %6542 = vmatmul.mubr.msk.bf16.gmra.mxu1 %vm500_vm2, %v957_v1  ;;  %v1022_v63 = vshrl.u32 %v6919_v49, 16  ;;  %v6923_v1 = vld [vmem:[#allocation2 + $0x80] sm:$0xff]  }
  0x52   : > { %6579 = vmatprep.mubr.msk.bf16.mxu0 %vm500_vm2, %v1539_v2  ;;  %6545 = vmatprep.mubr.msk.bf16.mxu1 %vm500_vm2, %v965_v5  ;;  %v1020_v2 = vrot.slane %v1018_v56, 1  ;;  %v1554_v5 = vrot.slane %v6922_v61, 1  ;;  %v1034_v9 = vshll.u32 %v6923_v1, 16  ;;  %v6940_v61 = vld [vmem:[#allocation2 + $0x20] sm:$0xff]  }
  0x54   : > { %v1024_v6 = vor.u32 %v1022_v63, %v1020_v2  ;;  %v1021_v12 = vsel %vm905_vm3, %v1016_v4, %v1020_v2  ;;  %v1555_v13 = vsel %vm1528_vm4, %v1552_v3, %v1554_v5  ;;  %v1564_v63 = vrot.slane %v6932_v50, 1 }
  0x55   : > { %v2573_v2 = vshll.u32 %v6938_v57, 16  ;;  %v2045_v3 = vrot.slane %v6934_v52, 1 }
  0x56   : > { %v1029_v16 = vsel %vm905_vm3, %v1024_v6, %v1028_v7  ;;  %v2579_v6 = vshrl.u32 %v6940_v61, 16  ;;  %v2582_v7 = vshll.u32 %v6940_v61, 16 }
  0x57   : > { %v2046_v18 = vsel %vm1528_vm4, %v2043_v0, %v2045_v3 }
  0x58   : > { %v2584_v21 = vrot.slane %v2582_v7, 2 }
  0x59   : > { %6580 = vmatmul.mubr.msk.bf16.gmra.mxu0 %vm500_vm2, %v1541_v17  ;;  %6546 = vmatmul.mubr.msk.bf16.gmra.mxu1 %vm500_vm2, %v973_v19  ;;  %v1038_v17 = vshrl.u32 %v6923_v1, 16  ;;  %v1036_v19 = vrot.slane %v1034_v9, 1  ;;  %v2570_v1 = vshrl.u32 %v6938_v57, 16  ;;  %v6937_v9 = vld [vmem:[#allocation2 + $0x28] sm:$0xff]  }
  0x5a   : > { %6583 = vmatprep.mubr.msk.bf16.mxu0 %vm500_vm2, %v1543_v20  ;;  %6549 = vmatprep.mubr.msk.bf16.mxu1 %vm500_vm2, %v981_v23  ;;  %v1556_v20 = vrot.slane %v6924_v11, 1  ;;  %v1558_v23 = vrot.slane %v6926_v15, 1  ;;  %v3289_v15 = vsel %vm555_vm0, %v7401_v36, 0 }
  0x5b   : > { %v1040_v24 = vor.u32 %v1038_v17, %v1036_v19  ;;  %v1037_v31 = vsel %vm905_vm3, %v1032_v22, %v1036_v19  ;;  %v2572_v11 = vrot.slane %v2570_v1, 1  ;;  %v6944_v17 = vld [vmem:[#allocation2 + $0x30] sm:$0xff]   ;;  %v2588_v22 = vshrl.u32 %v6942_v8, 16 }
  0x5c   : > { %v1557_v28 = vsel %vm1528_vm4, %v1554_v5, %v1556_v20  ;;  %v1559_v33 = vsel %vm1528_vm4, %v1556_v20, %v1558_v23  ;;  %v6939_v19 = vld [vmem:[#allocation2 + $0x30] sm:$0xff]   ;;  %v2581_v20 = vrot.slane %v2579_v6, 1  ;;  %v2597_v26 = vshrl.u32 %v6944_v17, 16 }
  0x5d   : > { %v1045_v38 = vsel %vm905_vm3, %v1040_v24, %v1044_v25  ;;  %v2047_v24 = vrot.slane %v6937_v9, 1  ;;  %v2591_v25 = vshll.u32 %v6942_v8, 16 }
  0x5e   : > { %v2585_v29 = vor.u32 %v2584_v21, %v2581_v20  ;;  %v2599_v39 = vrot.slane %v2597_v26, 1  ;;  %v6951_v21 = vld [vmem:[#allocation2 + $0x60] sm:$0xff]  }
  0x5f   : > { %v2593_v34 = vrot.slane %v2591_v25, 2 }
  0x61   : > { %6584 = vmatmul.mubr.msk.bf16.gmra.mxu0 %vm500_vm2, %v1545_v37  ;;  %6550 = vmatmul.mubr.msk.bf16.gmra.mxu1 %vm500_vm2, %v989_v40  ;;  %v6931_v37 = vld [vmem:[#allocation2 + $0x10] sm:$0xff]   ;;  %v2561_v40 = vshrl.u32 %v6936_v27, 16 }
  0x62   : > { %6587 = vmatprep.mubr.msk.bf16.mxu0 %vm500_vm2, %v1547_v41  ;;  %6553 = vmatprep.mubr.msk.bf16.mxu1 %vm500_vm2, %v997_v44  ;;  %v2564_v41 = vshll.u32 %v6936_v27, 16  ;;  %v2553_v44 = vshrl.u32 %v6935_v30, 16  ;;  %v2041_v49 = vrot.slane %v6931_v37, 1  ;;  %v2600_v27 = vshll.u32 %v6944_v17, 16  ;;  %v6941_v30 = vld [vmem:[#allocation2 + $0x38] sm:$0xff]   ;;  %v6956_v17 = vld [vmem:[#allocation2 + $0x60] sm:$0xff]  }
  0x63   : > { %v2563_v53 = vrot.slane %v2561_v40, 1  ;;  %v2048_v37 = vsel %vm1528_vm4, %v2045_v3, %v2047_v24  ;;  %v7529_v3 = vld [vmem:[%s8503_s2 + $0x10] sm:$0x3]  ;;  %v2651_v25 = vshrl.u32 %v6956_v17, 16  ;;  %v2654_v26 = vshll.u32 %v6956_v17, 16 }
  0x64   : > { %v2566_v55 = vrot.slane %v2564_v41, 2  ;;  %v2555_v56 = vrot.slane %v2553_v44, 1  ;;  %v2044_v14 = vsel %vm1528_vm4, %v2041_v49, %v2043_v0  ;;  %v2602_v40 = vrot.slane %v2600_v27, 2  ;;  %v6948_v41 = vld [vmem:[#allocation2 + $0x40] sm:$0xff]   ;;  %v6947_v0 = vld [vmem:[#allocation2 + $0x50] sm:$0xff]  }
  0x65   : > { %v2615_v50 = vshrl.u32 %v6948_v41, 16  ;;  %v2618_v51 = vshll.u32 %v6948_v41, 16  ;;  %v2057_v9 = vrot.slane %v6947_v0, 1 }
  0x66   : > { %v2559_v4 = vor.u32 %v2558_v60, %v2555_v56  ;;  %v2567_v5 = vor.u32 %v2566_v55, %v2563_v53  ;;  %v6945_v53 = vld [vmem:[#allocation2 + $0x48] sm:$0xff]   ;;  %v2608_v56 = vrot.slane %v2606_v47, 1 }
  0x67   : > { %v6950_v55 = vld [vmem:[#allocation2 + $0x48] sm:$0xff]   ;;  %v2617_v61 = vrot.slane %v2615_v50, 1 }
  0x68   : > { %v2624_v1 = vshrl.u32 %v6950_v55, 16 }
  0x69   : > { %6588 = vmatmul.mubr.msk.bf16.gmra.mxu0 %vm500_vm2, %v1549_v35  ;;  %6554 = vmatmul.mubr.msk.bf16.gmra.mxu1 %vm500_vm2, %v1005_v58  ;;  %v1561_v35 = vsel %vm1528_vm4, %v1558_v23, %v1560_v42  ;;  %v1053_v58 = vsel %vm905_vm3, %v1048_v45, %v1052_v46  ;;  %v363_v23 = vld [vmem:[%s7441_s14 + $0x8] sm:$0xf]  ;;  %v6943_v45 = vld [vmem:[#allocation2 + $0x40] sm:$0xff]  }
  0x6a   : > { %6591 = vmatprep.mubr.msk.bf16.mxu0 %vm500_vm2, %v1551_v59  ;;  %6557 = vmatprep.mubr.msk.bf16.mxu1 %vm500_vm2, %v1013_v62  ;;  %v1563_v59 = vsel %vm1528_vm4, %v1560_v42, %v1562_v43  ;;  %v2042_v62 = vsel %vm1528_vm4, %v2040_v48, %v2041_v49  ;;  %369 = vst.msk [vmem:[#allocation2 + $0x98] sm:$0xf] %vm324_vm1, %v363_v23  ;;  %v7511_v42 = vld [vmem:[%s8503_s2 + $0xe] sm:$0x3]  ;;  %v2609_v48 = vshll.u32 %v6946_v32, 16  ;;  %v2053_v52 = vrot.slane %v6943_v45, 1 }
  0x6b   : > { %v2603_v49 = vor.u32 %v2602_v40, %v2599_v39  ;;  %v2656_v32 = vrot.slane %v2654_v26, 2 }
  0x6c   : > { %v2611_v57 = vrot.slane %v2609_v48, 2 }
  0x71   : > { %6592 = vmatmul.mubr.msk.bf16.gmra.mxu0 %vm500_vm2, %v1553_v10  ;;  %6558 = vmatmul.mubr.msk.bf16.gmra.mxu1 %vm500_vm2, %v1021_v12  ;;  %v1565_v10 = vsel %vm1528_vm4, %v1562_v43, %v1564_v63  ;;  %v2575_v12 = vrot.slane %v2573_v2, 2  ;;  %v2055_v2 = vrot.slane %v6945_v53, 1  ;;  %v6964_v53 = vld [vmem:[#allocation2 + $0x80] sm:$0xff]  }
  0x72   : > { %6595 = vmatprep.mubr.msk.bf16.mxu0 %vm500_vm2, %v1555_v13  ;;  %6561 = vmatprep.mubr.msk.bf16.mxu1 %vm500_vm2, %v1029_v16  ;;  %v362_v13 = vld [vmem:[%s7441_s14 + $0x4] sm:$0xf]  ;;  %v2568_v16 = vsel %vm2551_vm5, %v2559_v4, %v2567_v5  ;;  %v2612_v4 = vor.u32 %v2611_v57, %v2608_v56 }
  0x73   : > { %368 = vst.msk [vmem:[#allocation2 + $0x94] sm:$0xf] %vm324_vm1, %v362_v13  ;;  %v2576_v36 = vor.u32 %v2575_v12, %v2572_v11  ;;  %v2626_v11 = vrot.slane %v2624_v1, 1  ;;  %v6954_v12 = vld [vmem:[#allocation2 + $0x58] sm:$0xff]   ;;  %v2058_v20 = vsel %vm1528_vm4, %v2055_v2, %v2057_v9  ;;  %v2687_v1 = vshrl.u32 %v6964_v53, 16 }
  0x74   : > { %v2613_v13 = vsel %vm2551_vm5, %v2603_v49, %v2612_v4  ;;  %v2645_v23 = vshll.u32 %v6954_v12, 16 }
  0x75   : > { %v2586_v44 = vsel %vm2551_vm5, %v2576_v36, %v2585_v29 }
  0x79   : > { %6596 = vmatmul.mubr.msk.bf16.gmra.mxu0 %vm500_vm2, %v1557_v28  ;;  %6562 = vmatmul.mubr.msk.bf16.gmra.mxu1 %vm500_vm2, %v1037_v31  ;;  %v2049_v28 = vrot.slane %v6939_v19, 1  ;;  %v2590_v31 = vrot.slane %v2588_v22, 1  ;;  %v2642_v22 = vshrl.u32 %v6954_v12, 16  ;;  %v6961_v12 = vld [vmem:[#allocation2 + $0x88] sm:$0xff]  }
  0x7a   : > { %6599 = vmatprep.mubr.msk.bf16.mxu0 %vm500_vm2, %v1559_v33  ;;  %6565 = vmatprep.mubr.msk.bf16.mxu1 %vm500_vm2, %v1045_v38  ;;  %v2577_v33 = vsel %vm2551_vm5, %v2567_v5, %v2576_v36  ;;  %v3800_v38 = vsel %vm555_vm0, %v7417_v54, 0  ;;  %v2051_v54 = vrot.slane %v6941_v30, 1  ;;  %v2627_v5 = vshll.u32 %v6950_v55, 16 }
  0x7b   : > { %v2050_v43 = vsel %vm1528_vm4, %v2047_v24, %v2049_v28  ;;  %v2594_v46 = vor.u32 %v2593_v34, %v2590_v31  ;;  %v2644_v30 = vrot.slane %v2642_v22, 1  ;;  %v2647_v31 = vrot.slane %v2645_v23, 2 }
  0x7c   : > { %v2054_v63 = vsel %vm1528_vm4, %v2051_v54, %v2053_v52  ;;  %v2653_v34 = vrot.slane %v2651_v25, 1 }
  0x7d   : > { %v2604_v60 = vsel %vm2551_vm5, %v2594_v46, %v2603_v49  ;;  %v2648_v45 = vor.u32 %v2647_v31, %v2644_v30  ;;  %v6970_v30 = vld [vmem:[#allocation2 + $0x98] ss:$0 sps:$4 sm:$0x33]  }
  0x7e   : > { %v2657_v49 = vor.u32 %v2656_v32, %v2653_v34 }
  0x81   : > { %6600 = vmatmul.mubr.msk.bf16.gmra.mxu0 %vm500_vm2, %v1561_v35  ;;  %6566 = vmatmul.mubr.msk.bf16.gmra.mxu1 %vm500_vm2, %v1053_v58  ;;  %v2595_v35 = vsel %vm2551_vm5, %v2585_v29, %v2594_v46  ;;  %v6952_v58 = vld [vmem:[#allocation2 + $0x50] sm:$0xff]   ;;  %v6953_v29 = vld [vmem:[#allocation2 + $0x68] sm:$0xff]  }
  0x82   : > { %6603 = vmatprep.mubr.msk.bf16.mxu0 %vm500_vm2, %v1563_v59  ;;  %6609 = vmatprep.mubr.msk.bf16.mxu1 %vm500_vm2, %v2042_v62  ;;  %v2052_v59 = vsel %vm1528_vm4, %v2049_v28, %v2051_v54  ;;  %v2620_v62 = vrot.slane %v2618_v51, 2  ;;  %v2633_v6 = vshrl.u32 %v6952_v58, 16  ;;  %v2636_v7 = vshll.u32 %v6952_v58, 16  ;;  %v6957_v51 = vld [vmem:[#allocation2 + $0x78] sm:$0xff]  }
  0x83   : > { %v2061_v28 = vrot.slane %v6951_v21, 1  ;;  %v365_v21 = vld [vmem:[%s7441_s14 + $0x10] sm:$0xf] }
  0x84   : > { %v2621_v8 = vor.u32 %v2620_v62, %v2617_v61  ;;  %v6959_v62 = vld [vmem:[#allocation2 + $0x80] sm:$0xff]   ;;  %371 = vst.msk [vmem:[#allocation2 + $0xa0] sm:$0xf] %vm324_vm1, %v365_v21 }
  0x86   : > { %v2622_v19 = vsel %vm2551_vm5, %v2612_v4, %v2621_v8 }
  0x89   : > { %6604 = vmatmul.mubr.msk.bf16.gmra.mxu0 %vm500_vm2, %v1565_v10  ;;  %6610 = vmatmul.mubr.msk.bf16.vlgmr.msra.gmra.mxu1 %vm500_vm2, %v2044_v14  ;;  %v6949_v10 = vld [vmem:[#allocation2 + $0x58] sm:$0xff]   ;;  %v2629_v14 = vrot.slane %v2627_v5, 2  ;;  %v2690_v5 = vshll.u32 %v6964_v53, 16 }
  0x8a   : > { %6647 = vmatprep.mubr.msk.bf16.mxu0 %vm500_vm2, %v2568_v16  ;;  %6684 = vmatpush3.bf16.msra.mxu1 %v3289_v15  ;;  %v2635_v15 = vrot.slane %v2633_v6, 1  ;;  %v2638_v16 = vrot.slane %v2636_v7, 2  ;;  %v2059_v24 = vrot.slane %v6949_v10, 1  ;;  %v2069_v7 = vrot.slane %v6959_v62, 1  ;;  %v6971_v53 = vld [vmem:[#allocation2 + $0x18] sm:$0xff]  }
  0x8b   : > { %6613 = vmatprep.mubr.msk.bf16.mxu1 %vm500_vm2, %v2046_v18  ;;  %6845 = vmatprep.subr.msk.bf16.mxu1 %vm555_vm0, %v7511_v42  ;;  %v2056_v18 = vsel %vm1528_vm4, %v2053_v52, %v2055_v2  ;;  %v2630_v36 = vor.u32 %v2629_v14, %v2626_v11  ;;  %v6962_v52 = vld [vmem:[#allocation2 + $0x78] sm:$0xff]   ;;  %v2067_v2 = vrot.slane %v6957_v51, 1  ;;  %v2689_v10 = vrot.slane %v2687_v1, 1  ;;  %v6966_v11 = vld [vmem:[#allocation2 + $0x88] sm:$0xff]  }
  0x8c   : > { %v2639_v27 = vor.u32 %v2638_v16, %v2635_v15  ;;  %v2060_v39 = vsel %vm1528_vm4, %v2057_v9, %v2059_v24  ;;  %v2062_v41 = vsel %vm1528_vm4, %v2059_v24, %v2061_v28  ;;  %v2681_v0 = vshll.u32 %v6962_v52, 16  ;;  %v6967_v16 = vld [vmem:[#allocation2 + $0x90] sm:$0xff]  }
  0x8d   : > { %v2692_v15 = vrot.slane %v2690_v5, 2  ;;  %v2696_v23 = vshrl.u32 %v6966_v11, 16  ;;  %v2699_v24 = vshll.u32 %v6966_v11, 16  ;;  %v2705_v26 = vshrl.u32 %v6967_v16, 16 }
  0x8e   : > { %v2640_v40 = vsel %vm2551_vm5, %v2630_v36, %v2639_v27  ;;  %v2649_v55 = vsel %vm2551_vm5, %v2639_v27, %v2648_v45  ;;  %v2683_v9 = vrot.slane %v2681_v0, 2  ;;  %v2708_v27 = vshll.u32 %v6967_v16, 16  ;;  %v6979_v16 = vld [vmem:[#allocation2 + $0x38] sm:$0xff]  }
  0x8f   : > { %v2693_v25 = vor.u32 %v2692_v15, %v2689_v10  ;;  %v2701_v34 = vrot.slane %v2699_v24, 2  ;;  %v6978_v10 = vld [vmem:[#allocation2 + $0x28] sm:$0xff]   ;;  %v3208_v24 = vrot.slane %v6979_v16, 2 }
  0x91   : > { %6648 = vmatmul.mubr.msk.bf16.vlgmr.msra.gmra.mxu0 %vm500_vm2, %v2577_v33  ;;  %6614 = vmatmul.mubr.msk.bf16.gmra.mxu1 %vm500_vm2, %v2048_v37  ;;  %v2631_v33 = vsel %vm2551_vm5, %v2621_v8, %v2630_v36  ;;  %v6958_v37 = vld [vmem:[#allocation2 + $0x68] sm:$0xff]   ;;  %v2071_v36 = vrot.slane %v6961_v12, 1 }
  0x92   : > { %6722 = vmatpush3.bf16.msra.mxu0 %v3800_v38  ;;  %6617 = vmatprep.mubr.msk.bf16.mxu1 %vm500_vm2, %v2050_v43  ;;  %v6960_v38 = vld [vmem:[#allocation2 + $0x70] sm:$0xff]   ;;  %v2063_v43 = vrot.slane %v6953_v29, 1  ;;  %v2660_v54 = vshrl.u32 %v6958_v37, 16  ;;  %v2663_v46 = vshll.u32 %v6958_v37, 16 }
  0x93   : > { %6651 = vmatprep.mubr.msk.bf16.mxu0 %vm500_vm2, %v2586_v44  ;;  %6846 = vmatprep.subr.msk.bf16.mxu0 %vm555_vm0, %v7529_v3  ;;  %v6955_v44 = vld [vmem:[#allocation2 + $0x70] sm:$0xff]   ;;  %v2669_v47 = vshrl.u32 %v6960_v38, 16  ;;  %v2672_v48 = vshll.u32 %v6960_v38, 16  ;;  %v6965_v29 = vld [vmem:[#allocation2 + $0x98] ss:$0 sps:$4 sm:$0x11]   ;;  %v2072_v32 = vsel %vm1528_vm4, %v2069_v7, %v2071_v36 }
  0x94   : > { %v2065_v50 = vrot.slane %v6955_v44, 1  ;;  %v2665_v56 = vrot.slane %v2663_v46, 2  ;;  %v2707_v38 = vrot.slane %v2705_v26, 1  ;;  %v2075_v46 = vrot.slane %v6965_v29, 1  ;;  %v6983_v26 = vld [vmem:[#allocation2 + $0x48] sm:$0xff]  }
  0x95   : > { %v2671_v57 = vrot.slane %v2669_v47, 1  ;;  %v2674_v58 = vrot.slane %v2672_v48, 2 }
  0x96   : > { %v2066_v61 = vsel %vm1528_vm4, %v2063_v43, %v2065_v50  ;;  %v2068_v17 = vsel %vm1528_vm4, %v2065_v50, %v2067_v2 }
  0x97   : > { %v2675_v6 = vor.u32 %v2674_v58, %v2671_v57  ;;  %v6974_v57 = vld [vmem:[#allocation2 + $0x18] sm:$0xff]  }
  0x99   : > { %6652 = vmatmul.mubr.msk.bf16.gmra.mxu0 %vm500_vm2, %v2595_v35  ;;  %6618 = vmatmul.mubr.msk.bf16.gmra.mxu1 %vm500_vm2, %v2052_v59  ;;  %v2662_v35 = vrot.slane %v2660_v54, 1  ;;  %v2064_v59 = vsel %vm1528_vm4, %v2061_v28, %v2063_v43  ;;  %v6969_v43 = vld [vmem:[#allocation2 + $0x10] sm:$0xff]   ;;  %v2717_v54 = vshll.u32 %v6970_v30, 16 }
  0x9a   : > { %6655 = vmatprep.mubr.msk.bf16.mxu0 %vm500_vm2, %v2604_v60  ;;  %6621 = vmatprep.mubr.msk.bf16.mxu1 %vm500_vm2, %v2054_v63  ;;  %v2658_v60 = vsel %vm2551_vm5, %v2648_v45, %v2657_v49  ;;  %v2678_v63 = vshrl.u32 %v6962_v52, 16  ;;  %v2714_v45 = vshrl.u32 %v6970_v30, 16  ;;  %v6986_v30 = vld [vmem:[#allocation2 + $0x48] sm:$0xff]  }
  0x9b   : > { %v2666_v4 = vor.u32 %v2665_v56, %v2662_v35  ;;  %v2719_v52 = vrot.slane %v2717_v54, 2  ;;  %v6973_v56 = vld [vmem:[#allocation2 + $0x10] sm:$0xfc]  }
  0x9c   : > { %v2680_v8 = vrot.slane %v2678_v63, 1  ;;  %v2716_v51 = vrot.slane %v2714_v45, 1  ;;  %v3708_v62 = vrot.slane %v6973_v56, 2  ;;  %v3709_v63 = vrot.slane %v6974_v57, 2 }
  0x9d   : > { %v2667_v14 = vsel %vm2551_vm5, %v2657_v49, %v2666_v4  ;;  %v3198_v49 = vrot.slane %v6969_v43, 2 }
  0x9e   : > { %v2684_v22 = vor.u32 %v2683_v9, %v2680_v8  ;;  %v3710_v5 = vsel %vm3196_vm6, %v3708_v62, %v3709_v63  ;;  %v4445_v8 = vsel %vm555_vm0, %v7511_v42, 0  ;;  %v6980_v42 = vld [vmem:[#allocation2 + $0x30] sm:$0xff]  }
  0xa0   : > { %v2685_v31 = vsel %vm2551_vm5, %v2675_v6, %v2684_v22  ;;  %v2694_v37 = vsel %vm2551_vm5, %v2684_v22, %v2693_v25  ;;  %v6981_v22 = vld [vmem:[#allocation2 + $0x40] sm:$0xff]  }
  0xa1   : > { %6656 = vmatmul.mubr.msk.bf16.gmra.mxu0 %vm500_vm2, %v2613_v13  ;;  %6622 = vmatmul.mubr.msk.bf16.gmra.mxu1 %vm500_vm2, %v2056_v18  ;;  %v364_v13 = vld [vmem:[%s7441_s14 + $0xc] sm:$0xf]  ;;  %v2676_v18 = vsel %vm2551_vm5, %v2666_v4, %v2675_v6 }
  0xa2   : > { %6659 = vmatprep.mubr.msk.bf16.mxu0 %vm500_vm2, %v2622_v19  ;;  %6625 = vmatprep.mubr.msk.bf16.mxu1 %vm500_vm2, %v2058_v20  ;;  %370 = vst.msk [vmem:[#allocation2 + $0x9c] sm:$0xf] %vm324_vm1, %v364_v13  ;;  %v2070_v19 = vsel %vm1528_vm4, %v2067_v2, %v2069_v7  ;;  %v6963_v20 = vld [vmem:[#allocation2 + $0x90] sm:$0xff]   ;;  %v6976_v2 = vld [vmem:[#allocation2 + $0x20] sm:$0xff]   ;;  %v6975_v6 = vld [vmem:[#allocation2 + $0x28] sm:$0xff]  }
  0xa3   : > { %v2073_v28 = vrot.slane %v6963_v20, 1  ;;  %v6977_v7 = vld [vmem:[#allocation2 + $0x30] sm:$0xff]   ;;  %v3711_v11 = vrot.slane %v6976_v2, 2  ;;  %v3204_v12 = vrot.slane %v6975_v6, 2  ;;  %v6992_v2 = vld [vmem:[#allocation2 + $0x60] sm:$0xff]  }
  0xa4   : > { %v3206_v13 = vrot.slane %v6977_v7, 2  ;;  %v6991_v7 = vld [vmem:[#allocation2 + $0x68] sm:$0xff]  }
  0xa5   : > { %v3712_v15 = vsel %vm3196_vm6, %v3709_v63, %v3711_v11  ;;  %v3220_v16 = vrot.slane %v6991_v7, 2  ;;  %v7009_v7 = vld [vmem:[#allocation2 + $0x20] sm:$0xff]  }
  0xa6   : > { %v3207_v20 = vsel %vm3196_vm6, %v3204_v12, %v3206_v13 }
  0xa9   : > { %6660 = vmatmul.mubr.msk.bf16.gmra.mxu0 %vm500_vm2, %v2631_v33  ;;  %6626 = vmatmul.mubr.msk.bf16.gmra.mxu1 %vm500_vm2, %v2060_v39  ;;  %v2698_v33 = vrot.slane %v2696_v23, 1  ;;  %v2710_v39 = vrot.slane %v2708_v27, 2  ;;  %v3715_v23 = vrot.slane %v6980_v42, 2  ;;  %v6984_v27 = vld [vmem:[#allocation2 + $0x40] sm:$0xff]  }
  0xaa   : > { %6663 = vmatprep.mubr.msk.bf16.mxu0 %vm500_vm2, %v2640_v40  ;;  %6629 = vmatprep.mubr.msk.bf16.mxu1 %vm500_vm2, %v2062_v41  ;;  %v6968_v40 = vld [vmem:[#allocation2 + $0x8] sm:$0xfc]   ;;  %v2074_v41 = vsel %vm1528_vm4, %v2071_v36, %v2073_v28 }
  0xab   : > { %v2702_v44 = vor.u32 %v2701_v34, %v2698_v33  ;;  %v2711_v47 = vor.u32 %v2710_v39, %v2707_v38  ;;  %v3197_v48 = vrot.slane %v6968_v40, 2  ;;  %v6985_v33 = vld [vmem:[#allocation2 + $0x50] sm:$0xff]   ;;  %v3212_v39 = vrot.slane %v6983_v26, 2 }
  0xac   : > { %v3721_v40 = vrot.slane %v6986_v30, 2  ;;  %v3214_v43 = vrot.slane %v6985_v33, 2 }
  0xad   : > { %v2703_v50 = vsel %vm2551_vm5, %v2693_v25, %v2702_v44  ;;  %v2712_v35 = vsel %vm2551_vm5, %v2702_v44, %v2711_v47  ;;  %v3199_v58 = vsel %vm3196_vm6, %v3197_v48, %v3198_v49  ;;  %v3210_v25 = vrot.slane %v6981_v22, 2  ;;  %v6996_v22 = vld [vmem:[#allocation2 + $0x70] sm:$0xff]  }
  0xb1   : > { %6664 = vmatmul.mubr.msk.bf16.gmra.mxu0 %vm500_vm2, %v2649_v55  ;;  %6630 = vmatmul.mubr.msk.bf16.gmra.mxu1 %vm500_vm2, %v2064_v59  ;;  %v2076_v55 = vsel %vm1528_vm4, %v2073_v28, %v2075_v46  ;;  %v6972_v59 = vld [vmem:[#allocation2 + $0x20] sm:$0xff]   ;;  %v3209_v28 = vsel %vm3196_vm6, %v3206_v13, %v3208_v24  ;;  %v6987_v46 = vld [vmem:[#allocation2 + $0x58] sm:$0xff]  }
  0xb2   : > { %6667 = vmatprep.mubr.msk.bf16.mxu0 %vm500_vm2, %v2658_v60  ;;  %6633 = vmatprep.mubr.msk.bf16.mxu1 %vm500_vm2, %v2066_v61  ;;  %v2720_v60 = vor.u32 %v2719_v52, %v2716_v51  ;;  %v3200_v61 = vrot.slane %v6971_v53, 2  ;;  %v3202_v0 = vrot.slane %v6972_v59, 2  ;;  %v6990_v51 = vld [vmem:[#allocation2 + $0x58] sm:$0xff]   ;;  %v3215_v53 = vsel %vm3196_vm6, %v3212_v39, %v3214_v43 }
  0xb3   : > { %v3216_v59 = vrot.slane %v6987_v46, 2  ;;  %v6999_v46 = vld [vmem:[#allocation2 + $0x88] sm:$0xff]  }
  0xb4   : > { %v2721_v1 = vsel %vm2551_vm5, %v2711_v47, %v2720_v60  ;;  %v3201_v4 = vsel %vm3196_vm6, %v3198_v49, %v3200_v61  ;;  %v3203_v9 = vsel %vm3196_vm6, %v3200_v61, %v3202_v0  ;;  %v6988_v47 = vld [vmem:[#allocation2 + $0x50] sm:$0xff]   ;;  %v3213_v49 = vsel %vm3196_vm6, %v3210_v25, %v3212_v39 }
  0xb5   : > { %v3723_v57 = vrot.slane %v6988_v47, 2  ;;  %v3725_v60 = vrot.slane %v6990_v51, 2  ;;  %v7679_v47 = vld [vmem:[#allocation2 + $0x90] sm:$0xff]  }
  0xb6   : > { %v7006_v51 = vld [vmem:[#allocation2 + $0x10] sm:$0xfc]  }
  0xb7   : > { %v3726_v6 = vsel %vm3196_vm6, %v3723_v57, %v3725_v60 }
  0xb9   : > { %6668 = vmatmul.mubr.msk.bf16.gmra.mxu0 %vm500_vm2, %v2667_v14  ;;  %6634 = vmatmul.mubr.msk.bf16.gmra.mxu1 %vm500_vm2, %v2068_v17  ;;  %v3713_v14 = vrot.slane %v6978_v10, 2  ;;  %v3205_v17 = vsel %vm3196_vm6, %v3202_v0, %v3204_v12 }
  0xba   : > { %6671 = vmatprep.mubr.msk.bf16.mxu0 %vm500_vm2, %v2676_v18  ;;  %6637 = vmatprep.mubr.msk.bf16.mxu1 %vm500_vm2, %v2070_v19  ;;  %v4957_v18 = vsel %vm555_vm0, %v7529_v3, 0  ;;  %v6982_v19 = vld [vmem:[#allocation2 + $0x38] sm:$0xff]  }
  0xbb   : > { %v3714_v21 = vsel %vm3196_vm6, %v3711_v11, %v3713_v14  ;;  %v3717_v36 = vrot.slane %v6982_v19, 2  ;;  %v3716_v3 = vsel %vm3196_vm6, %v3713_v14, %v3715_v23  ;;  %v6993_v11 = vld [vmem:[#allocation2 + $0x70] sm:$0xff]   ;;  %v3727_v14 = vrot.slane %v6992_v2, 2 }
  0xbd   : > { %v3718_v29 = vsel %vm3196_vm6, %v3715_v23, %v3717_v36 }
  0xc1   : > { %6672 = vmatmul.mubr.msk.bf16.gmra.mxu0 %vm500_vm2, %v2685_v31  ;;  %6638 = vmatmul.mubr.msk.bf16.gmra.mxu1 %vm500_vm2, %v2072_v32  ;;  %v3211_v31 = vsel %vm3196_vm6, %v3208_v24, %v3210_v25  ;;  %v6995_v25 = vld [vmem:[#allocation2 + $0x78] sm:$0xff]  }
  0xc2   : > { %6675 = vmatprep.mubr.msk.bf16.mxu0 %vm500_vm2, %v2694_v37  ;;  %6641 = vmatprep.mubr.msk.bf16.mxu1 %vm500_vm2, %v2074_v41  ;;  %v3719_v37 = vrot.slane %v6984_v27, 2 }
  0xc4   : > { %v3720_v54 = vsel %vm3196_vm6, %v3717_v36, %v3719_v37 }
  0xc9   : > { %6676 = vmatmul.mubr.msk.bf16.gmra.mxu0 %vm500_vm2, %v2703_v50  ;;  %6642 = vmatmul.mubr.msk.bf16.gmra.mxu1 %vm500_vm2, %v2076_v55  ;;  %v3722_v50 = vsel %vm3196_vm6, %v3719_v37, %v3721_v40  ;;  %v6989_v55 = vld [vmem:[#allocation2 + $0x60] sm:$0xff]  }
  0xca   : > { %6679 = vmatprep.mubr.msk.bf16.mxu0 %vm500_vm2, %v2712_v35  ;;  %6685 = vmatprep.mubr.msk.bf16.mxu1 %vm500_vm2, %v3199_v58  ;;  %v3218_v62 = vrot.slane %v6989_v55, 2 }
  0xcc   : > { %v3219_v10 = vsel %vm3196_vm6, %v3216_v59, %v3218_v62  ;;  %v3221_v24 = vsel %vm3196_vm6, %v3218_v62, %v3220_v16 }
  0xd1   : > { %6680 = vmatmul.mubr.msk.bf16.gmra.mxu0 %vm500_vm2, %v2721_v1  ;;  %6686 = vmatmul.mubr.msk.bf16.vlgmr.msra.gmra.mxu1 %vm500_vm2, %v3201_v4  ;;  %v3724_v1 = vsel %vm3196_vm6, %v3721_v40, %v3723_v57 }
  0xd2   : > { %6723 = vmatprep.mubr.msk.bf16.mxu0 %vm500_vm2, %v3710_v5  ;;  %6760 = vmatpush3.bf16.msra.mxu1 %v4445_v8  ;;  %v3217_v5 = vsel %vm3196_vm6, %v3214_v43, %v3216_v59  ;;  %v6994_v8 = vld [vmem:[#allocation2 + $0x68] sm:$0xff]   ;;  %v7000_v43 = vld [vmem:[#allocation2 + $0x80] sm:$0xff]   ;;  %v3228_v59 = vrot.slane %v6999_v46, 2 }
  0xd3   : > { %6689 = vmatprep.mubr.msk.bf16.mxu1 %vm500_vm2, %v3203_v9  ;;  %v3729_v42 = vrot.slane %v6994_v8, 2 }
  0xd5   : > { %v3730_v36 = vsel %vm3196_vm6, %v3727_v14, %v3729_v42 }
  0xd9   : > { %6724 = vmatmul.mubr.msk.bf16.vlgmr.msra.gmra.mxu0 %vm500_vm2, %v3712_v15  ;;  %6690 = vmatmul.mubr.msk.bf16.gmra.mxu1 %vm500_vm2, %v3205_v17 }
  0xda   : > { %6798 = vmatpush3.bf16.msra.mxu0 %v4957_v18  ;;  %6693 = vmatprep.mubr.msk.bf16.mxu1 %vm500_vm2, %v3207_v20  ;;  %v3222_v18 = vrot.slane %v6993_v11, 2  ;;  %v7697_v11 = vld [vmem:[#allocation2 + $0x90] sm:$0xff]  }
  0xdb   : > { %6727 = vmatprep.mubr.msk.bf16.mxu0 %vm500_vm2, %v3714_v21  ;;  %v3728_v21 = vsel %vm3196_vm6, %v3725_v60, %v3727_v14  ;;  %v3230_v60 = vrot.slane %v7679_v47, 2 }
  0xdc   : > { %v3223_v27 = vsel %vm3196_vm6, %v3220_v16, %v3222_v18 }
  0xe1   : > { %v6497_v34 = vpop.f32.mrf.mxu0  ;;  %6728 = vmatmul.mubr.msk.bf16.gmra.mxu0 %vm500_vm2, %v3716_v3  ;;  %v6517_v32 = vpop.f32.mrf.mxu1  ;;  %6694 = vmatmul.mubr.msk.bf16.gmra.mxu1 %vm500_vm2, %v3209_v28  ;;  %v7657_v3 = vld [vmem:[#allocation2 + $0x78] sm:$0xff]   ;;  %v7661_v28 = vld [vmem:[#allocation2 + $0x80] sm:$0xff]  }
  0xe2   : > { %739 = vst.msk [vmem:[#allocation3 + $0x10] sm:$0xff] %vm736_vm7, %v6497_v34  ;;  %6731 = vmatprep.mubr.msk.bf16.mxu0 %vm500_vm2, %v3718_v29  ;;  %759 = vst.msk [vmem:[#allocation3 + $0xb0] sm:$0xff] %vm736_vm7, %v6517_v32  ;;  %6697 = vmatprep.mubr.msk.bf16.mxu1 %vm500_vm2, %v3211_v31  ;;  %v3731_v31 = vrot.slane %v6996_v22, 2  ;;  %v3224_v34 = vrot.slane %v6995_v25, 2  ;;  %v3733_v32 = vrot.slane %v7657_v3, 2  ;;  %v4238_v3 = vshrl.u32 %v7009_v7, 16 }
  0xe3   : > { %v593_v38 = vpop.f32.mrf.mxu0  ;;  %v673_v41 = vpop.f32.mrf.mxu1 }
  0xe4   : > { %737 = vst.msk [vmem:[#allocation3] sm:$0xff] %vm736_vm7, %v593_v38  ;;  %757 = vst.msk [vmem:[#allocation3 + $0xa0] sm:$0xff] %vm736_vm7, %v673_v41  ;;  %v3226_v38 = vrot.slane %v7661_v28, 2  ;;  %v3732_v41 = vsel %vm3196_vm6, %v3729_v42, %v3731_v31  ;;  %v7003_v42 = vld [vmem:[#allocation2 + $0x98] ss:$0 sps:$4 sm:$0x33]  }
  0xe5   : > { %v6498_v44 = vpop.f32.mrf.mxu0  ;;  %v6518_v45 = vpop.f32.mrf.mxu1  ;;  %v3739_v28 = vrot.slane %v7697_v11, 2  ;;  %v4240_v46 = vrot.slane %v4238_v3, 2 }
  0xe6   : > { %740 = vst.msk [vmem:[#allocation3 + $0x18] sm:$0xff] %vm736_vm7, %v6498_v44  ;;  %760 = vst.msk [vmem:[#allocation3 + $0xb8] sm:$0xff] %vm736_vm7, %v6518_v45  ;;  %v3225_v45 = vsel %vm3196_vm6, %v3222_v18, %v3224_v34  ;;  %v3229_v14 = vsel %vm3196_vm6, %v3226_v38, %v3228_v59 }
  0xe7   : > { %v596_v48 = vpop.f32.mrf.mxu0  ;;  %v676_v52 = vpop.f32.mrf.mxu1 }
  0xe8   : > { %738 = vst.msk [vmem:[#allocation3 + $0x8] sm:$0xff] %vm736_vm7, %v596_v48  ;;  %758 = vst.msk [vmem:[#allocation3 + $0xa8] sm:$0xff] %vm736_vm7, %v676_v52  ;;  %v7681_v48 = vld [vmem:[#allocation2 + $0x88] sm:$0xff]   ;;  %v7007_v52 = vld [vmem:[#allocation2 + $0x18] sm:$0xff]  }
  0xe9   : > { %v6501_v35 = vpop.f32.mrf.mxu0  ;;  %6732 = vmatmul.mubr.msk.bf16.gmra.mxu0 %vm500_vm2, %v3720_v54  ;;  %v6521_v56 = vpop.f32.mrf.mxu1  ;;  %6698 = vmatmul.mubr.msk.bf16.gmra.mxu1 %vm500_vm2, %v3213_v49  ;;  %v3734_v54 = vsel %vm3196_vm6, %v3731_v31, %v3733_v32  ;;  %v4229_v2 = vshrl.u32 %v7007_v52, 16 }
  0xea   : > { %743 = vst.msk [vmem:[#allocation3 + $0x30] sm:$0xff] %vm736_vm7, %v6501_v35  ;;  %6735 = vmatprep.mubr.msk.bf16.mxu0 %vm500_vm2, %v3722_v50  ;;  %763 = vst.msk [vmem:[#allocation3 + $0xd0] sm:$0xff] %vm736_vm7, %v6521_v56  ;;  %6701 = vmatprep.mubr.msk.bf16.mxu1 %vm500_vm2, %v3215_v53  ;;  %v3227_v50 = vsel %vm3196_vm6, %v3224_v34, %v3226_v38  ;;  %v1290_v35 = vld [vmem:[#allocation3 + $0x10] sm:$0xff]  ;;  %v3735_v56 = vrot.slane %v7000_v43, 2 }
  0xeb   : > { %v609_v58 = vpop.f32.mrf.mxu0  ;;  %v689_v61 = vpop.f32.mrf.mxu1  ;;  %v4231_v22 = vrot.slane %v4229_v2, 2 }
  0xec   : > { %741 = vst.msk [vmem:[#allocation3 + $0x20] sm:$0xff] %vm736_vm7, %v609_v58  ;;  %761 = vst.msk [vmem:[#allocation3 + $0xc0] sm:$0xff] %vm736_vm7, %v689_v61  ;;  %v3737_v61 = vrot.slane %v7681_v48, 2  ;;  %v7013_v48 = vld [vmem:[#allocation2 + $0x30] sm:$0xff]  }
  0xed   : > { %v6502_v63 = vpop.f32.mrf.mxu0  ;;  %v6522_v0 = vpop.f32.mrf.mxu1 }
  0xee   : > { %744 = vst.msk [vmem:[#allocation3 + $0x38] sm:$0xff] %vm736_vm7, %v6502_v63  ;;  %764 = vst.msk [vmem:[#allocation3 + $0xd8] sm:$0xff] %vm736_vm7, %v6522_v0  ;;  %v1288_v63 = vld [vmem:[#allocation3] sm:$0xff]  ;;  %v4221_v0 = vshrl.u32 %v7006_v51, 16  ;;  %v3738_v16 = vsel %vm3196_vm6, %v3735_v56, %v3737_v61 }
  0xef   : > { %v612_v4 = vpop.f32.mrf.mxu0  ;;  %v692_v9 = vpop.f32.mrf.mxu1 }
  0xf0   : > { %742 = vst.msk [vmem:[#allocation3 + $0x28] sm:$0xff] %vm736_vm7, %v612_v4  ;;  %762 = vst.msk [vmem:[#allocation3 + $0xc8] sm:$0xff] %vm736_vm7, %v692_v9  ;;  %v4232_v4 = vshll.u32 %v7007_v52, 16  ;;  %v1291_v9 = vld [vmem:[#allocation3 + $0x18] sm:$0xff] }
  0xf1   : > { %v6505_v12 = vpop.f32.mrf.mxu0  ;;  %6736 = vmatmul.mubr.msk.bf16.gmra.mxu0 %vm500_vm2, %v3724_v1  ;;  %v6525_v13 = vpop.f32.mrf.mxu1  ;;  %6702 = vmatmul.mubr.msk.bf16.gmra.mxu1 %vm500_vm2, %v3217_v5  ;;  %v4224_v1 = vshll.u32 %v7006_v51, 16 }
  0xf2   : > { %747 = vst.msk [vmem:[#allocation3 + $0x50] sm:$0xff] %vm736_vm7, %v6505_v12  ;;  %6739 = vmatprep.mubr.msk.bf16.mxu0 %vm500_vm2, %v3726_v6  ;;  %767 = vst.msk [vmem:[#allocation3 + $0xf0] sm:$0xff] %vm736_vm7, %v6525_v13  ;;  %6705 = vmatprep.mubr.msk.bf16.mxu1 %vm500_vm2, %v3219_v10  ;;  %v3736_v10 = vsel %vm3196_vm6, %v3733_v32, %v3735_v56 }
  0xf3   : > { %v625_v15 = vpop.f32.mrf.mxu0  ;;  %v705_v17 = vpop.f32.mrf.mxu1  ;;  %v1292_v38 = vld [vmem:[#allocation3 + $0x20] sm:$0xff] }
  0xf4   : > { %745 = vst.msk [vmem:[#allocation3 + $0x40] sm:$0xff] %vm736_vm7, %v625_v15  ;;  %765 = vst.msk [vmem:[#allocation3 + $0xe0] sm:$0xff] %vm736_vm7, %v705_v17  ;;  %v3231_v15 = vsel %vm3196_vm6, %v3228_v59, %v3230_v60  ;;  %v7707_v17 = vld [vmem:[#allocation2 + $0x98] sm:$0xff]  }
  0xf5   : > { %v6506_v19 = vpop.f32.mrf.mxu0  ;;  %v6526_v20 = vpop.f32.mrf.mxu1  ;;  %v3741_v34 = vrot.slane %v7707_v17, 2  ;;  %v7764_v17 = vld [vmem:[#allocation2 + $0x28] sm:$0xff]  }
  0xf6   : > { %748 = vst.msk [vmem:[#allocation3 + $0x58] sm:$0xff] %vm736_vm7, %v6506_v19  ;;  %768 = vst.msk [vmem:[#allocation3 + $0xf8] sm:$0xff] %vm736_vm7, %v6526_v20  ;;  %v1289_v19 = vld [vmem:[#allocation3 + $0x8] sm:$0xff]  ;;  %v4223_v20 = vrot.slane %v4221_v0, 2 }
  0xf7   : > { %v628_v23 = vpop.f32.mrf.mxu0  ;;  %v708_v26 = vpop.f32.mrf.mxu1 }
  0xf8   : > { %746 = vst.msk [vmem:[#allocation3 + $0x48] sm:$0xff] %vm736_vm7, %v628_v23  ;;  %766 = vst.msk [vmem:[#allocation3 + $0xe8] sm:$0xff] %vm736_vm7, %v708_v26  ;;  %v4234_v23 = vrot.slane %v4232_v4, 3 }
  0xf9   : > { %v6509_v29 = vpop.f32.mrf.mxu0  ;;  %6740 = vmatmul.mubr.msk.bf16.gmra.mxu0 %vm500_vm2, %v3728_v21  ;;  %v6529_v30 = vpop.f32.mrf.mxu1  ;;  %6706 = vmatmul.mubr.msk.bf16.gmra.mxu1 %vm500_vm2, %v3221_v24  ;;  %v4226_v21 = vrot.slane %v4224_v1, 3  ;;  %v7010_v24 = vld [vmem:[#allocation2 + $0x28] sm:$0xff]   ;;  %v1293_v1 = vld [vmem:[#allocation3 + $0x28] sm:$0xff] }
  0xfa   : > { %751 = vst.msk [vmem:[#allocation3 + $0x70] sm:$0xff] %vm736_vm7, %v6509_v29  ;;  %6743 = vmatprep.mubr.msk.bf16.mxu0 %vm500_vm2, %v3730_v36  ;;  %771 = vst.msk [vmem:[#allocation3 + $0x110] sm:$0xff] %vm736_vm7, %v6529_v30  ;;  %6709 = vmatprep.mubr.msk.bf16.mxu1 %vm500_vm2, %v3223_v27  ;;  %v1294_v27 = vld [vmem:[#allocation3 + $0x30] sm:$0xff]  ;;  %v4241_v29 = vshll.u32 %v7009_v7, 16  ;;  %v4250_v43 = vshll.u32 %v7010_v24, 16 }
  0xfb   : > { %v641_v33 = vpop.f32.mrf.mxu0  ;;  %v721_v37 = vpop.f32.mrf.mxu1 }
  0xfc   : > { %749 = vst.msk [vmem:[#allocation3 + $0x60] sm:$0xff] %vm736_vm7, %v641_v33  ;;  %769 = vst.msk [vmem:[#allocation3 + $0x100] sm:$0xff] %vm736_vm7, %v721_v37  ;;  %v3232_v33 = vrot.slane %v7003_v42, 2  ;;  %v4243_v56 = vrot.slane %v4241_v29, 3 }
  0xfd   : > { %v6510_v39 = vpop.f32.mrf.mxu0  ;;  %v6530_v40 = vpop.f32.mrf.mxu1 }
  0xfe   : > { %752 = vst.msk [vmem:[#allocation3 + $0x78] sm:$0xff] %vm736_vm7, %v6510_v39  ;;  %772 = vst.msk [vmem:[#allocation3 + $0x118] sm:$0xff] %vm736_vm7, %v6530_v40  ;;  %v4227_v39 = vor.u32 %v4226_v21, %v4223_v20  ;;  %v7718_v40 = vor.u32 %v4234_v23, %v4231_v22  ;;  %v1296_v22 = vld [vmem:[#allocation3 + $0x40] sm:$0xff] }
  0xff   : > { %v644_v44 = vpop.f32.mrf.mxu0  ;;  %v724_v49 = vpop.f32.mrf.mxu1 }
 0x100   : > { %750 = vst.msk [vmem:[#allocation3 + $0x68] sm:$0xff] %vm736_vm7, %v644_v44  ;;  %770 = vst.msk [vmem:[#allocation3 + $0x108] sm:$0xff] %vm736_vm7, %v724_v49  ;;  %v7721_v49 = vld [vmem:[#allocation2 + $0x10] sm:$0xf8]   ;;  %v4236_v2 = vsel %vm4219_vm8, %v4227_v39, %v7718_v40 }
 0x101   : > { %v6513_v53 = vpop.f32.mrf.mxu0  ;;  %6744 = vmatmul.mubr.msk.bf16.gmra.mxu0 %vm500_vm2, %v3732_v41  ;;  %v6535_v55 = vpop.f32.mrf.mxu1  ;;  %6710 = vmatmul.mubr.msk.bf16.gmra.mxu1 %vm500_vm2, %v3225_v45  ;;  %v4247_v41 = vshrl.u32 %v7010_v24, 16 }
 0x102   : > { %755 = vst.msk [vmem:[#allocation3 + $0x90] sm:$0xff] %vm736_vm7, %v6513_v53  ;;  %6747 = vmatprep.mubr.msk.bf16.mxu0 %vm500_vm2, %v3734_v54  ;;  %v1326_v57 = vadd.f32 %v6535_v55, %v1290_v35  ;;  %6713 = vmatprep.mubr.msk.bf16.mxu1 %vm500_vm2, %v3227_v50  ;;  %v7723_v50 = vld [vmem:[#allocation2 + $0x18] sm:$0xff]   ;;  %v1295_v53 = vld [vmem:[#allocation3 + $0x38] sm:$0xff]  ;;  %v3740_v55 = vsel %vm3196_vm6, %v3737_v61, %v3739_v28 }
 0x103   : > { %v657_v58 = vpop.f32.mrf.mxu0  ;;  %v1145_v62 = vpop.f32.mrf.mxu1  ;;  %v7008_v35 = vld [vmem:[#allocation2 + $0xa0] ss:$0 sps:$4 sm:$0x33]   ;;  %v4249_v4 = vrot.slane %v4247_v41, 2 }
 0x104   : > { %753 = vst.msk [vmem:[#allocation3 + $0x80] sm:$0xff] %vm736_vm7, %v657_v58  ;;  %1362 = vst.msk [vmem:[#allocation3 + $0x10] sm:$0xff] %vm736_vm7, %v1326_v57  ;;  %v1324_v5 = vadd.f32 %v1288_v63, %v1145_v62  ;;  %v3233_v62 = vsel %vm3196_vm6, %v3230_v60, %v3232_v33  ;;  %v3742_v63 = vsel %vm3196_vm6, %v3739_v28, %v3741_v34  ;;  %v3743_v11 = vrot.slane %v7008_v35, 2 }
 0x105   : > { %v6514_v6 = vpop.f32.mrf.mxu0  ;;  %v6536_v8 = vpop.f32.mrf.mxu1 }
 0x106   : > { %756 = vst.msk [vmem:[#allocation3 + $0x98] sm:$0xff] %vm736_vm7, %v6514_v6  ;;  %1360 = vst.msk [vmem:[#allocation3] sm:$0xff] %vm736_vm7, %v1324_v5  ;;  %v1327_v12 = vadd.f32 %v6536_v8, %v1291_v9  ;;  %v4252_v5 = vrot.slane %v4250_v43, 3  ;;  %v7015_v6 = vld [vmem:[#allocation2 + $0x38] sm:$0xff]  }
 0x107   : > { %v660_v13 = vpop.f32.mrf.mxu0  ;;  %v1148_v18 = vpop.f32.mrf.mxu1  ;;  %v4265_v24 = vshrl.u32 %v7015_v6, 16 }
 0x108   : > { %754 = vst.msk [vmem:[#allocation3 + $0x88] sm:$0xff] %vm736_vm7, %v660_v13  ;;  %1363 = vst.msk [vmem:[#allocation3 + $0x18] sm:$0xff] %vm736_vm7, %v1327_v12  ;;  %v1325_v36 = vadd.f32 %v1289_v19, %v1148_v18  ;;  %v4244_v12 = vor.u32 %v4243_v56, %v4240_v46  ;;  %v4865_v13 = vrot.slane %v7721_v49, 3  ;;  %v4256_v18 = vshrl.u32 %v7013_v48, 16 }
 0x109   : > { %v6573_v25 = vpop.f32.mrf.mxu0  ;;  %6748 = vmatmul.mubr.msk.bf16.gmra.mxu0 %vm500_vm2, %v3736_v10  ;;  %v6539_v26 = vpop.f32.mrf.mxu1  ;;  %6714 = vmatmul.mubr.msk.bf16.gmra.mxu1 %vm500_vm2, %v3229_v14  ;;  %v1298_v10 = vld [vmem:[#allocation3 + $0x50] sm:$0xff]  ;;  %v4866_v14 = vrot.slane %v7723_v50, 3  ;;  %v4259_v19 = vshll.u32 %v7013_v48, 16  ;;  %v7748_v23 = vor.u32 %v4252_v5, %v4249_v4  ;;  %v4267_v46 = vrot.slane %v4265_v24, 2  ;;  %v1300_v5 = vld [vmem:[#allocation3 + $0x60] sm:$0xff]  ;;  %v7021_v24 = vld [vmem:[#allocation2 + $0x50] sm:$0xff]  }
 0x10a   : > { %6751 = vmatprep.mubr.msk.bf16.mxu0 %vm500_vm2, %v3738_v16  ;;  %1361 = vst.msk [vmem:[#allocation3 + $0x8] sm:$0xff] %vm736_vm7, %v1325_v36  ;;  %v1330_v30 = vadd.f32 %v6539_v26, %v1294_v27  ;;  %6717 = vmatprep.mubr.msk.bf16.mxu1 %vm500_vm2, %v3231_v15  ;;  %v4268_v36 = vshll.u32 %v7015_v6, 16  ;;  %v7752_v27 = vld [vmem:[#allocation2 + $0x20] sm:$0xff]   ;;  %v4245_v33 = vsel %vm4219_vm8, %v7718_v40, %v4244_v12  ;;  %v4258_v43 = vrot.slane %v4256_v18, 2  ;;  %v7787_v18 = vld [vmem:[#allocation2 + $0x38] sm:$0xff]  }
 0x10b   : > { %v1657_v31 = vpop.f32.mrf.mxu0  ;;  %v1802_v32 = vld [vmem:[#allocation3 + $0x10] sm:$0xff]  ;;  %v1161_v37 = vpop.f32.mrf.mxu1  ;;  %v4254_v40 = vsel %vm4219_vm8, %v4244_v12, %v7748_v23 }
 0x10c   : > { %1366 = vst.msk [vmem:[#allocation3 + $0x30] sm:$0xff] %vm736_vm7, %v1330_v30  ;;  %v1838_v44 = vadd.f32 %v6573_v25, %v1802_v32  ;;  %v1328_v45 = vadd.f32 %v1292_v38, %v1161_v37  ;;  %v1299_v30 = vld [vmem:[#allocation3 + $0x58] sm:$0xff]  ;;  %v4867_v32 = vsel %vm4864_vm9, %v4865_v13, %v4866_v14  ;;  %v4270_v49 = vrot.slane %v4268_v36, 3 }
 0x10d   : > { %v6574_v54 = vpop.f32.mrf.mxu0  ;;  %v1800_v51 = vld [vmem:[#allocation3] sm:$0xff]  ;;  %v6540_v52 = vpop.f32.mrf.mxu1  ;;  %v7017_v37 = vld [vmem:[#allocation2 + $0x40] sm:$0xff]  }
 0x10e   : > { %1874 = vst.msk [vmem:[#allocation3 + $0x10] sm:$0xff] %vm736_vm7, %v1838_v44  ;;  %1364 = vst.msk [vmem:[#allocation3 + $0x20] sm:$0xff] %vm736_vm7, %v1328_v45  ;;  %v1836_v57 = vadd.f32 %v1800_v51, %v1657_v31  ;;  %v1331_v58 = vadd.f32 %v6540_v52, %v1295_v53  ;;  %v3744_v31 = vsel %vm3196_vm6, %v3741_v34, %v3743_v11  ;;  %v4261_v44 = vrot.slane %v4259_v19, 3  ;;  %v7019_v51 = vld [vmem:[#allocation2 + $0x48] sm:$0xff]   ;;  %v1303_v13 = vld [vmem:[#allocation3 + $0x78] sm:$0xff] }
 0x10f   : > { %v1660_v59 = vpop.f32.mrf.mxu0  ;;  %v1803_v0 = vld [vmem:[#allocation3 + $0x18] sm:$0xff]  ;;  %v1164_v61 = vpop.f32.mrf.mxu1  ;;  %v7778_v6 = vor.u32 %v4270_v49, %v4267_v46  ;;  %v1304_v46 = vld [vmem:[#allocation3 + $0x80] sm:$0xff] }
 0x110   : > { %1872 = vst.msk [vmem:[#allocation3] sm:$0xff] %vm736_vm7, %v1836_v57  ;;  %1367 = vst.msk [vmem:[#allocation3 + $0x38] sm:$0xff] %vm736_vm7, %v1331_v58  ;;  %v1839_v47 = vadd.f32 %v6574_v54, %v1803_v0  ;;  %v1329_v60 = vadd.f32 %v1293_v1, %v1164_v61  ;;  %v1297_v54 = vld [vmem:[#allocation3 + $0x48] sm:$0xff]  ;;  %v1302_v57 = vld [vmem:[#allocation3 + $0x70] sm:$0xff]  ;;  %v4868_v58 = vrot.slane %v7752_v27, 3  ;;  %v4262_v61 = vor.u32 %v4261_v44, %v4258_v43 }
 0x111   : > { %v6577_v7 = vpop.f32.mrf.mxu0  ;;  %6752 = vmatmul.mubr.msk.bf16.gmra.mxu0 %vm500_vm2, %v3740_v55  ;;  %v1801_v8 = vld [vmem:[#allocation3 + $0x8] sm:$0xff]  ;;  %v6543_v9 = vpop.f32.mrf.mxu1  ;;  %6718 = vmatmul.mubr.msk.bf16.gmra.mxu1 %vm500_vm2, %v3233_v62  ;;  %v4277_v62 = vshll.u32 %v7017_v37, 16  ;;  %v4870_v1 = vrot.slane %v7764_v17, 3 }
 0x112   : > { %6755 = vmatprep.mubr.msk.bf16.mxu0 %vm500_vm2, %v3742_v63  ;;  %1875 = vst.msk [vmem:[#allocation3 + $0x18] sm:$0xff] %vm736_vm7, %v1839_v47  ;;  %1365 = vst.msk [vmem:[#allocation3 + $0x28] sm:$0xff] %vm736_vm7, %v1329_v60  ;;  %v1837_v15 = vadd.f32 %v1801_v8, %v1660_v59  ;;  %v1334_v16 = vadd.f32 %v6543_v9, %v1298_v10  ;;  %6761 = vmatprep.mubr.msk.bf16.mxu1 %vm500_vm2, %v4236_v2  ;;  %v4274_v59 = vshrl.u32 %v7017_v37, 16  ;;  %v7782_v10 = vld [vmem:[#allocation2 + $0x30] sm:$0xff]  }
 0x113   : > { %v1673_v42 = vpop.f32.mrf.mxu0  ;;  %v1806_v20 = vld [vmem:[#allocation3 + $0x30] sm:$0xff]  ;;  %v1177_v21 = vpop.f32.mrf.mxu1  ;;  %v4283_v47 = vshrl.u32 %v7019_v51, 16  ;;  %v4286_v60 = vshll.u32 %v7019_v51, 16  ;;  %v4871_v50 = vsel %vm4864_vm9, %v4868_v58, %v4870_v1 }
 0x114   : > { %1873 = vst.msk [vmem:[#allocation3 + $0x8] sm:$0xff] %vm736_vm7, %v1837_v15  ;;  %1370 = vst.msk [vmem:[#allocation3 + $0x50] sm:$0xff] %vm736_vm7, %v1334_v16  ;;  %v1842_v25 = vadd.f32 %v6577_v7, %v1806_v20  ;;  %v1332_v3 = vadd.f32 %v1296_v22, %v1177_v21  ;;  %v4869_v15 = vsel %vm4864_vm9, %v4866_v14, %v4868_v58  ;;  %v4276_v16 = vrot.slane %v4274_v59, 2  ;;  %v1307_v59 = vld [vmem:[#allocation3 + $0x98] sm:$0xff] }
 0x115   : > { %v6578_v26 = vpop.f32.mrf.mxu0  ;;  %v1804_v28 = vld [vmem:[#allocation3 + $0x20] sm:$0xff]  ;;  %v6544_v29 = vpop.f32.mrf.mxu1  ;;  %v4263_v22 = vsel %vm4219_vm8, %v7748_v23, %v4262_v61  ;;  %v4288_v27 = vrot.slane %v4286_v60, 3 }
 0x116   : > { %1878 = vst.msk [vmem:[#allocation3 + $0x30] sm:$0xff] %vm736_vm7, %v1842_v25  ;;  %1368 = vst.msk [vmem:[#allocation3 + $0x40] sm:$0xff] %vm736_vm7, %v1332_v3  ;;  %v1840_v38 = vadd.f32 %v1804_v28, %v1673_v42  ;;  %v1335_v39 = vadd.f32 %v6544_v29, %v1299_v30  ;;  %v4279_v42 = vrot.slane %v4277_v62, 3  ;;  %v1301_v25 = vld [vmem:[#allocation3 + $0x68] sm:$0xff]  ;;  %v4272_v3 = vsel %vm4219_vm8, %v4262_v61, %v7778_v6  ;;  %v7023_v28 = vld [vmem:[#allocation2 + $0x58] sm:$0xff]  }
 0x117   : > { %v1676_v41 = vpop.f32.mrf.mxu0  ;;  %v1807_v34 = vld [vmem:[#allocation3 + $0x38] sm:$0xff]  ;;  %v1180_v45 = vpop.f32.mrf.mxu1  ;;  %v4301_v51 = vshrl.u32 %v7023_v28, 16  ;;  %v7824_v60 = vld [vmem:[#allocation2 + $0x48] sm:$0xff]  }
 0x118   : > { %1876 = vst.msk [vmem:[#allocation3 + $0x20] sm:$0xff] %vm736_vm7, %v1840_v38  ;;  %1371 = vst.msk [vmem:[#allocation3 + $0x58] sm:$0xff] %vm736_vm7, %v1335_v39  ;;  %v1843_v52 = vadd.f32 %v6578_v26, %v1807_v34  ;;  %v1333_v53 = vadd.f32 %v1297_v54, %v1180_v45  ;;  %v4285_v26 = vrot.slane %v4283_v47, 2  ;;  %v4280_v37 = vor.u32 %v4279_v42, %v4276_v16  ;;  %v1310_v42 = vld [vmem:[#allocation3 + $0xb0] sm:$0xff] }
 0x119   : > { %v6581_v55 = vpop.f32.mrf.mxu0  ;;  %6756 = vmatmul.mubr.msk.bf16.gmra.mxu0 %vm500_vm2, %v3744_v31  ;;  %v1805_v35 = vld [vmem:[#allocation3 + $0x28] sm:$0xff]  ;;  %v6547_v56 = vpop.f32.mrf.mxu1  ;;  %6762 = vmatmul.mubr.msk.bf16.vlgmr.msra.gmra.mxu1 %vm500_vm2, %v4245_v33  ;;  %v4872_v38 = vrot.slane %v7782_v10, 3  ;;  %v4874_v39 = vrot.slane %v7787_v18, 3  ;;  %v4292_v34 = vshrl.u32 %v7021_v24, 16  ;;  %v4295_v45 = vshll.u32 %v7021_v24, 16  ;;  %v7027_v10 = vld [vmem:[#allocation2 + $0x68] sm:$0xff]  }
 0x11a   : > { %6799 = vmatprep.mubr.msk.bf16.mxu0 %vm500_vm2, %v4867_v32  ;;  %1879 = vst.msk [vmem:[#allocation3 + $0x38] sm:$0xff] %vm736_vm7, %v1843_v52  ;;  %1369 = vst.msk [vmem:[#allocation3 + $0x48] sm:$0xff] %vm736_vm7, %v1333_v53  ;;  %v1841_v63 = vadd.f32 %v1805_v35, %v1676_v41  ;;  %v1338_v48 = vadd.f32 %v6547_v56, %v1302_v57  ;;  %6765 = vmatprep.mubr.msk.bf16.mxu1 %vm500_vm2, %v4254_v40  ;;  %v1306_v32 = vld [vmem:[#allocation3 + $0x90] sm:$0xff]  ;;  %v4304_v52 = vshll.u32 %v7023_v28, 16  ;;  %v7812_v56 = vld [vmem:[#allocation2 + $0x40] sm:$0xff]  }
 0x11b   : > { %v1689_v0 = vpop.f32.mrf.mxu0  ;;  %v1810_v2 = vld [vmem:[#allocation3 + $0x50] sm:$0xff]  ;;  %v1193_v4 = vpop.f32.mrf.mxu1  ;;  %v7808_v49 = vor.u32 %v4288_v27, %v4285_v26  ;;  %v4281_v62 = vsel %vm4219_vm8, %v7778_v6, %v4280_v37  ;;  %v4297_v47 = vrot.slane %v4295_v45, 3  ;;  %v1308_v26 = vld [vmem:[#allocation3 + $0xa0] sm:$0xff]  ;;  %v4319_v28 = vshrl.u32 %v7027_v10, 16 }
 0x11c   : > { %1877 = vst.msk [vmem:[#allocation3 + $0x28] sm:$0xff] %vm736_vm7, %v1841_v63  ;;  %1374 = vst.msk [vmem:[#allocation3 + $0x70] sm:$0xff] %vm736_vm7, %v1338_v48  ;;  %v1846_v7 = vadd.f32 %v6581_v55, %v1810_v2  ;;  %v1336_v8 = vadd.f32 %v1300_v5, %v1193_v4  ;;  %v4873_v63 = vsel %vm4864_vm9, %v4870_v1, %v4872_v38  ;;  %v4294_v5 = vrot.slane %v4292_v34, 2  ;;  %v7847_v34 = vld [vmem:[#allocation2 + $0x58] sm:$0xff]  }
 0x11d   : > { %v6582_v9 = vpop.f32.mrf.mxu0  ;;  %v1808_v11 = vld [vmem:[#allocation3 + $0x40] sm:$0xff]  ;;  %v6548_v12 = vpop.f32.mrf.mxu1  ;;  %v4875_v48 = vsel %vm4864_vm9, %v4872_v38, %v4874_v39  ;;  %v4290_v1 = vsel %vm4219_vm8, %v4280_v37, %v7808_v49  ;;  %v1311_v38 = vld [vmem:[#allocation3 + $0xb8] sm:$0xff] }
 0x11e   : > { %1882 = vst.msk [vmem:[#allocation3 + $0x50] sm:$0xff] %vm736_vm7, %v1846_v7  ;;  %1372 = vst.msk [vmem:[#allocation3 + $0x60] sm:$0xff] %vm736_vm7, %v1336_v8  ;;  %v1844_v19 = vadd.f32 %v1808_v11, %v1689_v0  ;;  %v1339_v20 = vadd.f32 %v6548_v12, %v1303_v13  ;;  %v7025_v0 = vld [vmem:[#allocation2 + $0x60] sm:$0xff]   ;;  %v1305_v7 = vld [vmem:[#allocation3 + $0x88] sm:$0xff]  ;;  %v4303_v8 = vrot.slane %v4301_v51, 2 }
 0x11f   : > { %v1692_v21 = vpop.f32.mrf.mxu0  ;;  %v1811_v14 = vld [vmem:[#allocation3 + $0x58] sm:$0xff]  ;;  %v1196_v36 = vpop.f32.mrf.mxu1  ;;  %v7029_v51 = vld [vmem:[#allocation2 + $0x70] sm:$0xff]  }
 0x120   : > { %1880 = vst.msk [vmem:[#allocation3 + $0x40] sm:$0xff] %vm736_vm7, %v1844_v19  ;;  %1375 = vst.msk [vmem:[#allocation3 + $0x78] sm:$0xff] %vm736_vm7, %v1339_v20  ;;  %v1847_v29 = vadd.f32 %v6582_v9, %v1811_v14  ;;  %v1337_v23 = vadd.f32 %v1301_v25, %v1196_v36  ;;  %v4306_v9 = vrot.slane %v4304_v52, 3  ;;  %v4876_v19 = vrot.slane %v7812_v56, 3 }
 0x121   : > { %v6585_v30 = vpop.f32.mrf.mxu0  ;;  %6800 = vmatmul.mubr.msk.bf16.vlgmr.msra.gmra.mxu0 %vm500_vm2, %v4869_v15  ;;  %v1809_v31 = vld [vmem:[#allocation3 + $0x48] sm:$0xff]  ;;  %v6551_v33 = vpop.f32.mrf.mxu1  ;;  %6766 = vmatmul.mubr.msk.bf16.gmra.mxu1 %vm500_vm2, %v4263_v22  ;;  %v4310_v20 = vshrl.u32 %v7025_v0, 16  ;;  %v4298_v14 = vor.u32 %v4297_v47, %v4294_v5  ;;  %v4878_v36 = vrot.slane %v7824_v60, 3 }
 0x122   : > { %6803 = vmatprep.mubr.msk.bf16.mxu0 %vm500_vm2, %v4871_v50  ;;  %1883 = vst.msk [vmem:[#allocation3 + $0x58] sm:$0xff] %vm736_vm7, %v1847_v29  ;;  %1373 = vst.msk [vmem:[#allocation3 + $0x68] sm:$0xff] %vm736_vm7, %v1337_v23  ;;  %v1845_v41 = vadd.f32 %v1809_v31, %v1692_v21  ;;  %v1342_v43 = vadd.f32 %v6551_v33, %v1306_v32  ;;  %6769 = vmatprep.mubr.msk.bf16.mxu1 %vm500_vm2, %v4272_v3  ;;  %v4313_v21 = vshll.u32 %v7025_v0, 16  ;;  %v7842_v33 = vld [vmem:[#allocation2 + $0x50] sm:$0xff]  }
 0x123   : > { %v1705_v44 = vpop.f32.mrf.mxu0  ;;  %v1814_v54 = vld [vmem:[#allocation3 + $0x70] sm:$0xff]  ;;  %v1209_v40 = vpop.f32.mrf.mxu1  ;;  %v7838_v27 = vor.u32 %v4306_v9, %v4303_v8  ;;  %v4322_v29 = vshll.u32 %v7027_v10, 16  ;;  %v4879_v18 = vsel %vm4864_vm9, %v4876_v19, %v4878_v36  ;;  %v1312_v8 = vld [vmem:[#allocation3 + $0xc0] sm:$0xff]  ;;  %v1313_v60 = vld [vmem:[#allocation3 + $0xc8] sm:$0xff] }
 0x124   : > { %1881 = vst.msk [vmem:[#allocation3 + $0x48] sm:$0xff] %vm736_vm7, %v1845_v41  ;;  %1378 = vst.msk [vmem:[#allocation3 + $0x90] sm:$0xff] %vm736_vm7, %v1342_v43  ;;  %v1850_v53 = vadd.f32 %v6585_v30, %v1814_v54  ;;  %v1340_v55 = vadd.f32 %v1304_v46, %v1209_v40  ;;  %v4877_v41 = vsel %vm4864_vm9, %v4874_v39, %v4876_v19  ;;  %v4312_v43 = vrot.slane %v4310_v20, 2 }
 0x125   : > { %v6586_v35 = vpop.f32.mrf.mxu0  ;;  %v1812_v57 = vld [vmem:[#allocation3 + $0x60] sm:$0xff]  ;;  %v6552_v58 = vpop.f32.mrf.mxu1  ;;  %v4299_v46 = vsel %vm4219_vm8, %v7808_v49, %v4298_v14  ;;  %v4324_v56 = vrot.slane %v4322_v29, 3 }
 0x126   : > { %1886 = vst.msk [vmem:[#allocation3 + $0x70] sm:$0xff] %vm736_vm7, %v1850_v53  ;;  %1376 = vst.msk [vmem:[#allocation3 + $0x80] sm:$0xff] %vm736_vm7, %v1340_v55  ;;  %v1848_v61 = vadd.f32 %v1812_v57, %v1705_v44  ;;  %v1343_v2 = vadd.f32 %v6552_v58, %v1307_v59  ;;  %v4315_v44 = vrot.slane %v4313_v21, 3  ;;  %v1309_v53 = vld [vmem:[#allocation3 + $0xa8] sm:$0xff]  ;;  %v4308_v55 = vsel %vm4219_vm8, %v4298_v14, %v7838_v27  ;;  %v7031_v57 = vld [vmem:[#allocation2 + $0x78] sm:$0xff]  }
 0x127   : > { %v1708_v4 = vpop.f32.mrf.mxu0  ;;  %v1815_v6 = vld [vmem:[#allocation3 + $0x78] sm:$0xff]  ;;  %v1212_v17 = vpop.f32.mrf.mxu1  ;;  %v4337_v10 = vshrl.u32 %v7031_v57, 16 }
 0x128   : > { %1884 = vst.msk [vmem:[#allocation3 + $0x60] sm:$0xff] %vm736_vm7, %v1848_v61  ;;  %1379 = vst.msk [vmem:[#allocation3 + $0x98] sm:$0xff] %vm736_vm7, %v1343_v2  ;;  %v1851_v11 = vadd.f32 %v6586_v35, %v1815_v6  ;;  %v1341_v12 = vadd.f32 %v1305_v7, %v1212_v17  ;;  %v4321_v35 = vrot.slane %v4319_v28, 2  ;;  %v4316_v0 = vor.u32 %v4315_v44, %v4312_v43  ;;  %v1315_v21 = vld [vmem:[#allocation3 + $0xd8] sm:$0xff]  ;;  %v1318_v44 = vld [vmem:[#allocation3 + $0xf0] sm:$0xff] }
 0x129   : > { %v6589_v13 = vpop.f32.mrf.mxu0  ;;  %6804 = vmatmul.mubr.msk.bf16.gmra.mxu0 %vm500_vm2, %v4873_v63  ;;  %v1813_v15 = vld [vmem:[#allocation3 + $0x68] sm:$0xff]  ;;  %v6555_v16 = vpop.f32.mrf.mxu1  ;;  %6770 = vmatmul.mubr.msk.bf16.gmra.mxu1 %vm500_vm2, %v4281_v62  ;;  %v4880_v61 = vrot.slane %v7842_v33, 3  ;;  %v4882_v2 = vrot.slane %v7847_v34, 3  ;;  %v4328_v6 = vshrl.u32 %v7029_v51, 16  ;;  %v4331_v17 = vshll.u32 %v7029_v51, 16  ;;  %v7884_v14 = vld [vmem:[#allocation2 + $0x80] sm:$0xff]  }
 0x12a   : > { %6807 = vmatprep.mubr.msk.bf16.mxu0 %vm500_vm2, %v4875_v48  ;;  %1887 = vst.msk [vmem:[#allocation3 + $0x78] sm:$0xff] %vm736_vm7, %v1851_v11  ;;  %1377 = vst.msk [vmem:[#allocation3 + $0x88] sm:$0xff] %vm736_vm7, %v1341_v12  ;;  %v1849_v22 = vadd.f32 %v1813_v15, %v1708_v4  ;;  %v1346_v50 = vadd.f32 %v6555_v16, %v1310_v42  ;;  %6773 = vmatprep.mubr.msk.bf16.mxu1 %vm500_vm2, %v4290_v1  ;;  %v1314_v48 = vld [vmem:[#allocation3 + $0xd0] sm:$0xff]  ;;  %v4340_v11 = vshll.u32 %v7031_v57, 16  ;;  %v7872_v16 = vld [vmem:[#allocation2 + $0x60] sm:$0xff]  }
 0x12b   : > { %v1721_v24 = vpop.f32.mrf.mxu0  ;;  %v1818_v25 = vld [vmem:[#allocation3 + $0x90] sm:$0xff]  ;;  %v1225_v3 = vpop.f32.mrf.mxu1  ;;  %v7868_v9 = vor.u32 %v4324_v56, %v4321_v35  ;;  %v7874_v42 = vld [vmem:[#allocation2 + $0x68] sm:$0xff]   ;;  %v4330_v28 = vrot.slane %v4328_v6, 2  ;;  %v4333_v29 = vrot.slane %v4331_v17, 3  ;;  %v7037_v6 = vld [vmem:[#allocation2 + $0x90] sm:$0xff]  }
 0x12c   : > { %1885 = vst.msk [vmem:[#allocation3 + $0x68] sm:$0xff] %vm736_vm7, %v1849_v22  ;;  %1382 = vst.msk [vmem:[#allocation3 + $0xb0] sm:$0xff] %vm736_vm7, %v1346_v50  ;;  %v1854_v23 = vadd.f32 %v6589_v13, %v1818_v25  ;;  %v1344_v30 = vadd.f32 %v1308_v26, %v1225_v3  ;;  %v4317_v22 = vsel %vm4219_vm8, %v7838_v27, %v4316_v0  ;;  %v7035_v33 = vld [vmem:[#allocation2 + $0x88] sm:$0xff]   ;;  %v7918_v34 = vld [vmem:[#allocation2 + $0x78] sm:$0xff]  }
 0x12d   : > { %v6590_v31 = vpop.f32.mrf.mxu0  ;;  %v1816_v32 = vld [vmem:[#allocation3 + $0x80] sm:$0xff]  ;;  %v6556_v37 = vpop.f32.mrf.mxu1  ;;  %v4881_v50 = vsel %vm4864_vm9, %v4878_v36, %v4880_v61  ;;  %v4326_v36 = vsel %vm4219_vm8, %v4316_v0, %v7868_v9  ;;  %v4355_v57 = vshrl.u32 %v7035_v33, 16 }
 0x12e   : > { %1890 = vst.msk [vmem:[#allocation3 + $0x90] sm:$0xff] %vm736_vm7, %v1854_v23  ;;  %1380 = vst.msk [vmem:[#allocation3 + $0xa0] sm:$0xff] %vm736_vm7, %v1344_v30  ;;  %v1852_v45 = vadd.f32 %v1816_v32, %v1721_v24  ;;  %v1347_v54 = vadd.f32 %v6556_v37, %v1311_v38  ;;  %v4883_v24 = vsel %vm4864_vm9, %v4880_v61, %v4882_v2  ;;  %v4339_v30 = vrot.slane %v4337_v10, 2  ;;  %v1316_v35 = vld [vmem:[#allocation3 + $0xe0] sm:$0xff]  ;;  %v1319_v61 = vld [vmem:[#allocation3 + $0xf8] sm:$0xff] }
 0x12f   : > { %v1724_v40 = vpop.f32.mrf.mxu0  ;;  %v1819_v39 = vld [vmem:[#allocation3 + $0x98] sm:$0xff]  ;;  %v1228_v52 = vpop.f32.mrf.mxu1 }
 0x130   : > { %1888 = vst.msk [vmem:[#allocation3 + $0x80] sm:$0xff] %vm736_vm7, %v1852_v45  ;;  %1383 = vst.msk [vmem:[#allocation3 + $0xb8] sm:$0xff] %vm736_vm7, %v1347_v54  ;;  %v1855_v58 = vadd.f32 %v6590_v31, %v1819_v39  ;;  %v1345_v49 = vadd.f32 %v1309_v53, %v1228_v52  ;;  %v4342_v31 = vrot.slane %v4340_v11, 3  ;;  %v4884_v45 = vrot.slane %v7872_v16, 3 }
 0x131   : > { %v6593_v59 = vpop.f32.mrf.mxu0  ;;  %6808 = vmatmul.mubr.msk.bf16.gmra.mxu0 %vm500_vm2, %v4877_v41  ;;  %v1817_v62 = vld [vmem:[#allocation3 + $0x88] sm:$0xff]  ;;  %v6559_v63 = vpop.f32.mrf.mxu1  ;;  %6774 = vmatmul.mubr.msk.bf16.gmra.mxu1 %vm500_vm2, %v4299_v46  ;;  %v4886_v54 = vrot.slane %v7874_v42, 3  ;;  %v4334_v39 = vor.u32 %v4333_v29, %v4330_v28  ;;  %v4349_v52 = vshll.u32 %v7884_v14, 16 }
 0x132   : > { %6811 = vmatprep.mubr.msk.bf16.mxu0 %vm500_vm2, %v4879_v18  ;;  %1891 = vst.msk [vmem:[#allocation3 + $0x98] sm:$0xff] %vm736_vm7, %v1855_v58  ;;  %1381 = vst.msk [vmem:[#allocation3 + $0xa8] sm:$0xff] %vm736_vm7, %v1345_v49  ;;  %v1853_v4 = vadd.f32 %v1817_v62, %v1724_v40  ;;  %v1350_v5 = vadd.f32 %v6559_v63, %v1314_v48  ;;  %6777 = vmatprep.mubr.msk.bf16.mxu1 %vm500_vm2, %v4308_v55  ;;  %v4346_v40 = vshrl.u32 %v7884_v14, 16  ;;  %v7906_v63 = vld [vmem:[#allocation2 + $0x70] sm:$0xff]  }
 0x133   : > { %v1737_v47 = vpop.f32.mrf.mxu0  ;;  %v1822_v7 = vld [vmem:[#allocation3 + $0xb0] sm:$0xff]  ;;  %v1241_v1 = vpop.f32.mrf.mxu1  ;;  %v7902_v56 = vor.u32 %v4342_v31, %v4339_v30  ;;  %v4358_v58 = vshll.u32 %v7035_v33, 16  ;;  %v4351_v10 = vrot.slane %v4349_v52, 3  ;;  %v4888_v14 = vrot.slane %v7906_v63, 3  ;;  %v1320_v30 = vld [vmem:[#allocation3 + $0x100] sm:$0xff] }
 0x134   : > { %1889 = vst.msk [vmem:[#allocation3 + $0x88] sm:$0xff] %vm736_vm7, %v1853_v4  ;;  %1386 = vst.msk [vmem:[#allocation3 + $0xd0] sm:$0xff] %vm736_vm7, %v1350_v5  ;;  %v1858_v12 = vadd.f32 %v6593_v59, %v1822_v7  ;;  %v1348_v13 = vadd.f32 %v1312_v8, %v1241_v1  ;;  %v4885_v4 = vsel %vm4864_vm9, %v4882_v2, %v4884_v45 }
 0x135   : > { %v6594_v15 = vpop.f32.mrf.mxu0  ;;  %v1820_v19 = vld [vmem:[#allocation3 + $0xa0] sm:$0xff]  ;;  %v6560_v20 = vpop.f32.mrf.mxu1  ;;  %v4887_v5 = vsel %vm4864_vm9, %v4884_v45, %v4886_v54  ;;  %v4335_v8 = vsel %vm4219_vm8, %v7868_v9, %v4334_v39  ;;  %v4360_v16 = vrot.slane %v4358_v58, 3 }
 0x136   : > { %1894 = vst.msk [vmem:[#allocation3 + $0xb0] sm:$0xff] %vm736_vm7, %v1858_v12  ;;  %1384 = vst.msk [vmem:[#allocation3 + $0xc0] sm:$0xff] %vm736_vm7, %v1348_v13  ;;  %v1856_v25 = vadd.f32 %v1820_v19, %v1737_v47  ;;  %v1351_v3 = vadd.f32 %v6560_v20, %v1315_v21  ;;  %v4348_v47 = vrot.slane %v4346_v40, 2  ;;  %v1317_v12 = vld [vmem:[#allocation3 + $0xe8] sm:$0xff]  ;;  %v4344_v13 = vsel %vm4219_vm8, %v4334_v39, %v7902_v56  ;;  %v7039_v19 = vld [vmem:[#allocation2 + $0x98] sm:$0xff]  }
 0x137   : > { %v1740_v26 = vpop.f32.mrf.mxu0  ;;  %v1823_v27 = vld [vmem:[#allocation3 + $0xb8] sm:$0xff]  ;;  %v1244_v23 = vpop.f32.mrf.mxu1  ;;  %v4373_v33 = vshrl.u32 %v7039_v19, 16  ;;  %v7939_v39 = vld [vmem:[#allocation2 + $0x88] sm:$0xff]  }
 0x138   : > { %1892 = vst.msk [vmem:[#allocation3 + $0xa0] sm:$0xff] %vm736_vm7, %v1856_v25  ;;  %1387 = vst.msk [vmem:[#allocation3 + $0xd8] sm:$0xff] %vm736_vm7, %v1351_v3  ;;  %v1859_v32 = vadd.f32 %v6594_v15, %v1823_v27  ;;  %v1349_v37 = vadd.f32 %v1313_v60, %v1244_v23  ;;  %v4357_v15 = vrot.slane %v4355_v57, 2  ;;  %v4364_v25 = vshrl.u32 %v7037_v6, 16  ;;  %v1323_v40 = vld [vmem:[#allocation3 + $0x118] sm:$0xff] }
 0x139   : > { %v6597_v38 = vpop.f32.mrf.mxu0  ;;  %6812 = vmatmul.mubr.msk.bf16.gmra.mxu0 %vm500_vm2, %v4881_v50  ;;  %v1821_v41 = vld [vmem:[#allocation3 + $0xa8] sm:$0xff]  ;;  %v6563_v43 = vpop.f32.mrf.mxu1  ;;  %6778 = vmatmul.mubr.msk.bf16.gmra.mxu1 %vm500_vm2, %v4317_v22  ;;  %v4367_v3 = vshll.u32 %v7037_v6, 16  ;;  %v4352_v27 = vor.u32 %v4351_v10, %v4348_v47  ;;  %v4890_v23 = vrot.slane %v7918_v34, 3  ;;  %v7041_v57 = vld [vmem:[#allocation2 + $0xa0] ss:$0 sps:$4 sm:$0x77]  }
 0x13a   : > { %6815 = vmatprep.mubr.msk.bf16.mxu0 %vm500_vm2, %v4883_v24  ;;  %1895 = vst.msk [vmem:[#allocation3 + $0xb8] sm:$0xff] %vm736_vm7, %v1859_v32  ;;  %1385 = vst.msk [vmem:[#allocation3 + $0xc8] sm:$0xff] %vm736_vm7, %v1349_v37  ;;  %v1857_v46 = vadd.f32 %v1821_v41, %v1740_v26  ;;  %v1354_v18 = vadd.f32 %v6563_v43, %v1318_v44  ;;  %6781 = vmatprep.mubr.msk.bf16.mxu1 %vm500_vm2, %v4326_v36  ;;  %v1322_v24 = vld [vmem:[#allocation3 + $0x110] sm:$0xff]  ;;  %v4376_v32 = vshll.u32 %v7039_v19, 16  ;;  %v7038_v43 = vld [vmem:[#allocation2 + $0x80] sm:$0xff]  }
 0x13b   : > { %v1753_v51 = vpop.f32.mrf.mxu0  ;;  %v1826_v53 = vld [vmem:[#allocation3 + $0xd0] sm:$0xff]  ;;  %v1257_v55 = vpop.f32.mrf.mxu1  ;;  %v7932_v31 = vor.u32 %v4360_v16, %v4357_v15  ;;  %v4891_v42 = vsel %vm4864_vm9, %v4888_v14, %v4890_v23  ;;  %v4892_v6 = vrot.slane %v7038_v43, 3  ;;  %v4382_v10 = vshrl.u32 %v7041_v57, 16 }
 0x13c   : > { %1893 = vst.msk [vmem:[#allocation3 + $0xa8] sm:$0xff] %vm736_vm7, %v1857_v46  ;;  %1390 = vst.msk [vmem:[#allocation3 + $0xf0] sm:$0xff] %vm736_vm7, %v1354_v18  ;;  %v1862_v49 = vadd.f32 %v6597_v38, %v1826_v53  ;;  %v1352_v59 = vadd.f32 %v1316_v35, %v1257_v55  ;;  %v4889_v46 = vsel %vm4864_vm9, %v4886_v54, %v4888_v14  ;;  %v4366_v18 = vrot.slane %v4364_v25, 2  ;;  %v7042_v25 = vld [vmem:[#allocation2 + $0x90] sm:$0xff]  }
 0x13d   : > { %v6598_v62 = vpop.f32.mrf.mxu0  ;;  %v1824_v48 = vld [vmem:[#allocation3 + $0xc0] sm:$0xff]  ;;  %v6564_v0 = vpop.f32.mrf.mxu1  ;;  %v4353_v35 = vsel %vm4219_vm8, %v7902_v56, %v4352_v27  ;;  %v4378_v63 = vrot.slane %v4376_v32, 3  ;;  %v4896_v43 = vrot.slane %v7042_v25, 3 }
 0x13e   : > { %1898 = vst.msk [vmem:[#allocation3 + $0xd0] sm:$0xff] %vm736_vm7, %v1862_v49  ;;  %1388 = vst.msk [vmem:[#allocation3 + $0xe0] sm:$0xff] %vm736_vm7, %v1352_v59  ;;  %v1860_v17 = vadd.f32 %v1824_v48, %v1753_v51  ;;  %v1355_v7 = vadd.f32 %v6564_v0, %v1319_v61  ;;  %v4369_v51 = vrot.slane %v4367_v3, 3  ;;  %v1321_v49 = vld [vmem:[#allocation3 + $0x108] sm:$0xff]  ;;  %v4362_v59 = vsel %vm4219_vm8, %v4352_v27, %v7932_v31 }
 0x13f   : > { %v1756_v1 = vpop.f32.mrf.mxu0  ;;  %v1827_v2 = vld [vmem:[#allocation3 + $0xd8] sm:$0xff]  ;;  %v1260_v11 = vpop.f32.mrf.mxu1 }
 0x140   : > { %1896 = vst.msk [vmem:[#allocation3 + $0xc0] sm:$0xff] %vm736_vm7, %v1860_v17  ;;  %1391 = vst.msk [vmem:[#allocation3 + $0xf8] sm:$0xff] %vm736_vm7, %v1355_v7  ;;  %v1863_v20 = vadd.f32 %v6598_v62, %v1827_v2  ;;  %v1353_v21 = vadd.f32 %v1317_v12, %v1260_v11  ;;  %v4375_v62 = vrot.slane %v4373_v33, 2  ;;  %v4370_v47 = vor.u32 %v4369_v51, %v4366_v18 }
 0x141   : > { %v6601_v22 = vpop.f32.mrf.mxu0  ;;  %6816 = vmatmul.mubr.msk.bf16.gmra.mxu0 %vm500_vm2, %v4885_v4  ;;  %v1825_v9 = vld [vmem:[#allocation3 + $0xc8] sm:$0xff]  ;;  %v6567_v50 = vpop.f32.mrf.mxu1  ;;  %6782 = vmatmul.mubr.msk.bf16.gmra.mxu1 %vm500_vm2, %v4335_v8  ;;  %v4894_v17 = vrot.slane %v7939_v39, 3  ;;  %v4385_v2 = vshll.u32 %v7041_v57, 16 }
 0x142   : > { %6819 = vmatprep.mubr.msk.bf16.mxu0 %vm500_vm2, %v4887_v5  ;;  %1899 = vst.msk [vmem:[#allocation3 + $0xd8] sm:$0xff] %vm736_vm7, %v1863_v20  ;;  %1389 = vst.msk [vmem:[#allocation3 + $0xe8] sm:$0xff] %vm736_vm7, %v1353_v21  ;;  %v1861_v26 = vadd.f32 %v1825_v9, %v1756_v1  ;;  %v1358_v28 = vadd.f32 %v6567_v50, %v1322_v24  ;;  %6785 = vmatprep.mubr.msk.bf16.mxu1 %vm500_vm2, %v4344_v13  ;;  %v2313_v5 = vld [vmem:[#allocation3 + $0x10] sm:$0xff]  ;;  %v2311_v13 = vld [vmem:[#allocation3] sm:$0xff] }
 0x143   : > { %v1769_v29 = vpop.f32.mrf.mxu0  ;;  %v1830_v60 = vld [vmem:[#allocation3 + $0xf0] sm:$0xff]  ;;  %v1273_v36 = vpop.f32.mrf.mxu1  ;;  %v7959_v15 = vor.u32 %v4378_v63, %v4375_v62  ;;  %v2314_v9 = vld [vmem:[#allocation3 + $0x18] sm:$0xff]  ;;  %v4371_v50 = vsel %vm4219_vm8, %v7932_v31, %v4370_v47  ;;  %v4893_v24 = vsel %vm4864_vm9, %v4890_v23, %v4892_v6  ;;  %v4895_v14 = vsel %vm4864_vm9, %v4892_v6, %v4894_v17 }
 0x144   : > { %1897 = vst.msk [vmem:[#allocation3 + $0xc8] sm:$0xff] %vm736_vm7, %v1861_v26  ;;  %1394 = vst.msk [vmem:[#allocation3 + $0x110] sm:$0xff] %vm736_vm7, %v1358_v28  ;;  %v1866_v37 = vadd.f32 %v6601_v22, %v1830_v60  ;;  %v1356_v38 = vadd.f32 %v1320_v30, %v1273_v36  ;;  %v4387_v27 = vrot.slane %v4385_v2, 3  ;;  %v7973_v60 = vld [vmem:[#allocation2 + $0x98] sm:$0xff]   ;;  %v2312_v30 = vld [vmem:[#allocation3 + $0x8] sm:$0xff] }
 0x145   : > { %v6602_v41 = vpop.f32.mrf.mxu0  ;;  %v1828_v44 = vld [vmem:[#allocation3 + $0xe0] sm:$0xff]  ;;  %v6568_v45 = vpop.f32.mrf.mxu1  ;;  %v4380_v23 = vsel %vm4219_vm8, %v4370_v47, %v7959_v15  ;;  %v4898_v18 = vrot.slane %v7973_v60, 3 }
 0x146   : > { %1902 = vst.msk [vmem:[#allocation3 + $0xf0] sm:$0xff] %vm736_vm7, %v1866_v37  ;;  %1392 = vst.msk [vmem:[#allocation3 + $0x100] sm:$0xff] %vm736_vm7, %v1356_v38  ;;  %v1864_v52 = vadd.f32 %v1828_v44, %v1769_v29  ;;  %v1359_v53 = vadd.f32 %v6568_v45, %v1323_v40  ;;  %v4384_v29 = vrot.slane %v4382_v10, 2 }
 0x147   : > { %v1772_v55 = vpop.f32.mrf.mxu0  ;;  %v1831_v54 = vld [vmem:[#allocation3 + $0xf8] sm:$0xff]  ;;  %v1276_v58 = vpop.f32.mrf.mxu1 }
 0x148   : > { %1900 = vst.msk [vmem:[#allocation3 + $0xe0] sm:$0xff] %vm736_vm7, %v1864_v52  ;;  %1395 = vst.msk [vmem:[#allocation3 + $0x118] sm:$0xff] %vm736_vm7, %v1359_v53  ;;  %v1867_v48 = vadd.f32 %v6602_v41, %v1831_v54  ;;  %v1357_v0 = vadd.f32 %v1321_v49, %v1276_v58  ;;  %v2317_v41 = vld [vmem:[#allocation3 + $0x30] sm:$0xff]  ;;  %v2315_v53 = vld [vmem:[#allocation3 + $0x20] sm:$0xff]  ;;  %v4897_v49 = vsel %vm4864_vm9, %v4894_v17, %v4896_v43 }
 0x149   : > { %v6605_v56 = vpop.f32.mrf.mxu0  ;;  %6820 = vmatmul.mubr.msk.bf16.gmra.mxu0 %vm500_vm2, %v4889_v46  ;;  %v1829_v61 = vld [vmem:[#allocation3 + $0xe8] sm:$0xff]  ;;  %v6611_v4 = vpop.f32.mrf.mxu1  ;;  %6786 = vmatmul.mubr.msk.bf16.gmra.mxu1 %vm500_vm2, %v4353_v35  ;;  %v4388_v46 = vor.u32 %v4387_v27, %v4384_v29  ;;  %v2318_v58 = vld [vmem:[#allocation3 + $0x38] sm:$0xff] }
 0x14a   : > { %6823 = vmatprep.mubr.msk.bf16.mxu0 %vm500_vm2, %v4891_v42  ;;  %1903 = vst.msk [vmem:[#allocation3 + $0xf8] sm:$0xff] %vm736_vm7, %v1867_v48  ;;  %1393 = vst.msk [vmem:[#allocation3 + $0x108] sm:$0xff] %vm736_vm7, %v1357_v0  ;;  %v1865_v7 = vadd.f32 %v1829_v61, %v1772_v55  ;;  %v2349_v1 = vadd.f32 %v6611_v4, %v2313_v5  ;;  %6789 = vmatprep.mubr.msk.bf16.mxu1 %vm500_vm2, %v4362_v59  ;;  %v7044_v59 = vld [vmem:[#allocation2 + $0xa0] ss:$0 sps:$4 sm:$0x77]   ;;  %v2316_v5 = vld [vmem:[#allocation3 + $0x28] sm:$0xff] }
 0x14b   : > { %v1785_v8 = vpop.f32.mrf.mxu0  ;;  %v1834_v11 = vld [vmem:[#allocation3 + $0x110] sm:$0xff]  ;;  %v2168_v12 = vpop.f32.mrf.mxu1  ;;  %v4389_v0 = vsel %vm4219_vm8, %v7959_v15, %v4388_v46  ;;  %v2319_v15 = vld [vmem:[#allocation3 + $0x40] sm:$0xff]  ;;  %v2326_v46 = vld [vmem:[#allocation3 + $0x78] sm:$0xff] }
 0x14c   : > { %1901 = vst.msk [vmem:[#allocation3 + $0xe8] sm:$0xff] %vm736_vm7, %v1865_v7  ;;  %v1870_v16 = vadd.f32 %v6605_v56, %v1834_v11  ;;  %2385 = vst.msk [vmem:[#allocation3 + $0x10] sm:$0xff] %vm736_vm7, %v2349_v1  ;;  %v2347_v19 = vadd.f32 %v2311_v13, %v2168_v12  ;;  %v4899_v56 = vsel %vm4864_vm9, %v4896_v43, %v4898_v18  ;;  %v2321_v1 = vld [vmem:[#allocation3 + $0x50] sm:$0xff] }
 0x14d   : > { %v6606_v20 = vpop.f32.mrf.mxu0  ;;  %v1832_v21 = vld [vmem:[#allocation3 + $0x100] sm:$0xff]  ;;  %v6612_v22 = vpop.f32.mrf.mxu1 }
 0x14e   : > { %1906 = vst.msk [vmem:[#allocation3 + $0x110] sm:$0xff] %vm736_vm7, %v1870_v16  ;;  %v1868_v3 = vadd.f32 %v1832_v21, %v1785_v8  ;;  %2383 = vst.msk [vmem:[#allocation3] sm:$0xff] %vm736_vm7, %v2347_v19  ;;  %v2350_v26 = vadd.f32 %v6612_v22, %v2314_v9  ;;  %v4900_v8 = vrot.slane %v7044_v59, 3  ;;  %v2322_v9 = vld [vmem:[#allocation3 + $0x58] sm:$0xff]  ;;  %v2329_v59 = vld [vmem:[#allocation3 + $0x90] sm:$0xff] }
 0x14f   : > { %v1788_v28 = vpop.f32.mrf.mxu0  ;;  %v1835_v36 = vld [vmem:[#allocation3 + $0x118] sm:$0xff]  ;;  %v2171_v34 = vpop.f32.mrf.mxu1 }
 0x150   : > { %1904 = vst.msk [vmem:[#allocation3 + $0x100] sm:$0xff] %vm736_vm7, %v1868_v3  ;;  %v1871_v31 = vadd.f32 %v6606_v20, %v1835_v36  ;;  %2386 = vst.msk [vmem:[#allocation3 + $0x18] sm:$0xff] %vm736_vm7, %v2350_v26  ;;  %v2348_v33 = vadd.f32 %v2312_v30, %v2171_v34  ;;  %v2325_v30 = vld [vmem:[#allocation3 + $0x70] sm:$0xff] }
 0x151   : > { %v6649_v32 = vpop.f32.mrf.mxu0  ;;  %6824 = vmatmul.mubr.msk.bf16.gmra.mxu0 %vm500_vm2, %v4893_v24  ;;  %v1833_v37 = vld [vmem:[#allocation3 + $0x108] sm:$0xff]  ;;  %v6615_v38 = vpop.f32.mrf.mxu1  ;;  %6790 = vmatmul.mubr.msk.bf16.gmra.mxu1 %vm500_vm2, %v4371_v50  ;;  %v4901_v50 = vsel %vm4864_vm9, %v4898_v18, %v4900_v8 }
 0x152   : > { %6827 = vmatprep.mubr.msk.bf16.mxu0 %vm500_vm2, %v4895_v14  ;;  %1907 = vst.msk [vmem:[#allocation3 + $0x118] sm:$0xff] %vm736_vm7, %v1871_v31  ;;  %v1869_v44 = vadd.f32 %v1833_v37, %v1788_v28  ;;  %2384 = vst.msk [vmem:[#allocation3 + $0x8] sm:$0xff] %vm736_vm7, %v2348_v33  ;;  %v2353_v45 = vadd.f32 %v6615_v38, %v2317_v41  ;;  %6793 = vmatprep.mubr.msk.bf16.mxu1 %vm500_vm2, %v4380_v23  ;;  %v2320_v28 = vld [vmem:[#allocation3 + $0x48] sm:$0xff]  ;;  %v2323_v38 = vld [vmem:[#allocation3 + $0x60] sm:$0xff] }
 0x153   : > { %v2813_v40 = vpop.f32.mrf.mxu0  ;;  %v2958_v51 = vld [vmem:[#allocation3 + $0x10] sm:$0xff]  ;;  %v2184_v52 = vpop.f32.mrf.mxu1 }
 0x154   : > { %1905 = vst.msk [vmem:[#allocation3 + $0x108] sm:$0xff] %vm736_vm7, %v1869_v44  ;;  %2389 = vst.msk [vmem:[#allocation3 + $0x30] sm:$0xff] %vm736_vm7, %v2353_v45  ;;  %v2994_v55 = vadd.f32 %v6649_v32, %v2958_v51  ;;  %v2351_v35 = vadd.f32 %v2315_v53, %v2184_v52 }
 0x155   : > { %v6650_v42 = vpop.f32.mrf.mxu0  ;;  %v2956_v57 = vld [vmem:[#allocation3] sm:$0xff]  ;;  %v6616_v54 = vpop.f32.mrf.mxu1 }
 0x156   : > { %3030 = vst.msk [vmem:[#allocation3 + $0x10] sm:$0xff] %vm736_vm7, %v2994_v55  ;;  %2387 = vst.msk [vmem:[#allocation3 + $0x20] sm:$0xff] %vm736_vm7, %v2351_v35  ;;  %v2992_v62 = vadd.f32 %v2956_v57, %v2813_v40  ;;  %v2354_v63 = vadd.f32 %v6616_v54, %v2318_v58  ;;  %v2324_v35 = vld [vmem:[#allocation3 + $0x68] sm:$0xff] }
 0x157   : > { %v2816_v48 = vpop.f32.mrf.mxu0  ;;  %v2959_v61 = vld [vmem:[#allocation3 + $0x18] sm:$0xff]  ;;  %v2187_v4 = vpop.f32.mrf.mxu1 }
 0x158   : > { %3028 = vst.msk [vmem:[#allocation3] sm:$0xff] %vm736_vm7, %v2992_v62  ;;  %2390 = vst.msk [vmem:[#allocation3 + $0x38] sm:$0xff] %vm736_vm7, %v2354_v63  ;;  %v2995_v39 = vadd.f32 %v6650_v42, %v2959_v61  ;;  %v2352_v47 = vadd.f32 %v2316_v5, %v2187_v4  ;;  %v2327_v61 = vld [vmem:[#allocation3 + $0x80] sm:$0xff] }
 0x159   : > { %v6653_v6 = vpop.f32.mrf.mxu0  ;;  %6828 = vmatmul.mubr.msk.bf16.gmra.mxu0 %vm500_vm2, %v4897_v49  ;;  %v2957_v17 = vld [vmem:[#allocation3 + $0x8] sm:$0xff]  ;;  %v6619_v7 = vpop.f32.mrf.mxu1  ;;  %6794 = vmatmul.mubr.msk.bf16.gmra.mxu1 %vm500_vm2, %v4389_v0 }
 0x15a   : > { %6831 = vmatprep.mubr.msk.bf16.mxu0 %vm500_vm2, %v4899_v56  ;;  %3031 = vst.msk [vmem:[#allocation3 + $0x18] sm:$0xff] %vm736_vm7, %v2995_v39  ;;  %2388 = vst.msk [vmem:[#allocation3 + $0x28] sm:$0xff] %vm736_vm7, %v2352_v47  ;;  %v2993_v10 = vadd.f32 %v2957_v17, %v2816_v48  ;;  %v2357_v2 = vadd.f32 %v6619_v7, %v2321_v1  ;;  %v2330_v17 = vld [vmem:[#allocation3 + $0x98] sm:$0xff] }
 0x15b   : > { %v2829_v11 = vpop.f32.mrf.mxu0  ;;  %v2962_v12 = vld [vmem:[#allocation3 + $0x30] sm:$0xff]  ;;  %v2200_v13 = vpop.f32.mrf.mxu1 }
 0x15c   : > { %3029 = vst.msk [vmem:[#allocation3 + $0x8] sm:$0xff] %vm736_vm7, %v2993_v10  ;;  %2393 = vst.msk [vmem:[#allocation3 + $0x50] sm:$0xff] %vm736_vm7, %v2357_v2  ;;  %v2998_v16 = vadd.f32 %v6653_v6, %v2962_v12  ;;  %v2355_v19 = vadd.f32 %v2319_v15, %v2200_v13 }
 0x15d   : > { %v6654_v20 = vpop.f32.mrf.mxu0  ;;  %v2960_v21 = vld [vmem:[#allocation3 + $0x20] sm:$0xff]  ;;  %v6620_v22 = vpop.f32.mrf.mxu1 }
 0x15e   : > { %3034 = vst.msk [vmem:[#allocation3 + $0x30] sm:$0xff] %vm736_vm7, %v2998_v16  ;;  %2391 = vst.msk [vmem:[#allocation3 + $0x40] sm:$0xff] %vm736_vm7, %v2355_v19  ;;  %v2996_v24 = vadd.f32 %v2960_v21, %v2829_v11  ;;  %v2358_v14 = vadd.f32 %v6620_v22, %v2322_v9  ;;  %v2328_v11 = vld [vmem:[#allocation3 + $0x88] sm:$0xff] }
 0x15f   : > { %v2832_v25 = vpop.f32.mrf.mxu0  ;;  %v2963_v3 = vld [vmem:[#allocation3 + $0x38] sm:$0xff]  ;;  %v2203_v26 = vpop.f32.mrf.mxu1 }
 0x160   : > { %3032 = vst.msk [vmem:[#allocation3 + $0x20] sm:$0xff] %vm736_vm7, %v2996_v24  ;;  %2394 = vst.msk [vmem:[#allocation3 + $0x58] sm:$0xff] %vm736_vm7, %v2358_v14  ;;  %v2999_v29 = vadd.f32 %v6654_v20, %v2963_v3  ;;  %v2356_v27 = vadd.f32 %v2320_v28, %v2203_v26  ;;  %v2333_v20 = vld [vmem:[#allocation3 + $0xb0] sm:$0xff]  ;;  %v2331_v14 = vld [vmem:[#allocation3 + $0xa0] sm:$0xff] }
 0x161   : > { %v6657_v60 = vpop.f32.mrf.mxu0  ;;  %6832 = vmatmul.mubr.msk.bf16.gmra.mxu0 %vm500_vm2, %v4901_v50  ;;  %v2961_v36 = vld [vmem:[#allocation3 + $0x28] sm:$0xff]  ;;  %v6623_v34 = vpop.f32.mrf.mxu1 }
 0x162   : > { %3035 = vst.msk [vmem:[#allocation3 + $0x38] sm:$0xff] %vm736_vm7, %v2999_v29  ;;  %2392 = vst.msk [vmem:[#allocation3 + $0x48] sm:$0xff] %vm736_vm7, %v2356_v27  ;;  %v2997_v23 = vadd.f32 %v2961_v36, %v2832_v25  ;;  %v2361_v31 = vadd.f32 %v6623_v34, %v2325_v30  ;;  %v2334_v27 = vld [vmem:[#allocation3 + $0xb8] sm:$0xff] }
 0x163   : > { %v2845_v33 = vpop.f32.mrf.mxu0  ;;  %v2966_v32 = vld [vmem:[#allocation3 + $0x50] sm:$0xff]  ;;  %v2216_v37 = vpop.f32.mrf.mxu1 }
 0x164   : > { %3033 = vst.msk [vmem:[#allocation3 + $0x28] sm:$0xff] %vm736_vm7, %v2997_v23  ;;  %2397 = vst.msk [vmem:[#allocation3 + $0x70] sm:$0xff] %vm736_vm7, %v2361_v31  ;;  %v3002_v41 = vadd.f32 %v6657_v60, %v2966_v32  ;;  %v2359_v43 = vadd.f32 %v2323_v38, %v2216_v37  ;;  %v2332_v31 = vld [vmem:[#allocation3 + $0xa8] sm:$0xff] }
 0x165   : > { %v6658_v44 = vpop.f32.mrf.mxu0  ;;  %v2964_v45 = vld [vmem:[#allocation3 + $0x40] sm:$0xff]  ;;  %v6624_v40 = vpop.f32.mrf.mxu1 }
 0x166   : > { %3038 = vst.msk [vmem:[#allocation3 + $0x50] sm:$0xff] %vm736_vm7, %v3002_v41  ;;  %2395 = vst.msk [vmem:[#allocation3 + $0x60] sm:$0xff] %vm736_vm7, %v2359_v43  ;;  %v3000_v18 = vadd.f32 %v2964_v45, %v2845_v33  ;;  %v2362_v51 = vadd.f32 %v6624_v40, %v2326_v46  ;;  %v2337_v43 = vld [vmem:[#allocation3 + $0xd0] sm:$0xff] }
 0x167   : > { %v2848_v52 = vpop.f32.mrf.mxu0  ;;  %v2967_v53 = vld [vmem:[#allocation3 + $0x58] sm:$0xff]  ;;  %v2219_v55 = vpop.f32.mrf.mxu1 }
 0x168   : > { %3036 = vst.msk [vmem:[#allocation3 + $0x40] sm:$0xff] %vm736_vm7, %v3000_v18  ;;  %2398 = vst.msk [vmem:[#allocation3 + $0x78] sm:$0xff] %vm736_vm7, %v2362_v51  ;;  %v3003_v42 = vadd.f32 %v6658_v44, %v2967_v53  ;;  %v2360_v57 = vadd.f32 %v2324_v35, %v2219_v55  ;;  %v2335_v51 = vld [vmem:[#allocation3 + $0xc0] sm:$0xff] }
 0x169   : > { %v6661_v54 = vpop.f32.mrf.mxu0  ;;  %v2965_v58 = vld [vmem:[#allocation3 + $0x48] sm:$0xff]  ;;  %v6627_v49 = vpop.f32.mrf.mxu1 }
 0x16a   : > { %3039 = vst.msk [vmem:[#allocation3 + $0x58] sm:$0xff] %vm736_vm7, %v3003_v42  ;;  %2396 = vst.msk [vmem:[#allocation3 + $0x68] sm:$0xff] %vm736_vm7, %v2360_v57  ;;  %v3001_v62 = vadd.f32 %v2965_v58, %v2848_v52  ;;  %v2365_v63 = vadd.f32 %v6627_v49, %v2329_v59  ;;  %v2338_v57 = vld [vmem:[#allocation3 + $0xd8] sm:$0xff] }
 0x16b   : > { %v2861_v48 = vpop.f32.mrf.mxu0  ;;  %v2970_v0 = vld [vmem:[#allocation3 + $0x70] sm:$0xff]  ;;  %v2232_v56 = vpop.f32.mrf.mxu1 }
 0x16c   : > { %3037 = vst.msk [vmem:[#allocation3 + $0x48] sm:$0xff] %vm736_vm7, %v3001_v62  ;;  %2401 = vst.msk [vmem:[#allocation3 + $0x90] sm:$0xff] %vm736_vm7, %v2365_v63  ;;  %v3006_v4 = vadd.f32 %v6661_v54, %v2970_v0  ;;  %v2363_v5 = vadd.f32 %v2327_v61, %v2232_v56  ;;  %v2336_v63 = vld [vmem:[#allocation3 + $0xc8] sm:$0xff] }
 0x16d   : > { %v6662_v39 = vpop.f32.mrf.mxu0  ;;  %v2968_v47 = vld [vmem:[#allocation3 + $0x60] sm:$0xff]  ;;  %v6628_v6 = vpop.f32.mrf.mxu1 }
 0x16e   : > { %3042 = vst.msk [vmem:[#allocation3 + $0x70] sm:$0xff] %vm736_vm7, %v3006_v4  ;;  %2399 = vst.msk [vmem:[#allocation3 + $0x80] sm:$0xff] %vm736_vm7, %v2363_v5  ;;  %v3004_v7 = vadd.f32 %v2968_v47, %v2861_v48  ;;  %v2366_v1 = vadd.f32 %v6628_v6, %v2330_v17  ;;  %v2341_v5 = vld [vmem:[#allocation3 + $0xf0] sm:$0xff] }
 0x16f   : > { %v2864_v8 = vpop.f32.mrf.mxu0  ;;  %v2971_v10 = vld [vmem:[#allocation3 + $0x78] sm:$0xff]  ;;  %v2235_v2 = vpop.f32.mrf.mxu1 }
 0x170   : > { %3040 = vst.msk [vmem:[#allocation3 + $0x60] sm:$0xff] %vm736_vm7, %v3004_v7  ;;  %2402 = vst.msk [vmem:[#allocation3 + $0x98] sm:$0xff] %vm736_vm7, %v2366_v1  ;;  %v3007_v12 = vadd.f32 %v6662_v39, %v2971_v10  ;;  %v2364_v13 = vadd.f32 %v2328_v11, %v2235_v2  ;;  %v2339_v1 = vld [vmem:[#allocation3 + $0xe0] sm:$0xff] }
 0x171   : > { %v6665_v15 = vpop.f32.mrf.mxu0  ;;  %v2969_v16 = vld [vmem:[#allocation3 + $0x68] sm:$0xff]  ;;  %v6631_v19 = vpop.f32.mrf.mxu1 }
 0x172   : > { %3043 = vst.msk [vmem:[#allocation3 + $0x78] sm:$0xff] %vm736_vm7, %v3007_v12  ;;  %2400 = vst.msk [vmem:[#allocation3 + $0x88] sm:$0xff] %vm736_vm7, %v2364_v13  ;;  %v3005_v21 = vadd.f32 %v2969_v16, %v2864_v8  ;;  %v2369_v22 = vadd.f32 %v6631_v19, %v2333_v20  ;;  %v2342_v13 = vld [vmem:[#allocation3 + $0xf8] sm:$0xff] }
 0x173   : > { %v2877_v9 = vpop.f32.mrf.mxu0  ;;  %v2974_v50 = vld [vmem:[#allocation3 + $0x90] sm:$0xff]  ;;  %v2248_v24 = vpop.f32.mrf.mxu1 }
 0x174   : > { %3041 = vst.msk [vmem:[#allocation3 + $0x68] sm:$0xff] %vm736_vm7, %v3005_v21  ;;  %2405 = vst.msk [vmem:[#allocation3 + $0xb0] sm:$0xff] %vm736_vm7, %v2369_v22  ;;  %v3010_v25 = vadd.f32 %v6665_v15, %v2974_v50  ;;  %v2367_v3 = vadd.f32 %v2331_v14, %v2248_v24  ;;  %v2340_v22 = vld [vmem:[#allocation3 + $0xe8] sm:$0xff] }
 0x175   : > { %v6666_v26 = vpop.f32.mrf.mxu0  ;;  %v2972_v28 = vld [vmem:[#allocation3 + $0x80] sm:$0xff]  ;;  %v6632_v29 = vpop.f32.mrf.mxu1 }
 0x176   : > { %3046 = vst.msk [vmem:[#allocation3 + $0x90] sm:$0xff] %vm736_vm7, %v3010_v25  ;;  %2403 = vst.msk [vmem:[#allocation3 + $0xa0] sm:$0xff] %vm736_vm7, %v2367_v3  ;;  %v3008_v60 = vadd.f32 %v2972_v28, %v2877_v9  ;;  %v2370_v36 = vadd.f32 %v6632_v29, %v2334_v27  ;;  %v2345_v3 = vld [vmem:[#allocation3 + $0x110] sm:$0xff] }
 0x177   : > { %v2880_v34 = vpop.f32.mrf.mxu0  ;;  %v2975_v30 = vld [vmem:[#allocation3 + $0x98] sm:$0xff]  ;;  %v2251_v23 = vpop.f32.mrf.mxu1 }
 0x178   : > { %3044 = vst.msk [vmem:[#allocation3 + $0x80] sm:$0xff] %vm736_vm7, %v3008_v60  ;;  %2406 = vst.msk [vmem:[#allocation3 + $0xb8] sm:$0xff] %vm736_vm7, %v2370_v36  ;;  %v3011_v33 = vadd.f32 %v6666_v26, %v2975_v30  ;;  %v2368_v32 = vadd.f32 %v2332_v31, %v2251_v23  ;;  %v2343_v36 = vld [vmem:[#allocation3 + $0x100] sm:$0xff] }
 0x179   : > { %v6669_v37 = vpop.f32.mrf.mxu0  ;;  %v2973_v38 = vld [vmem:[#allocation3 + $0x88] sm:$0xff]  ;;  %v6635_v41 = vpop.f32.mrf.mxu1 }
 0x17a   : > { %3047 = vst.msk [vmem:[#allocation3 + $0x98] sm:$0xff] %vm736_vm7, %v3011_v33  ;;  %2404 = vst.msk [vmem:[#allocation3 + $0xa8] sm:$0xff] %vm736_vm7, %v2368_v32  ;;  %v3009_v44 = vadd.f32 %v2973_v38, %v2880_v34  ;;  %v2373_v45 = vadd.f32 %v6635_v41, %v2337_v43  ;;  %v2346_v32 = vld [vmem:[#allocation3 + $0x118] sm:$0xff] }
 0x17b   : > { %v2893_v40 = vpop.f32.mrf.mxu0  ;;  %v2978_v46 = vld [vmem:[#allocation3 + $0xb0] sm:$0xff]  ;;  %v2264_v18 = vpop.f32.mrf.mxu1 }
 0x17c   : > { %3045 = vst.msk [vmem:[#allocation3 + $0x88] sm:$0xff] %vm736_vm7, %v3009_v44  ;;  %2409 = vst.msk [vmem:[#allocation3 + $0xd0] sm:$0xff] %vm736_vm7, %v2373_v45  ;;  %v3014_v52 = vadd.f32 %v6669_v37, %v2978_v46  ;;  %v2371_v53 = vadd.f32 %v2335_v51, %v2264_v18  ;;  %v2344_v45 = vld [vmem:[#allocation3 + $0x108] sm:$0xff] }
 0x17d   : > { %v6670_v55 = vpop.f32.mrf.mxu0  ;;  %v2976_v35 = vld [vmem:[#allocation3 + $0xa0] sm:$0xff]  ;;  %v6636_v42 = vpop.f32.mrf.mxu1 }
 0x17e   : > { %3050 = vst.msk [vmem:[#allocation3 + $0xb0] sm:$0xff] %vm736_vm7, %v3014_v52  ;;  %2407 = vst.msk [vmem:[#allocation3 + $0xc0] sm:$0xff] %vm736_vm7, %v2371_v53  ;;  %v3012_v54 = vadd.f32 %v2976_v35, %v2893_v40  ;;  %v2374_v58 = vadd.f32 %v6636_v42, %v2338_v57  ;;  %v3470_v53 = vld [vmem:[#allocation3 + $0x10] sm:$0xff] }
 0x17f   : > { %v2896_v49 = vpop.f32.mrf.mxu0  ;;  %v2979_v59 = vld [vmem:[#allocation3 + $0xb8] sm:$0xff]  ;;  %v2267_v62 = vpop.f32.mrf.mxu1 }
 0x180   : > { %3048 = vst.msk [vmem:[#allocation3 + $0xa0] sm:$0xff] %vm736_vm7, %v3012_v54  ;;  %2410 = vst.msk [vmem:[#allocation3 + $0xd8] sm:$0xff] %vm736_vm7, %v2374_v58  ;;  %v3015_v48 = vadd.f32 %v6670_v55, %v2979_v59  ;;  %v2372_v0 = vadd.f32 %v2336_v63, %v2267_v62  ;;  %v3468_v58 = vld [vmem:[#allocation3] sm:$0xff] }
 0x181   : > { %v6673_v56 = vpop.f32.mrf.mxu0  ;;  %v2977_v61 = vld [vmem:[#allocation3 + $0xa8] sm:$0xff]  ;;  %v6639_v4 = vpop.f32.mrf.mxu1 }
 0x182   : > { %3051 = vst.msk [vmem:[#allocation3 + $0xb8] sm:$0xff] %vm736_vm7, %v3015_v48  ;;  %2408 = vst.msk [vmem:[#allocation3 + $0xc8] sm:$0xff] %vm736_vm7, %v2372_v0  ;;  %v3013_v39 = vadd.f32 %v2977_v61, %v2896_v49  ;;  %v2377_v47 = vadd.f32 %v6639_v4, %v2341_v5  ;;  %v3471_v0 = vld [vmem:[#allocation3 + $0x18] sm:$0xff] }
 0x183   : > { %v2909_v6 = vpop.f32.mrf.mxu0  ;;  %v2982_v17 = vld [vmem:[#allocation3 + $0xd0] sm:$0xff]  ;;  %v2280_v7 = vpop.f32.mrf.mxu1 }
 0x184   : > { %3049 = vst.msk [vmem:[#allocation3 + $0xa8] sm:$0xff] %vm736_vm7, %v3013_v39  ;;  %2413 = vst.msk [vmem:[#allocation3 + $0xf0] sm:$0xff] %vm736_vm7, %v2377_v47  ;;  %v3018_v8 = vadd.f32 %v6673_v56, %v2982_v17  ;;  %v2375_v10 = vadd.f32 %v2339_v1, %v2280_v7  ;;  %v3469_v47 = vld [vmem:[#allocation3 + $0x8] sm:$0xff] }
 0x185   : > { %v6674_v2 = vpop.f32.mrf.mxu0  ;;  %v2980_v11 = vld [vmem:[#allocation3 + $0xc0] sm:$0xff]  ;;  %v6640_v12 = vpop.f32.mrf.mxu1 }
 0x186   : > { %3054 = vst.msk [vmem:[#allocation3 + $0xd0] sm:$0xff] %vm736_vm7, %v3018_v8  ;;  %2411 = vst.msk [vmem:[#allocation3 + $0xe0] sm:$0xff] %vm736_vm7, %v2375_v10  ;;  %v3016_v15 = vadd.f32 %v2980_v11, %v2909_v6  ;;  %v2378_v16 = vadd.f32 %v6640_v12, %v2342_v13  ;;  %v3474_v10 = vld [vmem:[#allocation3 + $0x30] sm:$0xff] }
 0x187   : > { %v2912_v19 = vpop.f32.mrf.mxu0  ;;  %v2983_v20 = vld [vmem:[#allocation3 + $0xd8] sm:$0xff]  ;;  %v2283_v21 = vpop.f32.mrf.mxu1 }
 0x188   : > { %3052 = vst.msk [vmem:[#allocation3 + $0xc0] sm:$0xff] %vm736_vm7, %v3016_v15  ;;  %2414 = vst.msk [vmem:[#allocation3 + $0xf8] sm:$0xff] %vm736_vm7, %v2378_v16  ;;  %v3019_v9 = vadd.f32 %v6674_v2, %v2983_v20  ;;  %v2376_v50 = vadd.f32 %v2340_v22, %v2283_v21  ;;  %v3472_v16 = vld [vmem:[#allocation3 + $0x20] sm:$0xff] }
 0x189   : > { %v6677_v24 = vpop.f32.mrf.mxu0  ;;  %v2981_v14 = vld [vmem:[#allocation3 + $0xc8] sm:$0xff]  ;;  %v6643_v25 = vpop.f32.mrf.mxu1 }
 0x18a   : > { %3055 = vst.msk [vmem:[#allocation3 + $0xd8] sm:$0xff] %vm736_vm7, %v3019_v9  ;;  %2412 = vst.msk [vmem:[#allocation3 + $0xe8] sm:$0xff] %vm736_vm7, %v2376_v50  ;;  %v3017_v26 = vadd.f32 %v2981_v14, %v2912_v19  ;;  %v2381_v28 = vadd.f32 %v6643_v25, %v2345_v3  ;;  %v3475_v50 = vld [vmem:[#allocation3 + $0x38] sm:$0xff] }
 0x18b   : > { %v2925_v29 = vpop.f32.mrf.mxu0  ;;  %v2986_v27 = vld [vmem:[#allocation3 + $0xf0] sm:$0xff]  ;;  %v2296_v60 = vpop.f32.mrf.mxu1 }
 0x18c   : > { %3053 = vst.msk [vmem:[#allocation3 + $0xc8] sm:$0xff] %vm736_vm7, %v3017_v26  ;;  %2417 = vst.msk [vmem:[#allocation3 + $0x110] sm:$0xff] %vm736_vm7, %v2381_v28  ;;  %v3022_v34 = vadd.f32 %v6677_v24, %v2986_v27  ;;  %v2379_v30 = vadd.f32 %v2343_v36, %v2296_v60  ;;  %v3473_v28 = vld [vmem:[#allocation3 + $0x28] sm:$0xff] }
 0x18d   : > { %v6678_v23 = vpop.f32.mrf.mxu0  ;;  %v2984_v31 = vld [vmem:[#allocation3 + $0xe0] sm:$0xff]  ;;  %v6644_v33 = vpop.f32.mrf.mxu1 }
 0x18e   : > { %3058 = vst.msk [vmem:[#allocation3 + $0xf0] sm:$0xff] %vm736_vm7, %v3022_v34  ;;  %2415 = vst.msk [vmem:[#allocation3 + $0x100] sm:$0xff] %vm736_vm7, %v2379_v30  ;;  %v3020_v37 = vadd.f32 %v2984_v31, %v2925_v29  ;;  %v2382_v38 = vadd.f32 %v6644_v33, %v2346_v32  ;;  %v3478_v30 = vld [vmem:[#allocation3 + $0x50] sm:$0xff] }
 0x18f   : > { %v2928_v41 = vpop.f32.mrf.mxu0  ;;  %v2987_v43 = vld [vmem:[#allocation3 + $0xf8] sm:$0xff]  ;;  %v2299_v44 = vpop.f32.mrf.mxu1 }
 0x190   : > { %3056 = vst.msk [vmem:[#allocation3 + $0xe0] sm:$0xff] %vm736_vm7, %v3020_v37  ;;  %2418 = vst.msk [vmem:[#allocation3 + $0x118] sm:$0xff] %vm736_vm7, %v2382_v38  ;;  %v3023_v40 = vadd.f32 %v6678_v23, %v2987_v43  ;;  %v2380_v46 = vadd.f32 %v2344_v45, %v2299_v44  ;;  %v3476_v38 = vld [vmem:[#allocation3 + $0x40] sm:$0xff] }
 0x191   : > { %v6681_v18 = vpop.f32.mrf.mxu0  ;;  %v2985_v51 = vld [vmem:[#allocation3 + $0xe8] sm:$0xff]  ;;  %v6687_v52 = vpop.f32.mrf.mxu1 }
 0x192   : > { %3059 = vst.msk [vmem:[#allocation3 + $0xf8] sm:$0xff] %vm736_vm7, %v3023_v40  ;;  %2416 = vst.msk [vmem:[#allocation3 + $0x108] sm:$0xff] %vm736_vm7, %v2380_v46  ;;  %v3021_v55 = vadd.f32 %v2985_v51, %v2928_v41  ;;  %v3506_v35 = vadd.f32 %v6687_v52, %v3470_v53  ;;  %v3479_v46 = vld [vmem:[#allocation3 + $0x58] sm:$0xff] }
 0x193   : > { %v2941_v42 = vpop.f32.mrf.mxu0  ;;  %v2990_v57 = vld [vmem:[#allocation3 + $0x110] sm:$0xff]  ;;  %v3325_v54 = vpop.f32.mrf.mxu1 }
 0x194   : > { %3057 = vst.msk [vmem:[#allocation3 + $0xe8] sm:$0xff] %vm736_vm7, %v3021_v55  ;;  %v3026_v49 = vadd.f32 %v6681_v18, %v2990_v57  ;;  %3542 = vst.msk [vmem:[#allocation3 + $0x10] sm:$0xff] %vm736_vm7, %v3506_v35  ;;  %v3504_v59 = vadd.f32 %v3468_v58, %v3325_v54  ;;  %v3477_v35 = vld [vmem:[#allocation3 + $0x48] sm:$0xff] }
 0x195   : > { %v6682_v62 = vpop.f32.mrf.mxu0  ;;  %v2988_v63 = vld [vmem:[#allocation3 + $0x100] sm:$0xff]  ;;  %v6688_v48 = vpop.f32.mrf.mxu1 }
 0x196   : > { %3062 = vst.msk [vmem:[#allocation3 + $0x110] sm:$0xff] %vm736_vm7, %v3026_v49  ;;  %v3024_v56 = vadd.f32 %v2988_v63, %v2941_v42  ;;  %3540 = vst.msk [vmem:[#allocation3] sm:$0xff] %vm736_vm7, %v3504_v59  ;;  %v3507_v61 = vadd.f32 %v6688_v48, %v3471_v0  ;;  %v3482_v59 = vld [vmem:[#allocation3 + $0x70] sm:$0xff] }
 0x197   : > { %v2944_v4 = vpop.f32.mrf.mxu0  ;;  %v2991_v5 = vld [vmem:[#allocation3 + $0x118] sm:$0xff]  ;;  %v3328_v39 = vpop.f32.mrf.mxu1 }
 0x198   : > { %3060 = vst.msk [vmem:[#allocation3 + $0x100] sm:$0xff] %vm736_vm7, %v3024_v56  ;;  %v3027_v6 = vadd.f32 %v6682_v62, %v2991_v5  ;;  %3543 = vst.msk [vmem:[#allocation3 + $0x18] sm:$0xff] %vm736_vm7, %v3507_v61  ;;  %v3505_v17 = vadd.f32 %v3469_v47, %v3328_v39  ;;  %v3480_v61 = vld [vmem:[#allocation3 + $0x60] sm:$0xff] }
 0x199   : > { %v6725_v7 = vpop.f32.mrf.mxu0  ;;  %v2989_v1 = vld [vmem:[#allocation3 + $0x108] sm:$0xff]  ;;  %v6691_v8 = vpop.f32.mrf.mxu1 }
 0x19a   : > { %3063 = vst.msk [vmem:[#allocation3 + $0x118] sm:$0xff] %vm736_vm7, %v3027_v6  ;;  %v3025_v2 = vadd.f32 %v2989_v1, %v2944_v4  ;;  %3541 = vst.msk [vmem:[#allocation3 + $0x8] sm:$0xff] %vm736_vm7, %v3505_v17  ;;  %v3510_v11 = vadd.f32 %v6691_v8, %v3474_v10  ;;  %v3483_v17 = vld [vmem:[#allocation3 + $0x78] sm:$0xff] }
 0x19b   : > { %v3836_v12 = vpop.f32.mrf.mxu0  ;;  %v3981_v13 = vld [vmem:[#allocation3 + $0x10] sm:$0xff]  ;;  %v3341_v15 = vpop.f32.mrf.mxu1 }
 0x19c   : > { %3061 = vst.msk [vmem:[#allocation3 + $0x108] sm:$0xff] %vm736_vm7, %v3025_v2  ;;  %3546 = vst.msk [vmem:[#allocation3 + $0x30] sm:$0xff] %vm736_vm7, %v3510_v11  ;;  %v4017_v19 = vadd.f32 %v6725_v7, %v3981_v13  ;;  %v3508_v20 = vadd.f32 %v3472_v16, %v3341_v15  ;;  %v3481_v11 = vld [vmem:[#allocation3 + $0x68] sm:$0xff] }
 0x19d   : > { %v6726_v21 = vpop.f32.mrf.mxu0  ;;  %v3979_v22 = vld [vmem:[#allocation3] sm:$0xff]  ;;  %v6692_v9 = vpop.f32.mrf.mxu1 }
 0x19e   : > { %4053 = vst.msk [vmem:[#allocation3 + $0x10] sm:$0xff] %vm736_vm7, %v4017_v19  ;;  %3544 = vst.msk [vmem:[#allocation3 + $0x20] sm:$0xff] %vm736_vm7, %v3508_v20  ;;  %v4015_v24 = vadd.f32 %v3979_v22, %v3836_v12  ;;  %v3511_v14 = vadd.f32 %v6692_v9, %v3475_v50  ;;  %v3486_v20 = vld [vmem:[#allocation3 + $0x90] sm:$0xff] }
 0x19f   : > { %v3839_v25 = vpop.f32.mrf.mxu0  ;;  %v3982_v3 = vld [vmem:[#allocation3 + $0x18] sm:$0xff]  ;;  %v3344_v26 = vpop.f32.mrf.mxu1 }
 0x1a0   : > { %4051 = vst.msk [vmem:[#allocation3] sm:$0xff] %vm736_vm7, %v4015_v24  ;;  %3547 = vst.msk [vmem:[#allocation3 + $0x38] sm:$0xff] %vm736_vm7, %v3511_v14  ;;  %v4018_v29 = vadd.f32 %v6726_v21, %v3982_v3  ;;  %v3509_v27 = vadd.f32 %v3473_v28, %v3344_v26  ;;  %v3484_v14 = vld [vmem:[#allocation3 + $0x80] sm:$0xff] }
 0x1a1   : > { %v6729_v60 = vpop.f32.mrf.mxu0  ;;  %v3980_v36 = vld [vmem:[#allocation3 + $0x8] sm:$0xff]  ;;  %v6695_v34 = vpop.f32.mrf.mxu1 }
 0x1a2   : > { %4054 = vst.msk [vmem:[#allocation3 + $0x18] sm:$0xff] %vm736_vm7, %v4018_v29  ;;  %3545 = vst.msk [vmem:[#allocation3 + $0x28] sm:$0xff] %vm736_vm7, %v3509_v27  ;;  %v4016_v23 = vadd.f32 %v3980_v36, %v3839_v25  ;;  %v3514_v31 = vadd.f32 %v6695_v34, %v3478_v30  ;;  %v3487_v27 = vld [vmem:[#allocation3 + $0x98] sm:$0xff] }
 0x1a3   : > { %v3852_v33 = vpop.f32.mrf.mxu0  ;;  %v3985_v32 = vld [vmem:[#allocation3 + $0x30] sm:$0xff]  ;;  %v3357_v37 = vpop.f32.mrf.mxu1 }
 0x1a4   : > { %4052 = vst.msk [vmem:[#allocation3 + $0x8] sm:$0xff] %vm736_vm7, %v4016_v23  ;;  %3550 = vst.msk [vmem:[#allocation3 + $0x50] sm:$0xff] %vm736_vm7, %v3514_v31  ;;  %v4021_v41 = vadd.f32 %v6729_v60, %v3985_v32  ;;  %v3512_v43 = vadd.f32 %v3476_v38, %v3357_v37  ;;  %v3485_v31 = vld [vmem:[#allocation3 + $0x88] sm:$0xff] }
 0x1a5   : > { %v6730_v44 = vpop.f32.mrf.mxu0  ;;  %v3983_v45 = vld [vmem:[#allocation3 + $0x20] sm:$0xff]  ;;  %v6696_v40 = vpop.f32.mrf.mxu1 }
 0x1a6   : > { %4057 = vst.msk [vmem:[#allocation3 + $0x30] sm:$0xff] %vm736_vm7, %v4021_v41  ;;  %3548 = vst.msk [vmem:[#allocation3 + $0x40] sm:$0xff] %vm736_vm7, %v3512_v43  ;;  %v4019_v18 = vadd.f32 %v3983_v45, %v3852_v33  ;;  %v3515_v51 = vadd.f32 %v6696_v40, %v3479_v46  ;;  %v3490_v43 = vld [vmem:[#allocation3 + $0xb0] sm:$0xff] }
 0x1a7   : > { %v3855_v52 = vpop.f32.mrf.mxu0  ;;  %v3986_v53 = vld [vmem:[#allocation3 + $0x38] sm:$0xff]  ;;  %v3360_v55 = vpop.f32.mrf.mxu1 }
 0x1a8   : > { %4055 = vst.msk [vmem:[#allocation3 + $0x20] sm:$0xff] %vm736_vm7, %v4019_v18  ;;  %3551 = vst.msk [vmem:[#allocation3 + $0x58] sm:$0xff] %vm736_vm7, %v3515_v51  ;;  %v4022_v42 = vadd.f32 %v6730_v44, %v3986_v53  ;;  %v3513_v57 = vadd.f32 %v3477_v35, %v3360_v55  ;;  %v3488_v51 = vld [vmem:[#allocation3 + $0xa0] sm:$0xff] }
 0x1a9   : > { %v6733_v54 = vpop.f32.mrf.mxu0  ;;  %v3984_v58 = vld [vmem:[#allocation3 + $0x28] sm:$0xff]  ;;  %v6699_v49 = vpop.f32.mrf.mxu1 }
 0x1aa   : > { %4058 = vst.msk [vmem:[#allocation3 + $0x38] sm:$0xff] %vm736_vm7, %v4022_v42  ;;  %3549 = vst.msk [vmem:[#allocation3 + $0x48] sm:$0xff] %vm736_vm7, %v3513_v57  ;;  %v4020_v62 = vadd.f32 %v3984_v58, %v3855_v52  ;;  %v3518_v63 = vadd.f32 %v6699_v49, %v3482_v59  ;;  %v3491_v57 = vld [vmem:[#allocation3 + $0xb8] sm:$0xff] }
 0x1ab   : > { %v3868_v48 = vpop.f32.mrf.mxu0  ;;  %v3989_v0 = vld [vmem:[#allocation3 + $0x50] sm:$0xff]  ;;  %v3373_v56 = vpop.f32.mrf.mxu1 }
 0x1ac   : > { %4056 = vst.msk [vmem:[#allocation3 + $0x28] sm:$0xff] %vm736_vm7, %v4020_v62  ;;  %3554 = vst.msk [vmem:[#allocation3 + $0x70] sm:$0xff] %vm736_vm7, %v3518_v63  ;;  %v4025_v4 = vadd.f32 %v6733_v54, %v3989_v0  ;;  %v3516_v5 = vadd.f32 %v3480_v61, %v3373_v56  ;;  %v3489_v63 = vld [vmem:[#allocation3 + $0xa8] sm:$0xff] }
 0x1ad   : > { %v6734_v39 = vpop.f32.mrf.mxu0  ;;  %v3987_v47 = vld [vmem:[#allocation3 + $0x40] sm:$0xff]  ;;  %v6700_v6 = vpop.f32.mrf.mxu1 }
 0x1ae   : > { %4061 = vst.msk [vmem:[#allocation3 + $0x50] sm:$0xff] %vm736_vm7, %v4025_v4  ;;  %3552 = vst.msk [vmem:[#allocation3 + $0x60] sm:$0xff] %vm736_vm7, %v3516_v5  ;;  %v4023_v7 = vadd.f32 %v3987_v47, %v3868_v48  ;;  %v3519_v1 = vadd.f32 %v6700_v6, %v3483_v17  ;;  %v3494_v5 = vld [vmem:[#allocation3 + $0xd0] sm:$0xff] }
 0x1af   : > { %v3871_v8 = vpop.f32.mrf.mxu0  ;;  %v3990_v10 = vld [vmem:[#allocation3 + $0x58] sm:$0xff]  ;;  %v3376_v2 = vpop.f32.mrf.mxu1 }
 0x1b0   : > { %4059 = vst.msk [vmem:[#allocation3 + $0x40] sm:$0xff] %vm736_vm7, %v4023_v7  ;;  %3555 = vst.msk [vmem:[#allocation3 + $0x78] sm:$0xff] %vm736_vm7, %v3519_v1  ;;  %v4026_v12 = vadd.f32 %v6734_v39, %v3990_v10  ;;  %v3517_v13 = vadd.f32 %v3481_v11, %v3376_v2  ;;  %v3492_v1 = vld [vmem:[#allocation3 + $0xc0] sm:$0xff] }
 0x1b1   : > { %v6737_v15 = vpop.f32.mrf.mxu0  ;;  %v3988_v16 = vld [vmem:[#allocation3 + $0x48] sm:$0xff]  ;;  %v6703_v19 = vpop.f32.mrf.mxu1 }
 0x1b2   : > { %4062 = vst.msk [vmem:[#allocation3 + $0x58] sm:$0xff] %vm736_vm7, %v4026_v12  ;;  %3553 = vst.msk [vmem:[#allocation3 + $0x68] sm:$0xff] %vm736_vm7, %v3517_v13  ;;  %v4024_v21 = vadd.f32 %v3988_v16, %v3871_v8  ;;  %v3522_v22 = vadd.f32 %v6703_v19, %v3486_v20  ;;  %v3495_v13 = vld [vmem:[#allocation3 + $0xd8] sm:$0xff] }
 0x1b3   : > { %v3884_v9 = vpop.f32.mrf.mxu0  ;;  %v3993_v50 = vld [vmem:[#allocation3 + $0x70] sm:$0xff]  ;;  %v3389_v24 = vpop.f32.mrf.mxu1 }
 0x1b4   : > { %4060 = vst.msk [vmem:[#allocation3 + $0x48] sm:$0xff] %vm736_vm7, %v4024_v21  ;;  %3558 = vst.msk [vmem:[#allocation3 + $0x90] sm:$0xff] %vm736_vm7, %v3522_v22  ;;  %v4029_v25 = vadd.f32 %v6737_v15, %v3993_v50  ;;  %v3520_v3 = vadd.f32 %v3484_v14, %v3389_v24  ;;  %v3493_v22 = vld [vmem:[#allocation3 + $0xc8] sm:$0xff] }
 0x1b5   : > { %v6738_v26 = vpop.f32.mrf.mxu0  ;;  %v3991_v28 = vld [vmem:[#allocation3 + $0x60] sm:$0xff]  ;;  %v6704_v29 = vpop.f32.mrf.mxu1 }
 0x1b6   : > { %4065 = vst.msk [vmem:[#allocation3 + $0x70] sm:$0xff] %vm736_vm7, %v4029_v25  ;;  %3556 = vst.msk [vmem:[#allocation3 + $0x80] sm:$0xff] %vm736_vm7, %v3520_v3  ;;  %v4027_v60 = vadd.f32 %v3991_v28, %v3884_v9  ;;  %v3523_v36 = vadd.f32 %v6704_v29, %v3487_v27  ;;  %v3498_v3 = vld [vmem:[#allocation3 + $0xf0] sm:$0xff] }
 0x1b7   : > { %v3887_v34 = vpop.f32.mrf.mxu0  ;;  %v3994_v30 = vld [vmem:[#allocation3 + $0x78] sm:$0xff]  ;;  %v3392_v23 = vpop.f32.mrf.mxu1 }
 0x1b8   : > { %4063 = vst.msk [vmem:[#allocation3 + $0x60] sm:$0xff] %vm736_vm7, %v4027_v60  ;;  %3559 = vst.msk [vmem:[#allocation3 + $0x98] sm:$0xff] %vm736_vm7, %v3523_v36  ;;  %v4030_v33 = vadd.f32 %v6738_v26, %v3994_v30  ;;  %v3521_v32 = vadd.f32 %v3485_v31, %v3392_v23  ;;  %v3496_v36 = vld [vmem:[#allocation3 + $0xe0] sm:$0xff] }
 0x1b9   : > { %v6741_v37 = vpop.f32.mrf.mxu0  ;;  %v3992_v38 = vld [vmem:[#allocation3 + $0x68] sm:$0xff]  ;;  %v6707_v41 = vpop.f32.mrf.mxu1 }
 0x1ba   : > { %4066 = vst.msk [vmem:[#allocation3 + $0x78] sm:$0xff] %vm736_vm7, %v4030_v33  ;;  %3557 = vst.msk [vmem:[#allocation3 + $0x88] sm:$0xff] %vm736_vm7, %v3521_v32  ;;  %v4028_v44 = vadd.f32 %v3992_v38, %v3887_v34  ;;  %v3526_v45 = vadd.f32 %v6707_v41, %v3490_v43  ;;  %v3499_v32 = vld [vmem:[#allocation3 + $0xf8] sm:$0xff] }
 0x1bb   : > { %v3900_v40 = vpop.f32.mrf.mxu0  ;;  %v3997_v46 = vld [vmem:[#allocation3 + $0x90] sm:$0xff]  ;;  %v3405_v18 = vpop.f32.mrf.mxu1 }
 0x1bc   : > { %4064 = vst.msk [vmem:[#allocation3 + $0x68] sm:$0xff] %vm736_vm7, %v4028_v44  ;;  %3562 = vst.msk [vmem:[#allocation3 + $0xb0] sm:$0xff] %vm736_vm7, %v3526_v45  ;;  %v4033_v52 = vadd.f32 %v6741_v37, %v3997_v46  ;;  %v3524_v53 = vadd.f32 %v3488_v51, %v3405_v18  ;;  %v3497_v45 = vld [vmem:[#allocation3 + $0xe8] sm:$0xff] }
 0x1bd   : > { %v6742_v55 = vpop.f32.mrf.mxu0  ;;  %v3995_v35 = vld [vmem:[#allocation3 + $0x80] sm:$0xff]  ;;  %v6708_v42 = vpop.f32.mrf.mxu1 }
 0x1be   : > { %4069 = vst.msk [vmem:[#allocation3 + $0x90] sm:$0xff] %vm736_vm7, %v4033_v52  ;;  %3560 = vst.msk [vmem:[#allocation3 + $0xa0] sm:$0xff] %vm736_vm7, %v3524_v53  ;;  %v4031_v54 = vadd.f32 %v3995_v35, %v3900_v40  ;;  %v3527_v58 = vadd.f32 %v6708_v42, %v3491_v57  ;;  %v3502_v53 = vld [vmem:[#allocation3 + $0x110] sm:$0xff] }
 0x1bf   : > { %v3903_v49 = vpop.f32.mrf.mxu0  ;;  %v3998_v59 = vld [vmem:[#allocation3 + $0x98] sm:$0xff]  ;;  %v3408_v62 = vpop.f32.mrf.mxu1 }
 0x1c0   : > { %4067 = vst.msk [vmem:[#allocation3 + $0x80] sm:$0xff] %vm736_vm7, %v4031_v54  ;;  %3563 = vst.msk [vmem:[#allocation3 + $0xb8] sm:$0xff] %vm736_vm7, %v3527_v58  ;;  %v4034_v48 = vadd.f32 %v6742_v55, %v3998_v59  ;;  %v3525_v0 = vadd.f32 %v3489_v63, %v3408_v62  ;;  %v3500_v58 = vld [vmem:[#allocation3 + $0x100] sm:$0xff] }
 0x1c1   : > { %v6745_v56 = vpop.f32.mrf.mxu0  ;;  %v3996_v61 = vld [vmem:[#allocation3 + $0x88] sm:$0xff]  ;;  %v6711_v4 = vpop.f32.mrf.mxu1 }
 0x1c2   : > { %4070 = vst.msk [vmem:[#allocation3 + $0x98] sm:$0xff] %vm736_vm7, %v4034_v48  ;;  %3561 = vst.msk [vmem:[#allocation3 + $0xa8] sm:$0xff] %vm736_vm7, %v3525_v0  ;;  %v4032_v39 = vadd.f32 %v3996_v61, %v3903_v49  ;;  %v3530_v47 = vadd.f32 %v6711_v4, %v3494_v5  ;;  %v3503_v0 = vld [vmem:[#allocation3 + $0x118] sm:$0xff] }
 0x1c3   : > { %v3916_v6 = vpop.f32.mrf.mxu0  ;;  %v4001_v17 = vld [vmem:[#allocation3 + $0xb0] sm:$0xff]  ;;  %v3421_v7 = vpop.f32.mrf.mxu1 }
 0x1c4   : > { %4068 = vst.msk [vmem:[#allocation3 + $0x88] sm:$0xff] %vm736_vm7, %v4032_v39  ;;  %3566 = vst.msk [vmem:[#allocation3 + $0xd0] sm:$0xff] %vm736_vm7, %v3530_v47  ;;  %v4037_v8 = vadd.f32 %v6745_v56, %v4001_v17  ;;  %v3528_v10 = vadd.f32 %v3492_v1, %v3421_v7  ;;  %v3501_v47 = vld [vmem:[#allocation3 + $0x108] sm:$0xff] }
 0x1c5   : > { %v6746_v2 = vpop.f32.mrf.mxu0  ;;  %v3999_v11 = vld [vmem:[#allocation3 + $0xa0] sm:$0xff]  ;;  %v6712_v12 = vpop.f32.mrf.mxu1 }
 0x1c6   : > { %4073 = vst.msk [vmem:[#allocation3 + $0xb0] sm:$0xff] %vm736_vm7, %v4037_v8  ;;  %3564 = vst.msk [vmem:[#allocation3 + $0xc0] sm:$0xff] %vm736_vm7, %v3528_v10  ;;  %v4035_v15 = vadd.f32 %v3999_v11, %v3916_v6  ;;  %v3531_v16 = vadd.f32 %v6712_v12, %v3495_v13  ;;  %v4626_v10 = vld [vmem:[#allocation3 + $0x10] sm:$0xff] }
 0x1c7   : > { %v3919_v19 = vpop.f32.mrf.mxu0  ;;  %v4002_v20 = vld [vmem:[#allocation3 + $0xb8] sm:$0xff]  ;;  %v3424_v21 = vpop.f32.mrf.mxu1 }
 0x1c8   : > { %4071 = vst.msk [vmem:[#allocation3 + $0xa0] sm:$0xff] %vm736_vm7, %v4035_v15  ;;  %3567 = vst.msk [vmem:[#allocation3 + $0xd8] sm:$0xff] %vm736_vm7, %v3531_v16  ;;  %v4038_v9 = vadd.f32 %v6746_v2, %v4002_v20  ;;  %v3529_v50 = vadd.f32 %v3493_v22, %v3424_v21  ;;  %v4624_v16 = vld [vmem:[#allocation3] sm:$0xff] }
 0x1c9   : > { %v6749_v24 = vpop.f32.mrf.mxu0  ;;  %v4000_v14 = vld [vmem:[#allocation3 + $0xa8] sm:$0xff]  ;;  %v6715_v25 = vpop.f32.mrf.mxu1 }
 0x1ca   : > { %4074 = vst.msk [vmem:[#allocation3 + $0xb8] sm:$0xff] %vm736_vm7, %v4038_v9  ;;  %3565 = vst.msk [vmem:[#allocation3 + $0xc8] sm:$0xff] %vm736_vm7, %v3529_v50  ;;  %v4036_v26 = vadd.f32 %v4000_v14, %v3919_v19  ;;  %v3534_v28 = vadd.f32 %v6715_v25, %v3498_v3  ;;  %v4627_v50 = vld [vmem:[#allocation3 + $0x18] sm:$0xff] }
 0x1cb   : > { %v3932_v29 = vpop.f32.mrf.mxu0  ;;  %v4005_v27 = vld [vmem:[#allocation3 + $0xd0] sm:$0xff]  ;;  %v3437_v60 = vpop.f32.mrf.mxu1 }
 0x1cc   : > { %4072 = vst.msk [vmem:[#allocation3 + $0xa8] sm:$0xff] %vm736_vm7, %v4036_v26  ;;  %3570 = vst.msk [vmem:[#allocation3 + $0xf0] sm:$0xff] %vm736_vm7, %v3534_v28  ;;  %v4041_v34 = vadd.f32 %v6749_v24, %v4005_v27  ;;  %v3532_v30 = vadd.f32 %v3496_v36, %v3437_v60  ;;  %v4625_v28 = vld [vmem:[#allocation3 + $0x8] sm:$0xff] }
 0x1cd   : > { %v6750_v23 = vpop.f32.mrf.mxu0  ;;  %v4003_v31 = vld [vmem:[#allocation3 + $0xc0] sm:$0xff]  ;;  %v6716_v33 = vpop.f32.mrf.mxu1 }
 0x1ce   : > { %4077 = vst.msk [vmem:[#allocation3 + $0xd0] sm:$0xff] %vm736_vm7, %v4041_v34  ;;  %3568 = vst.msk [vmem:[#allocation3 + $0xe0] sm:$0xff] %vm736_vm7, %v3532_v30  ;;  %v4039_v37 = vadd.f32 %v4003_v31, %v3932_v29  ;;  %v3535_v38 = vadd.f32 %v6716_v33, %v3499_v32  ;;  %v4630_v30 = vld [vmem:[#allocation3 + $0x30] sm:$0xff] }
 0x1cf   : > { %v3935_v41 = vpop.f32.mrf.mxu0  ;;  %v4006_v43 = vld [vmem:[#allocation3 + $0xd8] sm:$0xff]  ;;  %v3440_v44 = vpop.f32.mrf.mxu1 }
 0x1d0   : > { %4075 = vst.msk [vmem:[#allocation3 + $0xc0] sm:$0xff] %vm736_vm7, %v4039_v37  ;;  %3571 = vst.msk [vmem:[#allocation3 + $0xf8] sm:$0xff] %vm736_vm7, %v3535_v38  ;;  %v4042_v40 = vadd.f32 %v6750_v23, %v4006_v43  ;;  %v3533_v46 = vadd.f32 %v3497_v45, %v3440_v44  ;;  %v4628_v38 = vld [vmem:[#allocation3 + $0x20] sm:$0xff] }
 0x1d1   : > { %v6753_v18 = vpop.f32.mrf.mxu0  ;;  %v4004_v51 = vld [vmem:[#allocation3 + $0xc8] sm:$0xff]  ;;  %v6719_v52 = vpop.f32.mrf.mxu1 }
 0x1d2   : > { %4078 = vst.msk [vmem:[#allocation3 + $0xd8] sm:$0xff] %vm736_vm7, %v4042_v40  ;;  %3569 = vst.msk [vmem:[#allocation3 + $0xe8] sm:$0xff] %vm736_vm7, %v3533_v46  ;;  %v4040_v55 = vadd.f32 %v4004_v51, %v3935_v41  ;;  %v3538_v35 = vadd.f32 %v6719_v52, %v3502_v53  ;;  %v4631_v46 = vld [vmem:[#allocation3 + $0x38] sm:$0xff] }
 0x1d3   : > { %v3948_v42 = vpop.f32.mrf.mxu0  ;;  %v4009_v57 = vld [vmem:[#allocation3 + $0xf0] sm:$0xff]  ;;  %v3453_v54 = vpop.f32.mrf.mxu1 }
 0x1d4   : > { %4076 = vst.msk [vmem:[#allocation3 + $0xc8] sm:$0xff] %vm736_vm7, %v4040_v55  ;;  %3574 = vst.msk [vmem:[#allocation3 + $0x110] sm:$0xff] %vm736_vm7, %v3538_v35  ;;  %v4045_v49 = vadd.f32 %v6753_v18, %v4009_v57  ;;  %v3536_v59 = vadd.f32 %v3500_v58, %v3453_v54  ;;  %v4629_v35 = vld [vmem:[#allocation3 + $0x28] sm:$0xff] }
 0x1d5   : > { %v6754_v62 = vpop.f32.mrf.mxu0  ;;  %v4007_v63 = vld [vmem:[#allocation3 + $0xe0] sm:$0xff]  ;;  %v6720_v48 = vpop.f32.mrf.mxu1 }
 0x1d6   : > { %4081 = vst.msk [vmem:[#allocation3 + $0xf0] sm:$0xff] %vm736_vm7, %v4045_v49  ;;  %3572 = vst.msk [vmem:[#allocation3 + $0x100] sm:$0xff] %vm736_vm7, %v3536_v59  ;;  %v4043_v56 = vadd.f32 %v4007_v63, %v3948_v42  ;;  %v3539_v61 = vadd.f32 %v6720_v48, %v3503_v0  ;;  %v4634_v59 = vld [vmem:[#allocation3 + $0x50] sm:$0xff]  ;;  %v8152_v0 = vld [vmem:[%s8504_s3] ss:$0 sm:$0xff] }
 0x1d7   : > { %v3951_v4 = vpop.f32.mrf.mxu0  ;;  %v4010_v5 = vld [vmem:[#allocation3 + $0xf8] sm:$0xff]  ;;  %v3456_v39 = vpop.f32.mrf.mxu1 }
 0x1d8   : > { %4079 = vst.msk [vmem:[#allocation3 + $0xe0] sm:$0xff] %vm736_vm7, %v4043_v56  ;;  %3575 = vst.msk [vmem:[#allocation3 + $0x118] sm:$0xff] %vm736_vm7, %v3539_v61  ;;  %v4046_v6 = vadd.f32 %v6754_v62, %v4010_v5  ;;  %v3537_v17 = vadd.f32 %v3501_v47, %v3456_v39 }
 0x1d9   : > { %v6757_v7 = vpop.f32.mrf.mxu0  ;;  %v4008_v1 = vld [vmem:[#allocation3 + $0xe8] sm:$0xff]  ;;  %v6763_v8 = vpop.f32.mrf.mxu1 }
 0x1da   : > { %4082 = vst.msk [vmem:[#allocation3 + $0xf8] sm:$0xff] %vm736_vm7, %v4046_v6  ;;  %3573 = vst.msk [vmem:[#allocation3 + $0x108] sm:$0xff] %vm736_vm7, %v3537_v17  ;;  %v4044_v2 = vadd.f32 %v4008_v1, %v3951_v4  ;;  %v4662_v11 = vadd.f32 %v6763_v8, %v4626_v10  ;;  %v4632_v4 = vld [vmem:[#allocation3 + $0x40] sm:$0xff]  ;;  %v4635_v1 = vld [vmem:[#allocation3 + $0x58] sm:$0xff] }
 0x1db   : > { %v3964_v12 = vpop.f32.mrf.mxu0  ;;  %v4013_v13 = vld [vmem:[#allocation3 + $0x110] sm:$0xff]  ;;  %v4481_v15 = vpop.f32.mrf.mxu1 }
 0x1dc   : > { %4080 = vst.msk [vmem:[#allocation3 + $0xe8] sm:$0xff] %vm736_vm7, %v4044_v2  ;;  %v4049_v19 = vadd.f32 %v6757_v7, %v4013_v13  ;;  %4698 = vst.msk [vmem:[#allocation3 + $0x10] sm:$0xff] %vm736_vm7, %v4662_v11  ;;  %v4660_v20 = vadd.f32 %v4624_v16, %v4481_v15  ;;  %v4633_v16 = vld [vmem:[#allocation3 + $0x48] sm:$0xff] }
 0x1dd   : > { %v6758_v21 = vpop.f32.mrf.mxu0  ;;  %v4011_v22 = vld [vmem:[#allocation3 + $0x100] sm:$0xff]  ;;  %v6764_v9 = vpop.f32.mrf.mxu1 }
 0x1de   : > { %4085 = vst.msk [vmem:[#allocation3 + $0x110] sm:$0xff] %vm736_vm7, %v4049_v19  ;;  %v4047_v24 = vadd.f32 %v4011_v22, %v3964_v12  ;;  %4696 = vst.msk [vmem:[#allocation3] sm:$0xff] %vm736_vm7, %v4660_v20  ;;  %v4663_v14 = vadd.f32 %v6764_v9, %v4627_v50 }
 0x1df   : > { %v3967_v25 = vpop.f32.mrf.mxu0  ;;  %v4014_v3 = vld [vmem:[#allocation3 + $0x118] sm:$0xff]  ;;  %v4484_v26 = vpop.f32.mrf.mxu1 }
 0x1e0   : > { %4083 = vst.msk [vmem:[#allocation3 + $0x100] sm:$0xff] %vm736_vm7, %v4047_v24  ;;  %v4050_v29 = vadd.f32 %v6758_v21, %v4014_v3  ;;  %4699 = vst.msk [vmem:[#allocation3 + $0x18] sm:$0xff] %vm736_vm7, %v4663_v14  ;;  %v4661_v27 = vadd.f32 %v4625_v28, %v4484_v26  ;;  %v4638_v28 = vld [vmem:[#allocation3 + $0x70] sm:$0xff] }
 0x1e1   : > { %v6801_v60 = vpop.f32.mrf.mxu0  ;;  %v4012_v36 = vld [vmem:[#allocation3 + $0x108] sm:$0xff]  ;;  %v6767_v34 = vpop.f32.mrf.mxu1 }
 0x1e2   : > { %4086 = vst.msk [vmem:[#allocation3 + $0x118] sm:$0xff] %vm736_vm7, %v4050_v29  ;;  %v4048_v23 = vadd.f32 %v4012_v36, %v3967_v25  ;;  %4697 = vst.msk [vmem:[#allocation3 + $0x8] sm:$0xff] %vm736_vm7, %v4661_v27  ;;  %v4666_v31 = vadd.f32 %v6767_v34, %v4630_v30 }
 0x1e3   : > { %v4993_v33 = vpop.f32.mrf.mxu0  ;;  %v5138_v32 = vld [vmem:[#allocation3 + $0x10] sm:$0xff]  ;;  %v4497_v37 = vpop.f32.mrf.mxu1 }
 0x1e4   : > { %4084 = vst.msk [vmem:[#allocation3 + $0x108] sm:$0xff] %vm736_vm7, %v4048_v23  ;;  %4702 = vst.msk [vmem:[#allocation3 + $0x30] sm:$0xff] %vm736_vm7, %v4666_v31  ;;  %v5174_v41 = vadd.f32 %v6801_v60, %v5138_v32  ;;  %v4664_v43 = vadd.f32 %v4628_v38, %v4497_v37 }
 0x1e5   : > { %v6802_v44 = vpop.f32.mrf.mxu0  ;;  %v5136_v45 = vld [vmem:[#allocation3] sm:$0xff]  ;;  %v6768_v40 = vpop.f32.mrf.mxu1 }
 0x1e6   : > { %5210 = vst.msk [vmem:[#allocation3 + $0x10] sm:$0xff] %vm736_vm7, %v5174_v41  ;;  %4700 = vst.msk [vmem:[#allocation3 + $0x20] sm:$0xff] %vm736_vm7, %v4664_v43  ;;  %v5172_v18 = vadd.f32 %v5136_v45, %v4993_v33  ;;  %v4667_v51 = vadd.f32 %v6768_v40, %v4631_v46  ;;  %v4636_v33 = vld [vmem:[#allocation3 + $0x60] sm:$0xff]  ;;  %v4639_v46 = vld [vmem:[#allocation3 + $0x78] sm:$0xff] }
 0x1e7   : > { %v4996_v52 = vpop.f32.mrf.mxu0  ;;  %v5139_v53 = vld [vmem:[#allocation3 + $0x18] sm:$0xff]  ;;  %v4500_v55 = vpop.f32.mrf.mxu1 }
 0x1e8   : > { %5208 = vst.msk [vmem:[#allocation3] sm:$0xff] %vm736_vm7, %v5172_v18  ;;  %4703 = vst.msk [vmem:[#allocation3 + $0x38] sm:$0xff] %vm736_vm7, %v4667_v51  ;;  %v5175_v42 = vadd.f32 %v6802_v44, %v5139_v53  ;;  %v4665_v57 = vadd.f32 %v4629_v35, %v4500_v55 }
 0x1e9   : > { %v6805_v54 = vpop.f32.mrf.mxu0  ;;  %v5137_v58 = vld [vmem:[#allocation3 + $0x8] sm:$0xff]  ;;  %v6771_v49 = vpop.f32.mrf.mxu1 }
 0x1ea   : > { %5211 = vst.msk [vmem:[#allocation3 + $0x18] sm:$0xff] %vm736_vm7, %v5175_v42  ;;  %4701 = vst.msk [vmem:[#allocation3 + $0x28] sm:$0xff] %vm736_vm7, %v4665_v57  ;;  %v5173_v62 = vadd.f32 %v5137_v58, %v4996_v52  ;;  %v4670_v63 = vadd.f32 %v6771_v49, %v4634_v59 }
 0x1eb   : > { %v5009_v48 = vpop.f32.mrf.mxu0  ;;  %v5142_v56 = vld [vmem:[#allocation3 + $0x30] sm:$0xff]  ;;  %v4513_v61 = vpop.f32.mrf.mxu1 }
 0x1ec   : > { %5209 = vst.msk [vmem:[#allocation3 + $0x8] sm:$0xff] %vm736_vm7, %v5173_v62  ;;  %4706 = vst.msk [vmem:[#allocation3 + $0x50] sm:$0xff] %vm736_vm7, %v4670_v63  ;;  %v5178_v5 = vadd.f32 %v6805_v54, %v5142_v56  ;;  %v4668_v39 = vadd.f32 %v4632_v4, %v4513_v61  ;;  %v4637_v54 = vld [vmem:[#allocation3 + $0x68] sm:$0xff]  ;;  %v4642_v4 = vld [vmem:[#allocation3 + $0x90] sm:$0xff] }
 0x1ed   : > { %v6806_v47 = vpop.f32.mrf.mxu0  ;;  %v5246_v6 = vld [vmem:[#allocation3 + $0x10] sm:$0xff]  ;;  %v5140_v17 = vld [vmem:[#allocation3 + $0x20] sm:$0xff]  ;;  %v6772_v7 = vpop.f32.mrf.mxu1 }
 0x1ee   : > { %v8157_v8 = vadd.f32 %v8152_v0, %v5246_v6  ;;  %5214 = vst.msk [vmem:[#allocation3 + $0x30] sm:$0xff] %vm736_vm7, %v5178_v5  ;;  %4704 = vst.msk [vmem:[#allocation3 + $0x40] sm:$0xff] %vm736_vm7, %v4668_v39  ;;  %v5176_v10 = vadd.f32 %v5140_v17, %v5009_v48  ;;  %v4671_v2 = vadd.f32 %v6772_v7, %v4635_v1  ;;  %v4640_v17 = vld [vmem:[#allocation3 + $0x80] sm:$0xff] }
 0x1ef   : > { %v5012_v11 = vpop.f32.mrf.mxu0  ;;  %v5244_v12 = vld [vmem:[#allocation3] sm:$0xff]  ;;  %v5143_v13 = vld [vmem:[#allocation3 + $0x38] sm:$0xff]  ;;  %v4516_v15 = vpop.f32.mrf.mxu1 }
 0x1f0   : > { %v6212_v19 = vmul.f32 -1.442695, %v8157_v8  ;;  %v8163_v20 = vadd.f32 %v8152_v0, %v5244_v12  ;;  %5212 = vst.msk [vmem:[#allocation3 + $0x20] sm:$0xff] %vm736_vm7, %v5176_v10  ;;  %4707 = vst.msk [vmem:[#allocation3 + $0x58] sm:$0xff] %vm736_vm7, %v4671_v2  ;;  %v5179_v21 = vadd.f32 %v6806_v47, %v5143_v13  ;;  %v4669_v22 = vadd.f32 %v4633_v16, %v4516_v15  ;;  %v4643_v16 = vld [vmem:[#allocation3 + $0x98] sm:$0xff] }
 0x1f1   : > { %v6809_v9 = vpop.f32.mrf.mxu0  ;;  %v5247_v50 = vld [vmem:[#allocation3 + $0x18] sm:$0xff]  ;;  %v5141_v24 = vld [vmem:[#allocation3 + $0x28] sm:$0xff]  ;;  %v6775_v14 = vpop.f32.mrf.mxu1 }
 0x1f2   : > { %7045 = vpow2.f32 %v6212_v19  ;;  %v6210_v25 = vmul.f32 -1.442695, %v8163_v20  ;;  %v8169_v3 = vadd.f32 %v8152_v0, %v5247_v50  ;;  %5215 = vst.msk [vmem:[#allocation3 + $0x38] sm:$0xff] %vm736_vm7, %v5179_v21  ;;  %4705 = vst.msk [vmem:[#allocation3 + $0x48] sm:$0xff] %vm736_vm7, %v4669_v22  ;;  %v5177_v26 = vadd.f32 %v5141_v24, %v5012_v11 }
 0x1f3   : > { %v5025_v29 = vpop.f32.mrf.mxu0  ;;  %v5245_v27 = vld [vmem:[#allocation3 + $0x8] sm:$0xff]  ;;  %v4674_v60 = vadd.f32 %v6775_v14, %v4638_v28  ;;  %v5146_v36 = vld [vmem:[#allocation3 + $0x50] sm:$0xff]  ;;  %v4529_v34 = vpop.f32.mrf.mxu1 }
 0x1f4   : > { %7047 = vpow2.f32 %v6210_v25  ;;  %v6213_v30 = vmul.f32 -1.442695, %v8169_v3  ;;  %v8175_v23 = vadd.f32 %v8152_v0, %v5245_v27  ;;  %5213 = vst.msk [vmem:[#allocation3 + $0x28] sm:$0xff] %vm736_vm7, %v5177_v26  ;;  %v5182_v31 = vadd.f32 %v6809_v9, %v5146_v36  ;;  %v4641_v36 = vld [vmem:[#allocation3 + $0x88] sm:$0xff] }
 0x1f5   : > { %v6810_v32 = vpop.f32.mrf.mxu0  ;;  %v5250_v37 = vld [vmem:[#allocation3 + $0x30] sm:$0xff]  ;;  %4710 = vst.msk [vmem:[#allocation3 + $0x70] sm:$0xff] %vm736_vm7, %v4674_v60  ;;  %v4672_v38 = vadd.f32 %v4636_v33, %v4529_v34  ;;  %v5144_v41 = vld [vmem:[#allocation3 + $0x40] sm:$0xff]  ;;  %v6776_v43 = vpop.f32.mrf.mxu1 }
 0x1f6   : > { %7049 = vpow2.f32 %v6213_v30  ;;  %v6211_v44 = vmul.f32 -1.442695, %v8175_v23  ;;  %v8181_v45 = vadd.f32 %v8152_v0, %v5250_v37  ;;  %5218 = vst.msk [vmem:[#allocation3 + $0x50] sm:$0xff] %vm736_vm7, %v5182_v31  ;;  %v5180_v40 = vadd.f32 %v5144_v41, %v5025_v29 }
 0x1f7   : > { %v5028_v18 = vpop.f32.mrf.mxu0  ;;  %v5248_v51 = vld [vmem:[#allocation3 + $0x20] sm:$0xff]  ;;  %4708 = vst.msk [vmem:[#allocation3 + $0x60] sm:$0xff] %vm736_vm7, %v4672_v38  ;;  %v4675_v52 = vadd.f32 %v6776_v43, %v4639_v46  ;;  %v5147_v53 = vld [vmem:[#allocation3 + $0x58] sm:$0xff]  ;;  %v4532_v55 = vpop.f32.mrf.mxu1 }
 0x1f8   : > { %7051 = vpow2.f32 %v6211_v44  ;;  %v6216_v35 = vmul.f32 -1.442695, %v8181_v45  ;;  %v8187_v42 = vadd.f32 %v8152_v0, %v5248_v51  ;;  %5216 = vst.msk [vmem:[#allocation3 + $0x40] sm:$0xff] %vm736_vm7, %v5180_v40  ;;  %v5183_v57 = vadd.f32 %v6810_v32, %v5147_v53  ;;  %v4646_v40 = vld [vmem:[#allocation3 + $0xb0] sm:$0xff] }
 0x1f9   : > { %v6813_v58 = vpop.f32.mrf.mxu0  ;;  %v5251_v49 = vld [vmem:[#allocation3 + $0x38] sm:$0xff]  ;;  %4711 = vst.msk [vmem:[#allocation3 + $0x78] sm:$0xff] %vm736_vm7, %v4675_v52  ;;  %v4673_v59 = vadd.f32 %v4637_v54, %v4532_v55  ;;  %v5145_v62 = vld [vmem:[#allocation3 + $0x48] sm:$0xff]  ;;  %v6779_v63 = vpop.f32.mrf.mxu1 }
 0x1fa   : > { %7053 = vpow2.f32 %v6216_v35  ;;  %v6214_v48 = vmul.f32 -1.442695, %v8187_v42  ;;  %v8193_v56 = vadd.f32 %v8152_v0, %v5251_v49  ;;  %5219 = vst.msk [vmem:[#allocation3 + $0x58] sm:$0xff] %vm736_vm7, %v5183_v57  ;;  %v5181_v61 = vadd.f32 %v5145_v62, %v5028_v18  ;;  %v4644_v49 = vld [vmem:[#allocation3 + $0xa0] sm:$0xff] }
 0x1fb   : > { %v5041_v5 = vpop.f32.mrf.mxu0  ;;  %v5249_v39 = vld [vmem:[#allocation3 + $0x28] sm:$0xff]  ;;  %4709 = vst.msk [vmem:[#allocation3 + $0x68] sm:$0xff] %vm736_vm7, %v4673_v59  ;;  %v4678_v47 = vadd.f32 %v6779_v63, %v4642_v4  ;;  %v4545_v6 = vpop.f32.mrf.mxu1 }
 0x1fc   : > { %7055 = vpow2.f32 %v6214_v48  ;;  %v6217_v7 = vmul.f32 -1.442695, %v8193_v56  ;;  %v8199_v1 = vadd.f32 %v8152_v0, %v5249_v39  ;;  %5217 = vst.msk [vmem:[#allocation3 + $0x48] sm:$0xff] %vm736_vm7, %v5181_v61  ;;  %v5150_v10 = vld [vmem:[#allocation3 + $0x70] sm:$0xff]  ;;  %v4676_v2 = vadd.f32 %v4640_v17, %v4545_v6  ;;  %v4647_v17 = vld [vmem:[#allocation3 + $0xb8] sm:$0xff] }
 0x1fd   : > { %v6814_v11 = vpop.f32.mrf.mxu0  ;;  %v5254_v12 = vld [vmem:[#allocation3 + $0x50] sm:$0xff]  ;;  %4714 = vst.msk [vmem:[#allocation3 + $0x90] sm:$0xff] %vm736_vm7, %v4678_v47  ;;  %v5186_v13 = vadd.f32 %v6813_v58, %v5150_v10  ;;  %v6780_v15 = vpop.f32.mrf.mxu1 }
 0x1fe   : > { %7057 = vpow2.f32 %v6217_v7  ;;  %v6215_v19 = vmul.f32 -1.442695, %v8199_v1  ;;  %v8205_v21 = vadd.f32 %v8152_v0, %v5254_v12  ;;  %4712 = vst.msk [vmem:[#allocation3 + $0x80] sm:$0xff] %vm736_vm7, %v4676_v2  ;;  %v5148_v22 = vld [vmem:[#allocation3 + $0x60] sm:$0xff]  ;;  %v4679_v9 = vadd.f32 %v6780_v15, %v4643_v16  ;;  %v4645_v15 = vld [vmem:[#allocation3 + $0xa8] sm:$0xff] }
 0x1ff   : > { %v5044_v50 = vpop.f32.mrf.mxu0  ;;  %v7046_v24 = vpop.eup %7045  ;;  %v5252_v14 = vld [vmem:[#allocation3 + $0x40] sm:$0xff]  ;;  %5222 = vst.msk [vmem:[#allocation3 + $0x70] sm:$0xff] %vm736_vm7, %v5186_v13  ;;  %v5184_v25 = vadd.f32 %v5148_v22, %v5041_v5 }
 0x200   : > { %v4548_v26 = vpop.f32.mrf.mxu1  ;;  %v5433_v28 = vadd.f32 1.0, %v7046_v24  ;;  %7059 = vpow2.f32 %v6215_v19  ;;  %v6220_v29 = vmul.f32 -1.442695, %v8205_v21  ;;  %v8211_v27 = vadd.f32 %v8152_v0, %v5252_v14  ;;  %4715 = vst.msk [vmem:[#allocation3 + $0x98] sm:$0xff] %vm736_vm7, %v4679_v9  ;;  %v5151_v60 = vld [vmem:[#allocation3 + $0x78] sm:$0xff] }
 0x201   : > { %v6817_v34 = vpop.f32.mrf.mxu0  ;;  %v7048_v30 = vpop.eup %7047  ;;  %v5255_v31 = vld [vmem:[#allocation3 + $0x58] sm:$0xff]  ;;  %5220 = vst.msk [vmem:[#allocation3 + $0x60] sm:$0xff] %vm736_vm7, %v5184_v25  ;;  %v5187_v33 = vadd.f32 %v6814_v11, %v5151_v60  ;;  %v4677_v32 = vadd.f32 %v4641_v36, %v4548_v26 }
 0x202   : > { %v6783_v37 = vpop.f32.mrf.mxu1  ;;  %7061 = vrcp.f32 %v5433_v28  ;;  %v5431_v38 = vadd.f32 1.0, %v7048_v30  ;;  %v6218_v41 = vmul.f32 -1.442695, %v8211_v27  ;;  %v8217_v43 = vadd.f32 %v8152_v0, %v5255_v31  ;;  %v5149_v44 = vld [vmem:[#allocation3 + $0x68] sm:$0xff]  ;;  %v4650_v28 = vld [vmem:[#allocation3 + $0xd0] sm:$0xff] }
 0x203   : > { %v5057_v46 = vpop.f32.mrf.mxu0  ;;  %v7050_v18 = vpop.eup %7049  ;;  %7063 = vpow2.f32 %v6220_v29  ;;  %v5253_v51 = vld [vmem:[#allocation3 + $0x48] sm:$0xff]  ;;  %5223 = vst.msk [vmem:[#allocation3 + $0x78] sm:$0xff] %vm736_vm7, %v5187_v33  ;;  %4713 = vst.msk [vmem:[#allocation3 + $0x88] sm:$0xff] %vm736_vm7, %v4677_v32  ;;  %v5185_v52 = vadd.f32 %v5149_v44, %v5044_v50  ;;  %v4682_v53 = vadd.f32 %v6783_v37, %v4646_v40 }
 0x204   : > { %v4561_v55 = vpop.f32.mrf.mxu1  ;;  %7065 = vrcp.f32 %v5431_v38  ;;  %v5434_v35 = vadd.f32 1.0, %v7050_v18  ;;  %v6221_v57 = vmul.f32 -1.442695, %v8217_v43  ;;  %v8223_v54 = vadd.f32 %v8152_v0, %v5253_v51  ;;  %v5154_v58 = vld [vmem:[#allocation3 + $0x90] sm:$0xff] }
 0x205   : > { %v6818_v59 = vpop.f32.mrf.mxu0  ;;  %v7052_v62 = vpop.eup %7051  ;;  %7067 = vpow2.f32 %v6218_v41  ;;  %5221 = vst.msk [vmem:[#allocation3 + $0x68] sm:$0xff] %vm736_vm7, %v5185_v52  ;;  %4718 = vst.msk [vmem:[#allocation3 + $0xb0] sm:$0xff] %vm736_vm7, %v4682_v53  ;;  %v5190_v63 = vadd.f32 %v6817_v34, %v5154_v58  ;;  %v4680_v48 = vadd.f32 %v4644_v49, %v4561_v55  ;;  %v5152_v61 = vld [vmem:[#allocation3 + $0x80] sm:$0xff]  ;;  %v4651_v58 = vld [vmem:[#allocation3 + $0xd8] sm:$0xff] }
 0x206   : > { %v6784_v4 = vpop.f32.mrf.mxu1  ;;  %7069 = vrcp.f32 %v5434_v35  ;;  %v5432_v5 = vadd.f32 1.0, %v7052_v62  ;;  %v6219_v39 = vmul.f32 -1.442695, %v8223_v54  ;;  %v5258_v47 = vld [vmem:[#allocation3 + $0x70] sm:$0xff]  ;;  %v5188_v6 = vadd.f32 %v5152_v61, %v5057_v46  ;;  %v4648_v41 = vld [vmem:[#allocation3 + $0xc0] sm:$0xff] }
 0x207   : > { %v5060_v7 = vpop.f32.mrf.mxu0  ;;  %v7054_v10 = vpop.eup %7053  ;;  %7071 = vpow2.f32 %v6221_v57  ;;  %v8229_v2 = vadd.f32 %v8152_v0, %v5258_v47  ;;  %5226 = vst.msk [vmem:[#allocation3 + $0x90] sm:$0xff] %vm736_vm7, %v5190_v63  ;;  %4716 = vst.msk [vmem:[#allocation3 + $0xa0] sm:$0xff] %vm736_vm7, %v4680_v48  ;;  %v4683_v11 = vadd.f32 %v6784_v4, %v4647_v17  ;;  %v5155_v12 = vld [vmem:[#allocation3 + $0x98] sm:$0xff]  ;;  %v4649_v17 = vld [vmem:[#allocation3 + $0xc8] sm:$0xff] }
 0x208   : > { %v4564_v13 = vpop.f32.mrf.mxu1  ;;  %7073 = vrcp.f32 %v5432_v5  ;;  %v5437_v16 = vadd.f32 1.0, %v7054_v10  ;;  %v5256_v19 = vld [vmem:[#allocation3 + $0x60] sm:$0xff]  ;;  %5224 = vst.msk [vmem:[#allocation3 + $0x80] sm:$0xff] %vm736_vm7, %v5188_v6  ;;  %v5191_v22 = vadd.f32 %v6818_v59, %v5155_v12 }
 0x209   : > { %v4681_v9 = vadd.f32 %v4645_v15, %v4564_v13  ;;  %v6821_v50 = vpop.f32.mrf.mxu0  ;;  %v7056_v24 = vpop.eup %7055  ;;  %7075 = vpow2.f32 %v6219_v39  ;;  %v6224_v14 = vmul.f32 -1.442695, %v8229_v2  ;;  %v8236_v25 = vadd.f32 %v8152_v0, %v5256_v19  ;;  %4719 = vst.msk [vmem:[#allocation3 + $0xb8] sm:$0xff] %vm736_vm7, %v4683_v11 }
 0x20a   : > { %v6787_v26 = vpop.f32.mrf.mxu1  ;;  %7077 = vrcp.f32 %v5437_v16  ;;  %v5435_v29 = vadd.f32 1.0, %v7056_v24  ;;  %v5259_v60 = vld [vmem:[#allocation3 + $0x78] sm:$0xff]  ;;  %5227 = vst.msk [vmem:[#allocation3 + $0x98] sm:$0xff] %vm736_vm7, %v5191_v22  ;;  %v5153_v36 = vld [vmem:[#allocation3 + $0x88] sm:$0xff] }
 0x20b   : > { %4717 = vst.msk [vmem:[#allocation3 + $0xa8] sm:$0xff] %vm736_vm7, %v4681_v9  ;;  %v4686_v34 = vadd.f32 %v6787_v26, %v4650_v28  ;;  %v5073_v30 = vpop.f32.mrf.mxu0  ;;  %v7058_v31 = vpop.eup %7057  ;;  %7079 = vpow2.f32 %v6224_v14  ;;  %v6222_v33 = vmul.f32 -1.442695, %v8236_v25  ;;  %v8243_v32 = vadd.f32 %v8152_v0, %v5259_v60 }
 0x20c   : > { %v5189_v37 = vadd.f32 %v5153_v36, %v5060_v7  ;;  %v4577_v38 = vpop.f32.mrf.mxu1  ;;  %7081 = vrcp.f32 %v5435_v29  ;;  %v5438_v44 = vadd.f32 1.0, %v7058_v31  ;;  %v5257_v40 = vld [vmem:[#allocation3 + $0x68] sm:$0xff]  ;;  %v5158_v46 = vld [vmem:[#allocation3 + $0xb0] sm:$0xff] }
 0x20d   : > { %4722 = vst.msk [vmem:[#allocation3 + $0xd0] sm:$0xff] %vm736_vm7, %v4686_v34  ;;  %v4684_v18 = vadd.f32 %v4648_v41, %v4577_v38  ;;  %v6822_v51 = vpop.f32.mrf.mxu0  ;;  %v7060_v52 = vpop.eup %7059  ;;  %7083 = vpow2.f32 %v6222_v33  ;;  %v6225_v53 = vmul.f32 -1.442695, %v8243_v32  ;;  %v8249_v55 = vadd.f32 %v8152_v0, %v5257_v40  ;;  %v4654_v36 = vld [vmem:[#allocation3 + $0xf0] sm:$0xff] }
 0x20e   : > { %5225 = vst.msk [vmem:[#allocation3 + $0x88] sm:$0xff] %vm736_vm7, %v5189_v37  ;;  %v5194_v35 = vadd.f32 %v6821_v50, %v5158_v46  ;;  %v6788_v57 = vpop.f32.mrf.mxu1  ;;  %7085 = vrcp.f32 %v5438_v44  ;;  %v5436_v49 = vadd.f32 1.0, %v7060_v52  ;;  %v5262_v59 = vld [vmem:[#allocation3 + $0x90] sm:$0xff]  ;;  %v5156_v62 = vld [vmem:[#allocation3 + $0xa0] sm:$0xff] }
 0x20f   : > { %4720 = vst.msk [vmem:[#allocation3 + $0xc0] sm:$0xff] %vm736_vm7, %v4684_v18  ;;  %v4687_v63 = vadd.f32 %v6788_v57, %v4651_v58  ;;  %v5076_v48 = vpop.f32.mrf.mxu0  ;;  %v7062_v61 = vpop.eup %7061  ;;  %7087 = vpow2.f32 %v6225_v53  ;;  %v6223_v4 = vmul.f32 -1.442695, %v8249_v55  ;;  %v8255_v5 = vadd.f32 %v8152_v0, %v5262_v59  ;;  %v5260_v39 = vld [vmem:[#allocation3 + $0x80] sm:$0xff] }
 0x210   : > { %5230 = vst.msk [vmem:[#allocation3 + $0xb0] sm:$0xff] %vm736_vm7, %v5194_v35  ;;  %v5192_v47 = vadd.f32 %v5156_v62, %v5073_v30  ;;  %v4580_v6 = vpop.f32.mrf.mxu1  ;;  %v7064_v7 = vpop.eup %7063  ;;  %v5541_v10 = vmul.f32 %v7062_v61, %v8157_v8  ;;  %7089 = vrcp.f32 %v5436_v49  ;;  %v8260_v11 = vadd.f32 %v8152_v0, %v5260_v39  ;;  %v5159_v12 = vld [vmem:[#allocation3 + $0xb8] sm:$0xff]  ;;  %v4652_v58 = vld [vmem:[#allocation3 + $0xe0] sm:$0xff] }
 0x211   : > { %4723 = vst.msk [vmem:[#allocation3 + $0xd8] sm:$0xff] %vm736_vm7, %v4687_v63  ;;  %v4685_v13 = vadd.f32 %v4649_v17, %v4580_v6  ;;  %v6825_v15 = vpop.f32.mrf.mxu0  ;;  %v7066_v16 = vpop.eup %7065  ;;  %v5441_v19 = vadd.f32 1.0, %v7064_v7  ;;  %7091 = vpow2.f32 %v6223_v4  ;;  %v6228_v8 = vmul.f32 -1.442695, %v8255_v5  ;;  %v5263_v22 = vld [vmem:[#allocation3 + $0x98] sm:$0xff] }
 0x212   : > { %5228 = vst.msk [vmem:[#allocation3 + $0xa0] sm:$0xff] %vm736_vm7, %v5192_v47  ;;  %v5195_v9 = vadd.f32 %v6822_v51, %v5159_v12  ;;  %v5157_v50 = vld [vmem:[#allocation3 + $0xa8] sm:$0xff]  ;;  %v6791_v24 = vpop.f32.mrf.mxu1  ;;  %v7068_v14 = vpop.eup %7067  ;;  %v6288_v26 = vpack.c.bf16 %v5541_v10, %v5541_v10  ;;  %v5539_v28 = vmul.f32 %v7066_v16, %v8163_v20  ;;  %v6226_v29 = vmul.f32 -1.442695, %v8260_v11 }
 0x213   : > { %v8275_v60 = vadd.f32 %v8152_v0, %v5263_v22  ;;  %4721 = vst.msk [vmem:[#allocation3 + $0xc8] sm:$0xff] %vm736_vm7, %v4685_v13  ;;  %v5089_v34 = vpop.f32.mrf.mxu0  ;;  %v7070_v30 = vpop.eup %7069  ;;  %7093 = vrcp.f32 %v5441_v19  ;;  %v5439_v31 = vadd.f32 1.0, %v7068_v14  ;;  %v5193_v33 = vadd.f32 %v5157_v50, %v5076_v48  ;;  %v4655_v50 = vld [vmem:[#allocation3 + $0xf8] sm:$0xff] }
 0x214   : > { %5231 = vst.msk [vmem:[#allocation3 + $0xb8] sm:$0xff] %vm736_vm7, %v5195_v9  ;;  %v4690_v37 = vadd.f32 %v6791_v24, %v4654_v36  ;;  %v5162_v38 = vld [vmem:[#allocation3 + $0xd0] sm:$0xff]  ;;  %v4593_v41 = vpop.f32.mrf.mxu1  ;;  %v7072_v44 = vpop.eup %7071  ;;  %v6286_v20 = vpack.c.bf16 %v5539_v28, %v5539_v28  ;;  %v5542_v40 = vmul.f32 %v7070_v30, %v8169_v3  ;;  %7095 = vpow2.f32 %v6228_v8 }
 0x215   : > { %5722 = vst.msk [vmem:[%s8268_s28 + $0x8] sm:$0xf] %vm5719_vm10, %v6288_v26  ;;  %v6229_v46 = vmul.f32 -1.442695, %v8275_v60  ;;  %v5261_v18 = vld [vmem:[#allocation3 + $0x88] sm:$0xff]  ;;  %v8283_v51 = vpop.f32.mrf.mxu0  ;;  %v7074_v52 = vpop.eup %7073  ;;  %7097 = vrcp.f32 %v5439_v31  ;;  %v5442_v53 = vadd.f32 1.0, %v7072_v44  ;;  %v5198_v57 = vadd.f32 %v6825_v15, %v5162_v38 }
 0x216   : > { %v8286_v35 = vadd.f32 %v8152_v0, %v5261_v18  ;;  %5229 = vst.msk [vmem:[#allocation3 + $0xa8] sm:$0xff] %vm736_vm7, %v5193_v33  ;;  %4726 = vst.msk [vmem:[#allocation3 + $0xf0] sm:$0xff] %vm736_vm7, %v4690_v37  ;;  %v5160_v3 = vld [vmem:[#allocation3 + $0xc0] sm:$0xff]  ;;  %v6792_v49 = vpop.f32.mrf.mxu1  ;;  %v7076_v59 = vpop.eup %7075  ;;  %v6289_v62 = vpack.c.bf16 %v5542_v40, %v5542_v40  ;;  %v5540_v63 = vmul.f32 %v7074_v52, %v8175_v23  ;;  %7099 = vpow2.f32 %v6226_v29 }
 0x217   : > { %5720 = vst.msk [vmem:[%s8268_s28] sm:$0xf] %vm5719_vm10, %v6286_v20  ;;  %v5266_v48 = vld [vmem:[#allocation3 + $0xb0] sm:$0xff]  ;;  %v4688_v61 = vadd.f32 %v4652_v58, %v4593_v41  ;;  %v8293_v4 = vpop.f32.mrf.mxu0  ;;  %v7078_v39 = vpop.eup %7077  ;;  %7101 = vrcp.f32 %v5442_v53  ;;  %v5440_v47 = vadd.f32 1.0, %v7076_v59  ;;  %v5196_v15 = vadd.f32 %v5160_v3, %v5089_v34  ;;  %v4653_v58 = vld [vmem:[#allocation3 + $0xe8] sm:$0xff] }
 0x218   : > { %v6227_v6 = vmul.f32 -1.442695, %v8286_v35  ;;  %v8297_v17 = vadd.f32 %v8152_v0, %v5266_v48  ;;  %5234 = vst.msk [vmem:[#allocation3 + $0xd0] sm:$0xff] %vm736_vm7, %v5198_v57  ;;  %v4596_v7 = vpop.f32.mrf.mxu1  ;;  %v7080_v10 = vpop.eup %7079  ;;  %v6287_v23 = vpack.c.bf16 %v5540_v63, %v5540_v63  ;;  %v5545_v12 = vmul.f32 %v7078_v39, %v8181_v45  ;;  %v5163_v24 = vld [vmem:[#allocation3 + $0xd8] sm:$0xff] }
 0x219   : > { %5723 = vst.msk [vmem:[%s8268_s28 + $0xc] sm:$0xf] %vm5719_vm10, %v6289_v62  ;;  %7103 = vpow2.f32 %v6229_v46  ;;  %v5264_v13 = vld [vmem:[#allocation3 + $0xa0] sm:$0xff]  ;;  %v8304_v16 = vpop.f32.mrf.mxu0  ;;  %v7082_v19 = vpop.eup %7081  ;;  %v5445_v8 = vadd.f32 1.0, %v7080_v10  ;;  %v4691_v36 = vadd.f32 %v6792_v49, %v4655_v50  ;;  %v5199_v40 = vadd.f32 %v8283_v51, %v5163_v24 }
 0x21a   : > { %4724 = vst.msk [vmem:[#allocation3 + $0xe0] sm:$0xff] %vm736_vm7, %v4688_v61  ;;  %7105 = vrcp.f32 %v5440_v47  ;;  %v6232_v22 = vmul.f32 -1.442695, %v8297_v17  ;;  %v8308_v9 = vadd.f32 %v8152_v0, %v5264_v13  ;;  %v6795_v14 = vpop.f32.mrf.mxu1  ;;  %v7084_v26 = vpop.eup %7083  ;;  %v6292_v45 = vpack.c.bf16 %v5545_v12, %v5545_v12  ;;  %5232 = vst.msk [vmem:[#allocation3 + $0xc0] sm:$0xff] %vm736_vm7, %v5196_v15  ;;  %v5161_v3 = vld [vmem:[#allocation3 + $0xc8] sm:$0xff]  ;;  %v4656_v24 = vld [vmem:[#allocation3 + $0x100] sm:$0xff] }
 0x21b   : > { %5721 = vst.msk [vmem:[%s8268_s28 + $0x4] sm:$0xf] %vm5719_vm10, %v6287_v23  ;;  %v5543_v28 = vmul.f32 %v7082_v19, %v8187_v42  ;;  %7107 = vpow2.f32 %v6227_v6  ;;  %v5267_v29 = vld [vmem:[#allocation3 + $0xb8] sm:$0xff]  ;;  %v8314_v34 = vpop.f32.mrf.mxu0  ;;  %v7086_v30 = vpop.eup %7085  ;;  %v5443_v31 = vadd.f32 1.0, %v7084_v26  ;;  %v4689_v62 = vadd.f32 %v4653_v58, %v4596_v7  ;;  %v4658_v6 = vld [vmem:[#allocation3 + $0x110] sm:$0xff] }
 0x21c   : > { %7109 = vrcp.f32 %v5445_v8  ;;  %v6230_v33 = vmul.f32 -1.442695, %v8308_v9  ;;  %v8318_v37 = vadd.f32 %v8152_v0, %v5267_v29  ;;  %v4609_v38 = vpop.f32.mrf.mxu1  ;;  %v7088_v41 = vpop.eup %7087  ;;  %5726 = vst.msk [vmem:[%s8268_s28 + $0x18] sm:$0xf] %vm5719_vm10, %v6292_v45  ;;  %v5546_v44 = vmul.f32 %v7086_v30, %v8193_v56  ;;  %v4659_v30 = vld [vmem:[#allocation3 + $0x118] sm:$0xff] }
 0x21d   : > { %v6290_v42 = vpack.c.bf16 %v5543_v28, %v5543_v28  ;;  %7111 = vpow2.f32 %v6232_v22  ;;  %v5265_v20 = vld [vmem:[#allocation3 + $0xa8] sm:$0xff]  ;;  %4727 = vst.msk [vmem:[#allocation3 + $0xf8] sm:$0xff] %vm736_vm7, %v4691_v36  ;;  %v8325_v46 = vpop.f32.mrf.mxu0  ;;  %v7090_v18 = vpop.eup %7089  ;;  %v5446_v52 = vadd.f32 1.0, %v7088_v41  ;;  %5235 = vst.msk [vmem:[#allocation3 + $0xd8] sm:$0xff] %vm736_vm7, %v5199_v40  ;;  %v5166_v63 = vld [vmem:[#allocation3 + $0xf0] sm:$0xff]  ;;  %v5197_v7 = vadd.f32 %v5161_v3, %v8293_v4 }
 0x21e   : > { %7113 = vrcp.f32 %v5443_v31  ;;  %v6233_v53 = vmul.f32 -1.442695, %v8318_v37  ;;  %v8329_v57 = vadd.f32 %v8152_v0, %v5265_v20  ;;  %v7092_v49 = vpop.eup %7091  ;;  %v6293_v56 = vpack.c.bf16 %v5546_v44, %v5546_v44  ;;  %v6796_v48 = vpop.f32.mrf.mxu1  ;;  %4725 = vst.msk [vmem:[#allocation3 + $0xe8] sm:$0xff] %vm736_vm7, %v4689_v62  ;;  %v4657_v20 = vld [vmem:[#allocation3 + $0x108] sm:$0xff] }
 0x21f   : > { %5724 = vst.msk [vmem:[%s8268_s28 + $0x10] sm:$0xf] %vm5719_vm10, %v6290_v42  ;;  %v5544_v59 = vmul.f32 %v7090_v18, %v8199_v1  ;;  %7115 = vpow2.f32 %v6230_v33  ;;  %v5270_v51 = vld [vmem:[#allocation3 + $0xd0] sm:$0xff]  ;;  %v5444_v61 = vadd.f32 1.0, %v7092_v49  ;;  %v8339_v10 = vpop.f32.mrf.mxu0  ;;  %v4694_v12 = vadd.f32 %v6795_v14, %v4658_v6 }
 0x220   : > { %7117 = vrcp.f32 %v5446_v52  ;;  %v6231_v39 = vmul.f32 -1.442695, %v8329_v57  ;;  %v8337_v47 = vadd.f32 %v8152_v0, %v5270_v51  ;;  %v7094_v23 = vpop.eup %7093  ;;  %5727 = vst.msk [vmem:[%s8268_s28 + $0x1c] sm:$0xf] %vm5719_vm10, %v6293_v56  ;;  %v5202_v50 = vadd.f32 %v8304_v16, %v5166_v63  ;;  %v4612_v4 = vpop.f32.mrf.mxu1 }
 0x221   : > { %v6291_v1 = vpack.c.bf16 %v5544_v59, %v5544_v59  ;;  %7119 = vpow2.f32 %v6233_v53  ;;  %v5164_v13 = vld [vmem:[#allocation3 + $0xe0] sm:$0xff]  ;;  %v7096_v15 = vpop.eup %7095  ;;  %v5549_v19 = vmul.f32 %v7094_v23, %v8205_v21  ;;  %5233 = vst.msk [vmem:[#allocation3 + $0xc8] sm:$0xff] %vm736_vm7, %v5197_v7  ;;  %4730 = vst.msk [vmem:[#allocation3 + $0x110] sm:$0xff] %vm736_vm7, %v4694_v12  ;;  %v4692_v21 = vadd.f32 %v4656_v24, %v4609_v38  ;;  %v6833_v33 = vpop.f32.mrf.mxu0 }
 0x222   : > { %7121 = vrcp.f32 %v5444_v61  ;;  %v6236_v8 = vmul.f32 -1.442695, %v8337_v47  ;;  %v5268_v22 = vld [vmem:[#allocation3 + $0xc0] sm:$0xff]  ;;  %v7098_v26 = vpop.eup %7097  ;;  %v5449_v45 = vadd.f32 1.0, %v7096_v15  ;;  %5238 = vst.msk [vmem:[#allocation3 + $0xf0] sm:$0xff] %vm736_vm7, %v5202_v50  ;;  %v5200_v36 = vadd.f32 %v5164_v13, %v8314_v34 }
 0x223   : > { %5725 = vst.msk [vmem:[%s8268_s28 + $0x14] sm:$0xf] %vm5719_vm10, %v6291_v1  ;;  %7123 = vpow2.f32 %v6231_v39  ;;  %v8351_v28 = vadd.f32 %v8152_v0, %v5268_v22  ;;  %v7100_v14 = vpop.eup %7099  ;;  %v6296_v29 = vpack.c.bf16 %v5549_v19, %v5549_v19  ;;  %v5547_v16 = vmul.f32 %v7098_v26, %v8211_v27  ;;  %v5121_v51 = vpop.f32.mrf.mxu0 }
 0x224   : > { %7125 = vpow2.f32 %v6236_v8  ;;  %v5167_v31 = vld [vmem:[#allocation3 + $0xf8] sm:$0xff]  ;;  %v7102_v41 = vpop.eup %7101  ;;  %v5447_v42 = vadd.f32 1.0, %v7100_v14  ;;  %4728 = vst.msk [vmem:[#allocation3 + $0x100] sm:$0xff] %vm736_vm7, %v4692_v21  ;;  %v4695_v38 = vadd.f32 %v6796_v48, %v4659_v30  ;;  %5236 = vst.msk [vmem:[#allocation3 + $0xe0] sm:$0xff] %vm736_vm7, %v5200_v36  ;;  %v4693_v53 = vadd.f32 %v4657_v20, %v4612_v4 }
 0x225   : > { %7127 = vrcp.f32 %v5449_v45  ;;  %v6234_v44 = vmul.f32 -1.442695, %v8351_v28  ;;  %5730 = vst.msk [vmem:[%s8268_s28 + $0x28] sm:$0xf] %vm5719_vm10, %v6296_v29  ;;  %v6294_v27 = vpack.c.bf16 %v5547_v16, %v5547_v16  ;;  %v5550_v18 = vmul.f32 %v7102_v41, %v8217_v43  ;;  %v5271_v34 = vld [vmem:[#allocation3 + $0xd8] sm:$0xff]  ;;  %v6834_v24 = vpop.f32.mrf.mxu0 }
 0x226   : > { %v7104_v40 = vpop.eup %7103  ;;  %v5203_v52 = vadd.f32 %v8325_v46, %v5167_v31  ;;  %7129 = vrcp.f32 %v5447_v42  ;;  %v8366_v49 = vadd.f32 %v8152_v0, %v5271_v34  ;;  %4731 = vst.msk [vmem:[#allocation3 + $0x118] sm:$0xff] %vm736_vm7, %v4695_v38  ;;  %4729 = vst.msk [vmem:[#allocation3 + $0x108] sm:$0xff] %vm736_vm7, %v4693_v53  ;;  %v5165_v46 = vld [vmem:[#allocation3 + $0xe8] sm:$0xff] }
 0x227   : > { %v7106_v58 = vpop.eup %7105  ;;  %v5450_v3 = vadd.f32 1.0, %v7104_v40  ;;  %5728 = vst.msk [vmem:[%s8268_s28 + $0x20] sm:$0xf] %vm5719_vm10, %v6294_v27  ;;  %v6297_v59 = vpack.c.bf16 %v5550_v18, %v5550_v18  ;;  %7131 = vpow2.f32 %v6234_v44  ;;  %v5201_v61 = vadd.f32 %v5165_v46, %v8339_v10  ;;  %v5124_v18 = vpop.f32.mrf.mxu0 }
 0x228   : > { %v7108_v56 = vpop.eup %7107  ;;  %v5548_v43 = vmul.f32 %v7106_v58, %v8223_v54  ;;  %5239 = vst.msk [vmem:[#allocation3 + $0xf8] sm:$0xff] %vm736_vm7, %v5203_v52  ;;  %v6237_v48 = vmul.f32 -1.442695, %v8366_v49  ;;  %v5269_v23 = vld [vmem:[#allocation3 + $0xc8] sm:$0xff]  ;;  %v5170_v1 = vld [vmem:[#allocation3 + $0x110] sm:$0xff] }
 0x229   : > { %v7110_v62 = vpop.eup %7109  ;;  %7133 = vrcp.f32 %v5450_v3  ;;  %v5448_v63 = vadd.f32 1.0, %v7108_v56  ;;  %5731 = vst.msk [vmem:[%s8268_s28 + $0x2c] sm:$0xf] %vm5719_vm10, %v6297_v59  ;;  %v8380_v13 = vadd.f32 %v8152_v0, %v5269_v23  ;;  %v5274_v15 = vld [vmem:[#allocation3 + $0xf0] sm:$0xff]  ;;  %v5206_v19 = vadd.f32 %v6833_v33, %v5170_v1 }
 0x22a   : > { %v7112_v39 = vpop.eup %7111  ;;  %v6295_v6 = vpack.c.bf16 %v5548_v43, %v5548_v43  ;;  %v5553_v54 = vmul.f32 %v7110_v62, %v8229_v2  ;;  %5237 = vst.msk [vmem:[#allocation3 + $0xe8] sm:$0xff] %vm736_vm7, %v5201_v61  ;;  %v8387_v2 = vadd.f32 %v8152_v0, %v5274_v15 }
 0x22b   : > { %v7114_v7 = vpop.eup %7113  ;;  %7135 = vrcp.f32 %v5448_v63  ;;  %v5453_v12 = vadd.f32 1.0, %v7112_v39  ;;  %v5168_v50 = vld [vmem:[#allocation3 + $0x100] sm:$0xff]  ;;  %v6235_v21 = vmul.f32 -1.442695, %v8380_v13  ;;  %5242 = vst.msk [vmem:[#allocation3 + $0x110] sm:$0xff] %vm736_vm7, %v5206_v19 }
 0x22c   : > { %v7116_v8 = vpop.eup %7115  ;;  %5729 = vst.msk [vmem:[%s8268_s28 + $0x24] sm:$0xf] %vm5719_vm10, %v6295_v6  ;;  %v6300_v10 = vpack.c.bf16 %v5553_v54, %v5553_v54  ;;  %v5551_v22 = vmul.f32 %v7114_v7, %v8236_v25  ;;  %7137 = vpow2.f32 %v6237_v48  ;;  %v5272_v4 = vld [vmem:[#allocation3 + $0xe0] sm:$0xff]  ;;  %v5204_v14 = vadd.f32 %v5168_v50, %v5121_v51 }
 0x22d   : > { %v7118_v26 = vpop.eup %7117  ;;  %7139 = vrcp.f32 %v5453_v12  ;;  %v5451_v45 = vadd.f32 1.0, %v7116_v8  ;;  %v6240_v36 = vmul.f32 -1.442695, %v8387_v2  ;;  %v8396_v30 = vadd.f32 %v8152_v0, %v5272_v4  ;;  %v5171_v31 = vld [vmem:[#allocation3 + $0x118] sm:$0xff]  ;;  %v5169_v38 = vld [vmem:[#allocation3 + $0x108] sm:$0xff] }
 0x22e   : > { %v7120_v29 = vpop.eup %7119  ;;  %5734 = vst.msk [vmem:[%s8268_s28 + $0x38] sm:$0xf] %vm5719_vm10, %v6300_v10  ;;  %v6298_v25 = vpack.c.bf16 %v5551_v22, %v5551_v22  ;;  %v5554_v16 = vmul.f32 %v7118_v26, %v8243_v32  ;;  %v5207_v44 = vadd.f32 %v6834_v24, %v5171_v31  ;;  %v5205_v58 = vadd.f32 %v5169_v38, %v5124_v18 }
 0x22f   : > { %v7122_v33 = vpop.eup %7121  ;;  %7141 = vrcp.f32 %v5451_v45  ;;  %v5454_v41 = vadd.f32 1.0, %v7120_v29  ;;  %v5275_v42 = vld [vmem:[#allocation3 + $0xf8] sm:$0xff]  ;;  %5240 = vst.msk [vmem:[#allocation3 + $0x100] sm:$0xff] %vm736_vm7, %v5204_v14  ;;  %v6238_v27 = vmul.f32 -1.442695, %v8396_v30 }
 0x230   : > { %v7124_v20 = vpop.eup %7123  ;;  %5732 = vst.msk [vmem:[%s8268_s28 + $0x30] sm:$0xf] %vm5719_vm10, %v6298_v25  ;;  %v6301_v40 = vpack.c.bf16 %v5554_v16, %v5554_v16  ;;  %v5552_v32 = vmul.f32 %v7122_v33, %v8249_v55  ;;  %7143 = vpow2.f32 %v6235_v21  ;;  %v8404_v53 = vadd.f32 %v8152_v0, %v5275_v42 }
 0x231   : > { %v7126_v34 = vpop.eup %7125  ;;  %7145 = vrcp.f32 %v5454_v41  ;;  %v5452_v52 = vadd.f32 1.0, %v7124_v20  ;;  %5243 = vst.msk [vmem:[#allocation3 + $0x118] sm:$0xff] %vm736_vm7, %v5207_v44  ;;  %v5273_v55 = vld [vmem:[#allocation3 + $0xe8] sm:$0xff]  ;;  %5241 = vst.msk [vmem:[#allocation3 + $0x108] sm:$0xff] %vm736_vm7, %v5205_v58 }
 0x232   : > { %v7128_v3 = vpop.eup %7127  ;;  %5735 = vst.msk [vmem:[%s8268_s28 + $0x3c] sm:$0xf] %vm5719_vm10, %v6301_v40  ;;  %v6299_v56 = vpack.c.bf16 %v5552_v32, %v5552_v32  ;;  %v5457_v59 = vadd.f32 1.0, %v7126_v34  ;;  %7147 = vpow2.f32 %v6240_v36  ;;  %v6241_v46 = vmul.f32 -1.442695, %v8404_v53  ;;  %v5278_v63 = vld [vmem:[#allocation3 + $0x110] sm:$0xff] }
 0x233   : > { %v5557_v43 = vmul.f32 %v7128_v3, %v8255_v5  ;;  %7149 = vrcp.f32 %v5452_v52  ;;  %v8412_v51 = vadd.f32 %v8152_v0, %v5273_v55  ;;  %v7130_v62 = vpop.eup %7129  ;;  %v7189_v0 = vld [vmem:[%s8504_s3] ss:$0 sm:$0xff] }
 0x234   : > { %5733 = vst.msk [vmem:[%s8268_s28 + $0x34] sm:$0xf] %vm5719_vm10, %v6299_v56  ;;  %7151 = vrcp.f32 %v5457_v59  ;;  %v7132_v48 = vpop.eup %7131  ;;  %v5555_v39 = vmul.f32 %v7130_v62, %v8260_v11  ;;  %v8422_v23 = vadd.f32 %v7189_v0, %v5278_v63 }
 0x235   : > { %v6304_v61 = vpack.c.bf16 %v5557_v43, %v5557_v43  ;;  %7153 = vpow2.f32 %v6238_v27  ;;  %v6239_v5 = vmul.f32 -1.442695, %v8412_v51  ;;  %v5455_v54 = vadd.f32 1.0, %v7132_v48 }
 0x236   : > { %v7134_v6 = vpop.eup %7133  ;;  %7155 = vpow2.f32 %v6241_v46  ;;  %v5276_v1 = vld [vmem:[#allocation3 + $0x100] sm:$0xff]  ;;  %v6302_v7 = vpack.c.bf16 %v5555_v39, %v5555_v39  ;;  %v6244_v19 = vmul.f32 -1.442695, %v8422_v23 }
 0x237   : > { %5738 = vst.msk [vmem:[%s8268_s28 + $0x48] sm:$0xf] %vm5719_vm10, %v6304_v61  ;;  %v5558_v12 = vmul.f32 %v7134_v6, %v8275_v60  ;;  %7157 = vpow2.f32 %v6239_v5  ;;  %v8427_v11 = vadd.f32 %v7189_v0, %v5276_v1 }
 0x238   : > { %v7136_v15 = vpop.eup %7135  ;;  %7159 = vrcp.f32 %v5455_v54  ;;  %v5279_v8 = vld [vmem:[#allocation3 + $0x118] sm:$0xff]  ;;  %5736 = vst.msk [vmem:[%s8268_s28 + $0x40] sm:$0xf] %vm5719_vm10, %v6302_v7  ;;  %v5277_v21 = vld [vmem:[#allocation3 + $0x108] sm:$0xff] }
 0x239   : > { %v7138_v10 = vpop.eup %7137  ;;  %v6305_v22 = vpack.c.bf16 %v5558_v12, %v5558_v12  ;;  %v5556_v50 = vmul.f32 %v7136_v15, %v8286_v35  ;;  %v6242_v24 = vmul.f32 -1.442695, %v8427_v11  ;;  %v8434_v26 = vadd.f32 %v7189_v0, %v5279_v8 }
 0x23a   : > { %v7140_v60 = vpop.eup %7139  ;;  %v5458_v45 = vadd.f32 1.0, %v7138_v10  ;;  %7161 = vpow2.f32 %v6244_v19  ;;  %v8440_v35 = vadd.f32 %v7189_v0, %v5277_v21 }
 0x23b   : > { %5739 = vst.msk [vmem:[%s8268_s28 + $0x4c] sm:$0xf] %vm5719_vm10, %v6305_v22  ;;  %v6303_v4 = vpack.c.bf16 %v5556_v50, %v5556_v50  ;;  %v5561_v14 = vmul.f32 %v7140_v60, %v8297_v17  ;;  %7163 = vpow2.f32 %v6242_v24  ;;  %v6245_v29 = vmul.f32 -1.442695, %v8434_v26 }
 0x23c   : > { %v7142_v25 = vpop.eup %7141  ;;  %7165 = vrcp.f32 %v5458_v45  ;;  %v6243_v42 = vmul.f32 -1.442695, %v8440_v35 }
 0x23d   : > { %v7144_v16 = vpop.eup %7143  ;;  %5737 = vst.msk [vmem:[%s8268_s28 + $0x44] sm:$0xf] %vm5719_vm10, %v6303_v4  ;;  %v6308_v36 = vpack.c.bf16 %v5561_v14, %v5561_v14  ;;  %v5559_v31 = vmul.f32 %v7142_v25, %v8308_v9  ;;  %7167 = vpow2.f32 %v6245_v29 }
 0x23e   : > { %v7146_v33 = vpop.eup %7145  ;;  %v5456_v41 = vadd.f32 1.0, %v7144_v16 }
 0x23f   : > { %v7148_v17 = vpop.eup %7147  ;;  %5742 = vst.msk [vmem:[%s8268_s28 + $0x58] sm:$0xf] %vm5719_vm10, %v6308_v36  ;;  %v6306_v44 = vpack.c.bf16 %v5559_v31, %v5559_v31  ;;  %v5562_v38 = vmul.f32 %v7146_v33, %v8318_v37 }
 0x240   : > { %v7150_v20 = vpop.eup %7149  ;;  %7169 = vrcp.f32 %v5456_v41  ;;  %v5461_v40 = vadd.f32 1.0, %v7148_v17 }
 0x241   : > { %v7152_v32 = vpop.eup %7151  ;;  %5740 = vst.msk [vmem:[%s8268_s28 + $0x50] sm:$0xf] %vm5719_vm10, %v6306_v44  ;;  %v6309_v9 = vpack.c.bf16 %v5562_v38, %v5562_v38  ;;  %v5560_v27 = vmul.f32 %v7150_v20, %v8329_v57  ;;  %7171 = vpow2.f32 %v6243_v42 }
 0x242   : > { %v7154_v18 = vpop.eup %7153  ;;  %v5565_v34 = vmul.f32 %v7152_v32, %v8337_v47  ;;  %7173 = vrcp.f32 %v5461_v40 }
 0x243   : > { %v7156_v52 = vpop.eup %7155  ;;  %5743 = vst.msk [vmem:[%s8268_s28 + $0x5c] sm:$0xf] %vm5719_vm10, %v6309_v9  ;;  %v6307_v37 = vpack.c.bf16 %v5560_v27, %v5560_v27  ;;  %v5459_v58 = vadd.f32 1.0, %v7154_v18 }
 0x244   : > { %v7158_v3 = vpop.eup %7157  ;;  %v6312_v56 = vpack.c.bf16 %v5565_v34, %v5565_v34  ;;  %v5462_v59 = vadd.f32 1.0, %v7156_v52 }
 0x245   : > { %v7160_v55 = vpop.eup %7159  ;;  %5741 = vst.msk [vmem:[%s8268_s28 + $0x54] sm:$0xf] %vm5719_vm10, %v6307_v37  ;;  %7175 = vrcp.f32 %v5459_v58  ;;  %v5460_v57 = vadd.f32 1.0, %v7158_v3 }
 0x246   : > { %5746 = vst.msk [vmem:[%s8268_s28 + $0x68] sm:$0xf] %vm5719_vm10, %v6312_v56  ;;  %v5563_v43 = vmul.f32 %v7160_v55, %v8351_v28  ;;  %7177 = vrcp.f32 %v5462_v59 }
 0x247   : > { %v7162_v47 = vpop.eup %7161  ;;  %7179 = vrcp.f32 %v5460_v57 }
 0x248   : > { %v7164_v46 = vpop.eup %7163  ;;  %v6310_v62 = vpack.c.bf16 %v5563_v43, %v5563_v43  ;;  %v5465_v63 = vadd.f32 1.0, %v7162_v47 }
 0x249   : > { %v7166_v48 = vpop.eup %7165  ;;  %v5463_v61 = vadd.f32 1.0, %v7164_v46 }
 0x24a   : > { %v7168_v39 = vpop.eup %7167  ;;  %5744 = vst.msk [vmem:[%s8268_s28 + $0x60] sm:$0xf] %vm5719_vm10, %v6310_v62  ;;  %v5566_v5 = vmul.f32 %v7166_v48, %v8366_v49  ;;  %7181 = vrcp.f32 %v5465_v63 }
 0x24b   : > { %7183 = vrcp.f32 %v5463_v61  ;;  %v5466_v6 = vadd.f32 1.0, %v7168_v39 }
 0x24c   : > { %v6313_v54 = vpack.c.bf16 %v5566_v5, %v5566_v5 }
 0x24d   : > { %v7170_v28 = vpop.eup %7169  ;;  %7185 = vrcp.f32 %v5466_v6 }
 0x24e   : > { %v7172_v0 = vpop.eup %7171  ;;  %5747 = vst.msk [vmem:[%s8268_s28 + $0x6c] sm:$0xf] %vm5719_vm10, %v6313_v54  ;;  %v5564_v1 = vmul.f32 %v7170_v28, %v8380_v13 }
 0x24f   : > { %v7174_v7 = vpop.eup %7173  ;;  %v5464_v12 = vadd.f32 1.0, %v7172_v0 }
 0x250   : > { %v6311_v15 = vpack.c.bf16 %v5564_v1, %v5564_v1  ;;  %v5569_v19 = vmul.f32 %v7174_v7, %v8387_v2 }
 0x251   : > { %7187 = vrcp.f32 %v5464_v12 }
 0x252   : > { %v7176_v49 = vpop.eup %7175  ;;  %5745 = vst.msk [vmem:[%s8268_s28 + $0x64] sm:$0xf] %vm5719_vm10, %v6311_v15  ;;  %v6316_v8 = vpack.c.bf16 %v5569_v19, %v5569_v19 }
 0x253   : > { %v7178_v10 = vpop.eup %7177  ;;  %v5567_v22 = vmul.f32 %v7176_v49, %v8396_v30 }
 0x254   : > { %v7180_v50 = vpop.eup %7179  ;;  %5750 = vst.msk [vmem:[%s8268_s28 + $0x78] sm:$0xf] %vm5719_vm10, %v6316_v8  ;;  %v5570_v13 = vmul.f32 %v7178_v10, %v8404_v53 }
 0x255   : > { %v6314_v24 = vpack.c.bf16 %v5567_v22, %v5567_v22  ;;  %v5568_v2 = vmul.f32 %v7180_v50, %v8412_v51 }
 0x256   : > { %v6317_v60 = vpack.c.bf16 %v5570_v13, %v5570_v13 }
 0x257   : > { %v7182_v45 = vpop.eup %7181  ;;  %5748 = vst.msk [vmem:[%s8268_s28 + $0x70] sm:$0xf] %vm5719_vm10, %v6314_v24  ;;  %v6315_v21 = vpack.c.bf16 %v5568_v2, %v5568_v2 }
 0x258   : > { %v7184_v4 = vpop.eup %7183  ;;  %5751 = vst.msk [vmem:[%s8268_s28 + $0x7c] sm:$0xf] %vm5719_vm10, %v6317_v60  ;;  %v5573_v30 = vmul.f32 %v7182_v45, %v8422_v23 }
 0x259   : > { %5749 = vst.msk [vmem:[%s8268_s28 + $0x74] sm:$0xf] %vm5719_vm10, %v6315_v21  ;;  %v5571_v53 = vmul.f32 %v7184_v4, %v8427_v11 }
 0x25a   : > { %v7186_v14 = vpop.eup %7185  ;;  %v6320_v29 = vpack.c.bf16 %v5573_v30, %v5573_v30 }
 0x25b   : > { %v6318_v25 = vpack.c.bf16 %v5571_v53, %v5571_v53  ;;  %v5574_v51 = vmul.f32 %v7186_v14, %v8434_v26 }
 0x25c   : > { %5754 = vst.msk [vmem:[%s8268_s28 + $0x88] sm:$0xf] %vm5719_vm10, %v6320_v29 }
 0x25d   : > { %5752 = vst.msk [vmem:[%s8268_s28 + $0x80] sm:$0xf] %vm5719_vm10, %v6318_v25  ;;  %v6321_v16 = vpack.c.bf16 %v5574_v51, %v5574_v51 }
 0x25e   : > { %v7188_v36 = vpop.eup %7187 }
 0x25f   : > { %5755 = vst.msk [vmem:[%s8268_s28 + $0x8c] sm:$0xf] %vm5719_vm10, %v6321_v16  ;;  %v5572_v31 = vmul.f32 %v7188_v36, %v8440_v35 }
 0x261   : > { %v6319_v23 = vpack.c.bf16 %v5572_v31, %v5572_v31 }
 0x263   : > { %5753 = vst.msk [vmem:[%s8268_s28 + $0x84] sm:$0xf] %vm5719_vm10, %v6319_v23 }
 0x264 PF: > { %s14_s17 = sadd.s32 1, %s7212_s17   ;;  %s8506_s15 = smov %s7208_s16 }
 0x265   : > { %p11_p5 = scmp.ge.s32.totalorder %s14_s17, 4   ;;  %s8507_s16 = smov %s8509_s18 }
 0x267   :  { %13 = sbr.rel (!%p11_p5) target bundleno = 2 (0x2), region = 77 }

</bundles_post_ra>
